<compile_context>
chip_gen: v7x
topology: tpu7x:2x2x1
jax: 0.10.0
libtpu: 0.0.40
codegen_flags: <defaults>
</compile_context>

<pallas_src>
import jax
import jax.numpy as jnp
import numpy as np
from jax.experimental import pallas as pl
from jax.experimental.pallas import tpu as pltpu


# (kernel-row ky, input-row offset di) taps of ConvTranspose2d(k=4,s=2,p=1)
# per output-row parity py:
#   out[2h+0] uses ky=1 at input row h   and ky=3 at input row h-1
#   out[2h+1] uses ky=0 at input row h+1 and ky=2 at input row h
_ROW_TAPS = {0: ((1, 0), (3, -1)), 1: ((0, 1), (2, 0))}


def fused_decoder_kernel(x_ref, w1_ref, b1_ref, wtc_ref, btc_ref, o_ref,
                         xp_s, yp_s):
    """One batch element, both stages fused.

    x_ref  : (1, H, W, Cin)          un-padded input block
    w1_ref : (3, 3, Cin, Cmid)       3x3 conv weight
    b1_ref : (1, Cmid)
    wtc_ref: (4, 3, Cmid, 2*Cout)    deconv weight, column phases folded:
                                     [ky, dj+1] with dj in {-1, 0, +1}
    btc_ref: (1, 2*Cout)             deconv bias duplicated for both px phases
    o_ref  : (1, H, 2, W, 2*Cout)    == NHWC (1, 2H, 2W, Cout) in memory order
    xp_s   : VMEM (H+2, W+2, Cin)    zero-padded input scratch
    yp_s   : VMEM (H+2, W+2, Cmid)   zero-padded intermediate scratch
    """
    _, H, W, Cin = x_ref.shape
    Cmid = w1_ref.shape[-1]
    Cout2 = wtc_ref.shape[-1]            # 2 * Cout

    # ---- stage 0: in-kernel zero padding of the input (no wrapper jnp.pad) ----
    xp_s[...] = jnp.zeros_like(xp_s)
    xp_s[1:H + 1, 1:W + 1, :] = x_ref[0]

    # ---- stage 1: 3x3 conv (padding=1) + ReLU, f32 accumulation on the MXU ----
    acc = jnp.zeros((H * W, Cmid), jnp.float32)
    for kh in range(3):
        for kw in range(3):
            xs = xp_s[kh:kh + H, kw:kw + W, :].reshape(H * W, Cin)
            acc = acc + jnp.dot(xs, w1_ref[kh, kw],
                                preferred_element_type=jnp.float32)
    y = jnp.maximum(acc + b1_ref[...], 0.0).reshape(H, W, Cmid)

    # intermediate stays entirely in VMEM (zero border for stage 2's taps)
    yp_s[...] = jnp.zeros_like(yp_s)
    yp_s[1:H + 1, 1:W + 1, :] = y.astype(yp_s.dtype)

    # ---- stage 2: ConvTranspose2d(4, stride=2, padding=1) + ReLU ----
    # For each output-row parity py, both column phases are produced by one
    # matmul of width 2*Cout against the pre-concatenated weight wtc[ky, dj+1].
    for py in (0, 1):
        acc2 = jnp.zeros((H * W, Cout2), jnp.float32)
        for ky, di in _ROW_TAPS[py]:
            for dj in (-1, 0, 1):
                ys = yp_s[1 + di:1 + di + H, 1 + dj:1 + dj + W, :]
                acc2 = acc2 + jnp.dot(ys.reshape(H * W, Cmid),
                                      wtc_ref[ky, dj + 1],
                                      preferred_element_type=jnp.float32)
        r = jnp.maximum(acc2 + btc_ref[...], 0.0)
        o_ref[0, :, py, :, :] = r.reshape(H, W, Cout2).astype(o_ref.dtype)


def _prep_params(w1, b1, wt, bt):
    """Fold the deconv's two column phases (px) into the weight's output dim.

    wt: (4, 4, Cmid, Cout) indexed [ky, kx, Cmid, Cout] ->
        wt_cat: (4, 3, Cmid, 2*Cout) indexed [ky, dj+1], dj in {-1, 0, +1}:
          dj=-1: [ wt[:,3] | 0       ]   (only px=0 uses column offset -1)
          dj= 0: [ wt[:,1] | wt[:,2] ]
          dj=+1: [ 0       | wt[:,0] ]   (only px=1 uses column offset +1)
    """
    Cmid, Cout = wt.shape[2], wt.shape[3]
    z = jnp.zeros((4, Cmid, Cout), wt.dtype)
    w_m1 = jnp.concatenate([wt[:, 3], z], axis=-1)
    w_0 = jnp.concatenate([wt[:, 1], wt[:, 2]], axis=-1)
    w_p1 = jnp.concatenate([z, wt[:, 0]], axis=-1)
    wt_cat = jnp.stack([w_m1, w_0, w_p1], axis=1)          # (4, 3, Cmid, 2*Cout)
    bt_cat = jnp.concatenate([bt, bt]).reshape(1, 2 * Cout)
    return w1, b1.reshape(1, -1), wt_cat, bt_cat


def decoder_block_forward(x_nchw, params):
    """Forward pass of DecoderBlock(in, mid, out, is_deconv=True)."""
    w1, b1, wt, bt = params["w1"], params["b1"], params["wt"], params["bt"]
    x = jnp.transpose(x_nchw, (0, 2, 3, 1)).astype(jnp.float32)   # NCHW -> NHWC
    N, H, W, Cin = x.shape
    Cmid = w1.shape[-1]
    Cout = wt.shape[-1]
    w1p, b1p, wtc, btc = _prep_params(w1, b1, wt, bt)

    flops = 2 * N * H * W * (9 * Cin * Cmid + 12 * Cmid * 2 * Cout)
    bytes_accessed = 4 * (x.size + w1p.size + b1p.size + wtc.size + btc.size
                          + N * H * 2 * W * 2 * Cout)

    out5 = pl.pallas_call(
        fused_decoder_kernel,
        out_shape=jax.ShapeDtypeStruct((N, H, 2, W, 2 * Cout), x.dtype),
        grid=(N,),
        in_specs=[
            pl.BlockSpec((1, H, W, Cin), lambda n: (n, 0, 0, 0)),
            pl.BlockSpec((3, 3, Cin, Cmid), lambda n: (0, 0, 0, 0)),
            pl.BlockSpec((1, Cmid), lambda n: (0, 0)),
            pl.BlockSpec((4, 3, Cmid, 2 * Cout), lambda n: (0, 0, 0, 0)),
            pl.BlockSpec((1, 2 * Cout), lambda n: (0, 0)),
        ],
        out_specs=pl.BlockSpec((1, H, 2, W, 2 * Cout),
                               lambda n: (n, 0, 0, 0, 0)),
        scratch_shapes=[
            pltpu.VMEM((H + 2, W + 2, Cin), x.dtype),
            pltpu.VMEM((H + 2, W + 2, Cmid), x.dtype),
        ],
        compiler_params=pltpu.CompilerParams(
            dimension_semantics=("parallel",)),
        cost_estimate=pl.CostEstimate(flops=flops, transcendentals=0,
                                      bytes_accessed=bytes_accessed),
    )(x, w1p, b1p, wtc, btc)

    # (N, H, 2, W, 2*Cout) row-major == (N, 2H, 2W, Cout) row-major:
    z = out5.reshape(N, 2 * H, 2 * W, Cout)    # pure reshape, no data movement
    return jnp.transpose(z, (0, 3, 1, 2))      # NHWC -> NCHW


def init_params(key, in_ch, mid_ch, out_ch):
    """Deterministic synthetic weights in PyTorch shapes, converted for the kernel."""
    k1, k2, k3, k4 = jax.random.split(key, 4)
    w1_torch = jax.random.normal(k1, (mid_ch, in_ch, 3, 3), jnp.float32) * 0.1
    b1 = jax.random.normal(k2, (mid_ch,), jnp.float32) * 0.1
    wt_torch = jax.random.normal(k3, (mid_ch, out_ch, 4, 4), jnp.float32) * 0.1
    bt = jax.random.normal(k4, (out_ch,), jnp.float32) * 0.1
    params = {
        "w1": jnp.transpose(w1_torch, (2, 3, 1, 0)),  # (3, 3, Cin, Cmid)
        "b1": b1,
        "wt": jnp.transpose(wt_torch, (2, 3, 0, 1)),  # (4, 4, Cmid, Cout)
        "bt": bt,
    }
    return params, (w1_torch, b1, wt_torch, bt)


def reference_forward(x_nchw, w1_torch, b1, wt_torch, bt):
    """Pure-JAX reference matching the PyTorch semantics exactly."""
    x = jnp.transpose(x_nchw, (0, 2, 3, 1))
    w1 = jnp.transpose(w1_torch, (2, 3, 1, 0))  # HWIO
    y = jax.lax.conv_general_dilated(
        x, w1, window_strides=(1, 1), padding=((1, 1), (1, 1)),
        dimension_numbers=("NHWC", "HWIO", "NHWC")) + b1
    y = jnp.maximum(y, 0.0)
    # ConvTranspose2d == conv with lhs_dilation=stride, pad=k-1-p, spatially-flipped kernel
    wt = jnp.transpose(wt_torch, (2, 3, 0, 1))[::-1, ::-1]  # HWIO, I=Cmid, O=Cout
    z = jax.lax.conv_general_dilated(
        y, wt, window_strides=(1, 1), padding=((2, 2), (2, 2)),
        lhs_dilation=(2, 2),
        dimension_numbers=("NHWC", "HWIO", "NHWC")) + bt
    z = jnp.maximum(z, 0.0)
    return jnp.transpose(z, (0, 3, 1, 2))


if __name__ == "__main__":
    key = jax.random.PRNGKey(0)
    kx, kp = jax.random.split(key)
    N, Cin, H, W = 2, 4, 16, 16
    Cmid, Cout = 8, 4

    x = jax.random.normal(kx, (N, Cin, H, W), jnp.float32)  # NCHW like PyTorch
    params, torch_params = init_params(kp, Cin, Cmid, Cout)

    out = jax.jit(decoder_block_forward)(x, params)
    out = jax.block_until_ready(out)

    ref = reference_forward(x, *torch_params)
    assert out.shape == (N, Cout, 2 * H, 2 * W), out.shape
    err = float(np.max(np.abs(np.asarray(out) - np.asarray(ref))))
    assert np.allclose(np.asarray(out), np.asarray(ref), rtol=1e-4, atol=1e-4), err

    print("KERNEL_OK")
</pallas_src>

<mosaic_0001>
module attributes {stable_mosaic.version = 11 : i64} {
  func.func @fused_decoder_kernel(%arg0: i32, %arg1: memref<1x16x16x4xf32, #tpu.memory_space<vmem>>, %arg2: memref<3x3x4x8xf32, #tpu.memory_space<vmem>>, %arg3: memref<1x8xf32, #tpu.memory_space<vmem>>, %arg4: memref<4x3x8x8xf32, #tpu.memory_space<vmem>>, %arg5: memref<1x8xf32, #tpu.memory_space<vmem>>, %arg6: memref<1x16x2x16x8xf32, #tpu.memory_space<vmem>>, %arg7: memref<18x18x4xf32, #tpu.memory_space<vmem>>, %arg8: memref<18x18x8xf32, #tpu.memory_space<vmem>>) attributes {dimension_semantics = [#tpu.dimension_semantics<parallel>], iteration_bounds = array<i64: 2>, scalar_prefetch = 0 : i64, scratch_operands = 2 : i64, tpu.core_type = #tpu.core_type<tc>, window_params = [{transform_indices = @transform_0, window_bounds = array<i64: 1, 16, 16, 4>}, {pipeline_mode = #tpu.pipeline_mode<synchronous>, transform_indices = @transform_1, window_bounds = array<i64: 3, 3, 4, 8>}, {pipeline_mode = #tpu.pipeline_mode<synchronous>, transform_indices = @transform_2, window_bounds = array<i64: 1, 8>}, {pipeline_mode = #tpu.pipeline_mode<synchronous>, transform_indices = @transform_3, window_bounds = array<i64: 4, 3, 8, 8>}, {pipeline_mode = #tpu.pipeline_mode<synchronous>, transform_indices = @transform_4, window_bounds = array<i64: 1, 8>}, {transform_indices = @transform_5, window_bounds = array<i64: 1, 16, 2, 16, 8>}]} {
    %cst = arith.constant 0.000000e+00 : f32
    %0 = vector.broadcast %cst : f32 to vector<18x18x4xf32>
    %c0 = arith.constant 0 : index
    %c0_0 = arith.constant 0 : index
    %c0_1 = arith.constant 0 : index
    %1 = vector.load %arg7[%c0, %c0_0, %c0_1] : memref<18x18x4xf32, #tpu.memory_space<vmem>>, vector<18x18x4xf32>
    tpu.vector_store %arg7[%c0, %c0_0, %c0_1], %0 {strides = array<i32>} : memref<18x18x4xf32, #tpu.memory_space<vmem>>, vector<18x18x4xf32>,
    %c0_2 = arith.constant 0 : index
    %c0_3 = arith.constant 0 : index
    %c0_4 = arith.constant 0 : index
    %c0_5 = arith.constant 0 : index
    %2 = vector.load %arg1[%c0_2, %c0_3, %c0_4, %c0_5] : memref<1x16x16x4xf32, #tpu.memory_space<vmem>>, vector<1x16x16x4xf32>
    %3 = vector.shape_cast %2 : vector<1x16x16x4xf32> to vector<16x16x4xf32>
    %c1 = arith.constant 1 : index
    %c1_6 = arith.constant 1 : index
    %c0_7 = arith.constant 0 : index
    %4 = vector.load %arg7[%c1, %c1_6, %c0_7] : memref<18x18x4xf32, #tpu.memory_space<vmem>>, vector<16x16x4xf32>
    tpu.vector_store %arg7[%c1, %c1_6, %c0_7], %3 {strides = array<i32>} : memref<18x18x4xf32, #tpu.memory_space<vmem>>, vector<16x16x4xf32>,
    %cst_8 = arith.constant 0.000000e+00 : f32
    %5 = vector.broadcast %cst_8 : f32 to vector<256x8xf32>
    %c0_9 = arith.constant 0 : index
    %c0_10 = arith.constant 0 : index
    %c0_11 = arith.constant 0 : index
    %6 = vector.load %arg7[%c0_9, %c0_10, %c0_11] : memref<18x18x4xf32, #tpu.memory_space<vmem>>, vector<16x16x4xf32>
    %7 = vector.shape_cast %6 : vector<16x16x4xf32> to vector<256x4xf32>
    %c0_12 = arith.constant 0 : index
    %c0_13 = arith.constant 0 : index
    %c0_14 = arith.constant 0 : index
    %c0_15 = arith.constant 0 : index
    %8 = vector.load %arg2[%c0_12, %c0_13, %c0_14, %c0_15] : memref<3x3x4x8xf32, #tpu.memory_space<vmem>>, vector<1x1x4x8xf32>
    %9 = vector.shape_cast %8 : vector<1x1x4x8xf32> to vector<4x8xf32>
    %cst_16 = arith.constant dense<0.000000e+00> : vector<256x8xf32>
    %10 = tpu.matmul %7, %9, %cst_16 {dimension_numbers = #tpu.dot_dimension_numbers<[1], [0], [0], [1], [0, 0, 1, 1], [], []>} : vector<256x4xf32>, vector<4x8xf32>, vector<256x8xf32> -> vector<256x8xf32>
    %11 = arith.addf %5, %10 : vector<256x8xf32>
    %c0_17 = arith.constant 0 : index
    %c1_18 = arith.constant 1 : index
    %c0_19 = arith.constant 0 : index
    %12 = vector.load %arg7[%c0_17, %c1_18, %c0_19] : memref<18x18x4xf32, #tpu.memory_space<vmem>>, vector<16x16x4xf32>
    %13 = vector.shape_cast %12 : vector<16x16x4xf32> to vector<256x4xf32>
    %c0_20 = arith.constant 0 : index
    %c1_21 = arith.constant 1 : index
    %c0_22 = arith.constant 0 : index
    %c0_23 = arith.constant 0 : index
    %14 = vector.load %arg2[%c0_20, %c1_21, %c0_22, %c0_23] : memref<3x3x4x8xf32, #tpu.memory_space<vmem>>, vector<1x1x4x8xf32>
    %15 = vector.shape_cast %14 : vector<1x1x4x8xf32> to vector<4x8xf32>
    %cst_24 = arith.constant dense<0.000000e+00> : vector<256x8xf32>
    %16 = tpu.matmul %13, %15, %cst_24 {dimension_numbers = #tpu.dot_dimension_numbers<[1], [0], [0], [1], [0, 0, 1, 1], [], []>} : vector<256x4xf32>, vector<4x8xf32>, vector<256x8xf32> -> vector<256x8xf32>
    %17 = arith.addf %11, %16 : vector<256x8xf32>
    %c0_25 = arith.constant 0 : index
    %c2 = arith.constant 2 : index
    %c0_26 = arith.constant 0 : index
    %18 = vector.load %arg7[%c0_25, %c2, %c0_26] : memref<18x18x4xf32, #tpu.memory_space<vmem>>, vector<16x16x4xf32>
    %19 = vector.shape_cast %18 : vector<16x16x4xf32> to vector<256x4xf32>
    %c0_27 = arith.constant 0 : index
    %c2_28 = arith.constant 2 : index
    %c0_29 = arith.constant 0 : index
    %c0_30 = arith.constant 0 : index
    %20 = vector.load %arg2[%c0_27, %c2_28, %c0_29, %c0_30] : memref<3x3x4x8xf32, #tpu.memory_space<vmem>>, vector<1x1x4x8xf32>
    %21 = vector.shape_cast %20 : vector<1x1x4x8xf32> to vector<4x8xf32>
    %cst_31 = arith.constant dense<0.000000e+00> : vector<256x8xf32>
    %22 = tpu.matmul %19, %21, %cst_31 {dimension_numbers = #tpu.dot_dimension_numbers<[1], [0], [0], [1], [0, 0, 1, 1], [], []>} : vector<256x4xf32>, vector<4x8xf32>, vector<256x8xf32> -> vector<256x8xf32>
    %23 = arith.addf %17, %22 : vector<256x8xf32>
    %c1_32 = arith.constant 1 : index
    %c0_33 = arith.constant 0 : index
    %c0_34 = arith.constant 0 : index
    %24 = vector.load %arg7[%c1_32, %c0_33, %c0_34] : memref<18x18x4xf32, #tpu.memory_space<vmem>>, vector<16x16x4xf32>
    %25 = vector.shape_cast %24 : vector<16x16x4xf32> to vector<256x4xf32>
    %c1_35 = arith.constant 1 : index
    %c0_36 = arith.constant 0 : index
    %c0_37 = arith.constant 0 : index
    %c0_38 = arith.constant 0 : index
    %26 = vector.load %arg2[%c1_35, %c0_36, %c0_37, %c0_38] : memref<3x3x4x8xf32, #tpu.memory_space<vmem>>, vector<1x1x4x8xf32>
    %27 = vector.shape_cast %26 : vector<1x1x4x8xf32> to vector<4x8xf32>
    %cst_39 = arith.constant dense<0.000000e+00> : vector<256x8xf32>
    %28 = tpu.matmul %25, %27, %cst_39 {dimension_numbers = #tpu.dot_dimension_numbers<[1], [0], [0], [1], [0, 0, 1, 1], [], []>} : vector<256x4xf32>, vector<4x8xf32>, vector<256x8xf32> -> vector<256x8xf32>
    %29 = arith.addf %23, %28 : vector<256x8xf32>
    %c1_40 = arith.constant 1 : index
    %c1_41 = arith.constant 1 : index
    %c0_42 = arith.constant 0 : index
    %30 = vector.load %arg7[%c1_40, %c1_41, %c0_42] : memref<18x18x4xf32, #tpu.memory_space<vmem>>, vector<16x16x4xf32>
    %31 = vector.shape_cast %30 : vector<16x16x4xf32> to vector<256x4xf32>
    %c1_43 = arith.constant 1 : index
    %c1_44 = arith.constant 1 : index
    %c0_45 = arith.constant 0 : index
    %c0_46 = arith.constant 0 : index
    %32 = vector.load %arg2[%c1_43, %c1_44, %c0_45, %c0_46] : memref<3x3x4x8xf32, #tpu.memory_space<vmem>>, vector<1x1x4x8xf32>
    %33 = vector.shape_cast %32 : vector<1x1x4x8xf32> to vector<4x8xf32>
    %cst_47 = arith.constant dense<0.000000e+00> : vector<256x8xf32>
    %34 = tpu.matmul %31, %33, %cst_47 {dimension_numbers = #tpu.dot_dimension_numbers<[1], [0], [0], [1], [0, 0, 1, 1], [], []>} : vector<256x4xf32>, vector<4x8xf32>, vector<256x8xf32> -> vector<256x8xf32>
    %35 = arith.addf %29, %34 : vector<256x8xf32>
    %c1_48 = arith.constant 1 : index
    %c2_49 = arith.constant 2 : index
    %c0_50 = arith.constant 0 : index
    %36 = vector.load %arg7[%c1_48, %c2_49, %c0_50] : memref<18x18x4xf32, #tpu.memory_space<vmem>>, vector<16x16x4xf32>
    %37 = vector.shape_cast %36 : vector<16x16x4xf32> to vector<256x4xf32>
    %c1_51 = arith.constant 1 : index
    %c2_52 = arith.constant 2 : index
    %c0_53 = arith.constant 0 : index
    %c0_54 = arith.constant 0 : index
    %38 = vector.load %arg2[%c1_51, %c2_52, %c0_53, %c0_54] : memref<3x3x4x8xf32, #tpu.memory_space<vmem>>, vector<1x1x4x8xf32>
    %39 = vector.shape_cast %38 : vector<1x1x4x8xf32> to vector<4x8xf32>
    %cst_55 = arith.constant dense<0.000000e+00> : vector<256x8xf32>
    %40 = tpu.matmul %37, %39, %cst_55 {dimension_numbers = #tpu.dot_dimension_numbers<[1], [0], [0], [1], [0, 0, 1, 1], [], []>} : vector<256x4xf32>, vector<4x8xf32>, vector<256x8xf32> -> vector<256x8xf32>
    %41 = arith.addf %35, %40 : vector<256x8xf32>
    %c2_56 = arith.constant 2 : index
    %c0_57 = arith.constant 0 : index
    %c0_58 = arith.constant 0 : index
    %42 = vector.load %arg7[%c2_56, %c0_57, %c0_58] : memref<18x18x4xf32, #tpu.memory_space<vmem>>, vector<16x16x4xf32>
    %43 = vector.shape_cast %42 : vector<16x16x4xf32> to vector<256x4xf32>
    %c2_59 = arith.constant 2 : index
    %c0_60 = arith.constant 0 : index
    %c0_61 = arith.constant 0 : index
    %c0_62 = arith.constant 0 : index
    %44 = vector.load %arg2[%c2_59, %c0_60, %c0_61, %c0_62] : memref<3x3x4x8xf32, #tpu.memory_space<vmem>>, vector<1x1x4x8xf32>
    %45 = vector.shape_cast %44 : vector<1x1x4x8xf32> to vector<4x8xf32>
    %cst_63 = arith.constant dense<0.000000e+00> : vector<256x8xf32>
    %46 = tpu.matmul %43, %45, %cst_63 {dimension_numbers = #tpu.dot_dimension_numbers<[1], [0], [0], [1], [0, 0, 1, 1], [], []>} : vector<256x4xf32>, vector<4x8xf32>, vector<256x8xf32> -> vector<256x8xf32>
    %47 = arith.addf %41, %46 : vector<256x8xf32>
    %c2_64 = arith.constant 2 : index
    %c1_65 = arith.constant 1 : index
    %c0_66 = arith.constant 0 : index
    %48 = vector.load %arg7[%c2_64, %c1_65, %c0_66] : memref<18x18x4xf32, #tpu.memory_space<vmem>>, vector<16x16x4xf32>
    %49 = vector.shape_cast %48 : vector<16x16x4xf32> to vector<256x4xf32>
    %c2_67 = arith.constant 2 : index
    %c1_68 = arith.constant 1 : index
    %c0_69 = arith.constant 0 : index
    %c0_70 = arith.constant 0 : index
    %50 = vector.load %arg2[%c2_67, %c1_68, %c0_69, %c0_70] : memref<3x3x4x8xf32, #tpu.memory_space<vmem>>, vector<1x1x4x8xf32>
    %51 = vector.shape_cast %50 : vector<1x1x4x8xf32> to vector<4x8xf32>
    %cst_71 = arith.constant dense<0.000000e+00> : vector<256x8xf32>
    %52 = tpu.matmul %49, %51, %cst_71 {dimension_numbers = #tpu.dot_dimension_numbers<[1], [0], [0], [1], [0, 0, 1, 1], [], []>} : vector<256x4xf32>, vector<4x8xf32>, vector<256x8xf32> -> vector<256x8xf32>
    %53 = arith.addf %47, %52 : vector<256x8xf32>
    %c2_72 = arith.constant 2 : index
    %c2_73 = arith.constant 2 : index
    %c0_74 = arith.constant 0 : index
    %54 = vector.load %arg7[%c2_72, %c2_73, %c0_74] : memref<18x18x4xf32, #tpu.memory_space<vmem>>, vector<16x16x4xf32>
    %55 = vector.shape_cast %54 : vector<16x16x4xf32> to vector<256x4xf32>
    %c2_75 = arith.constant 2 : index
    %c2_76 = arith.constant 2 : index
    %c0_77 = arith.constant 0 : index
    %c0_78 = arith.constant 0 : index
    %56 = vector.load %arg2[%c2_75, %c2_76, %c0_77, %c0_78] : memref<3x3x4x8xf32, #tpu.memory_space<vmem>>, vector<1x1x4x8xf32>
    %57 = vector.shape_cast %56 : vector<1x1x4x8xf32> to vector<4x8xf32>
    %cst_79 = arith.constant dense<0.000000e+00> : vector<256x8xf32>
    %58 = tpu.matmul %55, %57, %cst_79 {dimension_numbers = #tpu.dot_dimension_numbers<[1], [0], [0], [1], [0, 0, 1, 1], [], []>} : vector<256x4xf32>, vector<4x8xf32>, vector<256x8xf32> -> vector<256x8xf32>
    %59 = arith.addf %53, %58 : vector<256x8xf32>
    %c0_80 = arith.constant 0 : index
    %c0_81 = arith.constant 0 : index
    %60 = vector.load %arg3[%c0_80, %c0_81] : memref<1x8xf32, #tpu.memory_space<vmem>>, vector<1x8xf32>
    %61 = vector.broadcast %60 : vector<1x8xf32> to vector<256x8xf32>
    %62 = arith.addf %59, %61 : vector<256x8xf32>
    %cst_82 = arith.constant 0.000000e+00 : f32
    %63 = vector.broadcast %cst_82 : f32 to vector<256x8xf32>
    %64 = arith.maximumf %62, %63 : vector<256x8xf32>
    %65 = vector.shape_cast %64 : vector<256x8xf32> to vector<16x16x8xf32>
    %cst_83 = arith.constant 0.000000e+00 : f32
    %66 = vector.broadcast %cst_83 : f32 to vector<18x18x8xf32>
    %c0_84 = arith.constant 0 : index
    %c0_85 = arith.constant 0 : index
    %c0_86 = arith.constant 0 : index
    %67 = vector.load %arg8[%c0_84, %c0_85, %c0_86] : memref<18x18x8xf32, #tpu.memory_space<vmem>>, vector<18x18x8xf32>
    tpu.vector_store %arg8[%c0_84, %c0_85, %c0_86], %66 {strides = array<i32>} : memref<18x18x8xf32, #tpu.memory_space<vmem>>, vector<18x18x8xf32>,
    %c1_87 = arith.constant 1 : index
    %c1_88 = arith.constant 1 : index
    %c0_89 = arith.constant 0 : index
    %68 = vector.load %arg8[%c1_87, %c1_88, %c0_89] : memref<18x18x8xf32, #tpu.memory_space<vmem>>, vector<16x16x8xf32>
    tpu.vector_store %arg8[%c1_87, %c1_88, %c0_89], %65 {strides = array<i32>} : memref<18x18x8xf32, #tpu.memory_space<vmem>>, vector<16x16x8xf32>,
    %cst_90 = arith.constant 0.000000e+00 : f32
    %69 = vector.broadcast %cst_90 : f32 to vector<256x8xf32>
    %c1_91 = arith.constant 1 : index
    %c0_92 = arith.constant 0 : index
    %c0_93 = arith.constant 0 : index
    %70 = vector.load %arg8[%c1_91, %c0_92, %c0_93] : memref<18x18x8xf32, #tpu.memory_space<vmem>>, vector<16x16x8xf32>
    %71 = vector.shape_cast %70 : vector<16x16x8xf32> to vector<256x8xf32>
    %c1_94 = arith.constant 1 : index
    %c0_95 = arith.constant 0 : index
    %c0_96 = arith.constant 0 : index
    %c0_97 = arith.constant 0 : index
    %72 = vector.load %arg4[%c1_94, %c0_95, %c0_96, %c0_97] : memref<4x3x8x8xf32, #tpu.memory_space<vmem>>, vector<1x1x8x8xf32>
    %73 = vector.shape_cast %72 : vector<1x1x8x8xf32> to vector<8x8xf32>
    %cst_98 = arith.constant dense<0.000000e+00> : vector<256x8xf32>
    %74 = tpu.matmul %71, %73, %cst_98 {dimension_numbers = #tpu.dot_dimension_numbers<[1], [0], [0], [1], [0, 0, 1, 1], [], []>} : vector<256x8xf32>, vector<8x8xf32>, vector<256x8xf32> -> vector<256x8xf32>
    %75 = arith.addf %69, %74 : vector<256x8xf32>
    %c1_99 = arith.constant 1 : index
    %c1_100 = arith.constant 1 : index
    %c0_101 = arith.constant 0 : index
    %76 = vector.load %arg8[%c1_99, %c1_100, %c0_101] : memref<18x18x8xf32, #tpu.memory_space<vmem>>, vector<16x16x8xf32>
    %77 = vector.shape_cast %76 : vector<16x16x8xf32> to vector<256x8xf32>
    %c1_102 = arith.constant 1 : index
    %c1_103 = arith.constant 1 : index
    %c0_104 = arith.constant 0 : index
    %c0_105 = arith.constant 0 : index
    %78 = vector.load %arg4[%c1_102, %c1_103, %c0_104, %c0_105] : memref<4x3x8x8xf32, #tpu.memory_space<vmem>>, vector<1x1x8x8xf32>
    %79 = vector.shape_cast %78 : vector<1x1x8x8xf32> to vector<8x8xf32>
    %cst_106 = arith.constant dense<0.000000e+00> : vector<256x8xf32>
    %80 = tpu.matmul %77, %79, %cst_106 {dimension_numbers = #tpu.dot_dimension_numbers<[1], [0], [0], [1], [0, 0, 1, 1], [], []>} : vector<256x8xf32>, vector<8x8xf32>, vector<256x8xf32> -> vector<256x8xf32>
    %81 = arith.addf %75, %80 : vector<256x8xf32>
    %c1_107 = arith.constant 1 : index
    %c2_108 = arith.constant 2 : index
    %c0_109 = arith.constant 0 : index
    %82 = vector.load %arg8[%c1_107, %c2_108, %c0_109] : memref<18x18x8xf32, #tpu.memory_space<vmem>>, vector<16x16x8xf32>
    %83 = vector.shape_cast %82 : vector<16x16x8xf32> to vector<256x8xf32>
    %c1_110 = arith.constant 1 : index
    %c2_111 = arith.constant 2 : index
    %c0_112 = arith.constant 0 : index
    %c0_113 = arith.constant 0 : index
    %84 = vector.load %arg4[%c1_110, %c2_111, %c0_112, %c0_113] : memref<4x3x8x8xf32, #tpu.memory_space<vmem>>, vector<1x1x8x8xf32>
    %85 = vector.shape_cast %84 : vector<1x1x8x8xf32> to vector<8x8xf32>
    %cst_114 = arith.constant dense<0.000000e+00> : vector<256x8xf32>
    %86 = tpu.matmul %83, %85, %cst_114 {dimension_numbers = #tpu.dot_dimension_numbers<[1], [0], [0], [1], [0, 0, 1, 1], [], []>} : vector<256x8xf32>, vector<8x8xf32>, vector<256x8xf32> -> vector<256x8xf32>
    %87 = arith.addf %81, %86 : vector<256x8xf32>
    %c0_115 = arith.constant 0 : index
    %c0_116 = arith.constant 0 : index
    %c0_117 = arith.constant 0 : index
    %88 = vector.load %arg8[%c0_115, %c0_116, %c0_117] : memref<18x18x8xf32, #tpu.memory_space<vmem>>, vector<16x16x8xf32>
    %89 = vector.shape_cast %88 : vector<16x16x8xf32> to vector<256x8xf32>
    %c3 = arith.constant 3 : index
    %c0_118 = arith.constant 0 : index
    %c0_119 = arith.constant 0 : index
    %c0_120 = arith.constant 0 : index
    %90 = vector.load %arg4[%c3, %c0_118, %c0_119, %c0_120] : memref<4x3x8x8xf32, #tpu.memory_space<vmem>>, vector<1x1x8x8xf32>
    %91 = vector.shape_cast %90 : vector<1x1x8x8xf32> to vector<8x8xf32>
    %cst_121 = arith.constant dense<0.000000e+00> : vector<256x8xf32>
    %92 = tpu.matmul %89, %91, %cst_121 {dimension_numbers = #tpu.dot_dimension_numbers<[1], [0], [0], [1], [0, 0, 1, 1], [], []>} : vector<256x8xf32>, vector<8x8xf32>, vector<256x8xf32> -> vector<256x8xf32>
    %93 = arith.addf %87, %92 : vector<256x8xf32>
    %c0_122 = arith.constant 0 : index
    %c1_123 = arith.constant 1 : index
    %c0_124 = arith.constant 0 : index
    %94 = vector.load %arg8[%c0_122, %c1_123, %c0_124] : memref<18x18x8xf32, #tpu.memory_space<vmem>>, vector<16x16x8xf32>
    %95 = vector.shape_cast %94 : vector<16x16x8xf32> to vector<256x8xf32>
    %c3_125 = arith.constant 3 : index
    %c1_126 = arith.constant 1 : index
    %c0_127 = arith.constant 0 : index
    %c0_128 = arith.constant 0 : index
    %96 = vector.load %arg4[%c3_125, %c1_126, %c0_127, %c0_128] : memref<4x3x8x8xf32, #tpu.memory_space<vmem>>, vector<1x1x8x8xf32>
    %97 = vector.shape_cast %96 : vector<1x1x8x8xf32> to vector<8x8xf32>
    %cst_129 = arith.constant dense<0.000000e+00> : vector<256x8xf32>
    %98 = tpu.matmul %95, %97, %cst_129 {dimension_numbers = #tpu.dot_dimension_numbers<[1], [0], [0], [1], [0, 0, 1, 1], [], []>} : vector<256x8xf32>, vector<8x8xf32>, vector<256x8xf32> -> vector<256x8xf32>
    %99 = arith.addf %93, %98 : vector<256x8xf32>
    %c0_130 = arith.constant 0 : index
    %c2_131 = arith.constant 2 : index
    %c0_132 = arith.constant 0 : index
    %100 = vector.load %arg8[%c0_130, %c2_131, %c0_132] : memref<18x18x8xf32, #tpu.memory_space<vmem>>, vector<16x16x8xf32>
    %101 = vector.shape_cast %100 : vector<16x16x8xf32> to vector<256x8xf32>
    %c3_133 = arith.constant 3 : index
    %c2_134 = arith.constant 2 : index
    %c0_135 = arith.constant 0 : index
    %c0_136 = arith.constant 0 : index
    %102 = vector.load %arg4[%c3_133, %c2_134, %c0_135, %c0_136] : memref<4x3x8x8xf32, #tpu.memory_space<vmem>>, vector<1x1x8x8xf32>
    %103 = vector.shape_cast %102 : vector<1x1x8x8xf32> to vector<8x8xf32>
    %cst_137 = arith.constant dense<0.000000e+00> : vector<256x8xf32>
    %104 = tpu.matmul %101, %103, %cst_137 {dimension_numbers = #tpu.dot_dimension_numbers<[1], [0], [0], [1], [0, 0, 1, 1], [], []>} : vector<256x8xf32>, vector<8x8xf32>, vector<256x8xf32> -> vector<256x8xf32>
    %105 = arith.addf %99, %104 : vector<256x8xf32>
    %c0_138 = arith.constant 0 : index
    %c0_139 = arith.constant 0 : index
    %106 = vector.load %arg5[%c0_138, %c0_139] : memref<1x8xf32, #tpu.memory_space<vmem>>, vector<1x8xf32>
    %107 = vector.broadcast %106 : vector<1x8xf32> to vector<256x8xf32>
    %108 = arith.addf %105, %107 : vector<256x8xf32>
    %cst_140 = arith.constant 0.000000e+00 : f32
    %109 = vector.broadcast %cst_140 : f32 to vector<256x8xf32>
    %110 = arith.maximumf %108, %109 : vector<256x8xf32>
    %111 = vector.shape_cast %110 : vector<256x8xf32> to vector<16x16x8xf32>
    %c0_141 = arith.constant 0 : index
    %c0_142 = arith.constant 0 : index
    %c0_143 = arith.constant 0 : index
    %c0_144 = arith.constant 0 : index
    %c0_145 = arith.constant 0 : index
    %112 = vector.load %arg6[%c0_141, %c0_142, %c0_143, %c0_144, %c0_145] : memref<1x16x2x16x8xf32, #tpu.memory_space<vmem>>, vector<1x16x1x16x8xf32>
    %113 = vector.shape_cast %112 : vector<1x16x1x16x8xf32> to vector<16x16x8xf32>
    %114 = vector.shape_cast %111 : vector<16x16x8xf32> to vector<1x16x1x16x8xf32>
    tpu.vector_store %arg6[%c0_141, %c0_142, %c0_143, %c0_144, %c0_145], %114 {strides = array<i32>} : memref<1x16x2x16x8xf32, #tpu.memory_space<vmem>>, vector<1x16x1x16x8xf32>,
    %cst_146 = arith.constant 0.000000e+00 : f32
    %115 = vector.broadcast %cst_146 : f32 to vector<256x8xf32>
    %c2_147 = arith.constant 2 : index
    %c0_148 = arith.constant 0 : index
    %c0_149 = arith.constant 0 : index
    %116 = vector.load %arg8[%c2_147, %c0_148, %c0_149] : memref<18x18x8xf32, #tpu.memory_space<vmem>>, vector<16x16x8xf32>
    %117 = vector.shape_cast %116 : vector<16x16x8xf32> to vector<256x8xf32>
    %c0_150 = arith.constant 0 : index
    %c0_151 = arith.constant 0 : index
    %c0_152 = arith.constant 0 : index
    %c0_153 = arith.constant 0 : index
    %118 = vector.load %arg4[%c0_150, %c0_151, %c0_152, %c0_153] : memref<4x3x8x8xf32, #tpu.memory_space<vmem>>, vector<1x1x8x8xf32>
    %119 = vector.shape_cast %118 : vector<1x1x8x8xf32> to vector<8x8xf32>
    %cst_154 = arith.constant dense<0.000000e+00> : vector<256x8xf32>
    %120 = tpu.matmul %117, %119, %cst_154 {dimension_numbers = #tpu.dot_dimension_numbers<[1], [0], [0], [1], [0, 0, 1, 1], [], []>} : vector<256x8xf32>, vector<8x8xf32>, vector<256x8xf32> -> vector<256x8xf32>
    %121 = arith.addf %115, %120 : vector<256x8xf32>
    %c2_155 = arith.constant 2 : index
    %c1_156 = arith.constant 1 : index
    %c0_157 = arith.constant 0 : index
    %122 = vector.load %arg8[%c2_155, %c1_156, %c0_157] : memref<18x18x8xf32, #tpu.memory_space<vmem>>, vector<16x16x8xf32>
    %123 = vector.shape_cast %122 : vector<16x16x8xf32> to vector<256x8xf32>
    %c0_158 = arith.constant 0 : index
    %c1_159 = arith.constant 1 : index
    %c0_160 = arith.constant 0 : index
    %c0_161 = arith.constant 0 : index
    %124 = vector.load %arg4[%c0_158, %c1_159, %c0_160, %c0_161] : memref<4x3x8x8xf32, #tpu.memory_space<vmem>>, vector<1x1x8x8xf32>
    %125 = vector.shape_cast %124 : vector<1x1x8x8xf32> to vector<8x8xf32>
    %cst_162 = arith.constant dense<0.000000e+00> : vector<256x8xf32>
    %126 = tpu.matmul %123, %125, %cst_162 {dimension_numbers = #tpu.dot_dimension_numbers<[1], [0], [0], [1], [0, 0, 1, 1], [], []>} : vector<256x8xf32>, vector<8x8xf32>, vector<256x8xf32> -> vector<256x8xf32>
    %127 = arith.addf %121, %126 : vector<256x8xf32>
    %c2_163 = arith.constant 2 : index
    %c2_164 = arith.constant 2 : index
    %c0_165 = arith.constant 0 : index
    %128 = vector.load %arg8[%c2_163, %c2_164, %c0_165] : memref<18x18x8xf32, #tpu.memory_space<vmem>>, vector<16x16x8xf32>
    %129 = vector.shape_cast %128 : vector<16x16x8xf32> to vector<256x8xf32>
    %c0_166 = arith.constant 0 : index
    %c2_167 = arith.constant 2 : index
    %c0_168 = arith.constant 0 : index
    %c0_169 = arith.constant 0 : index
    %130 = vector.load %arg4[%c0_166, %c2_167, %c0_168, %c0_169] : memref<4x3x8x8xf32, #tpu.memory_space<vmem>>, vector<1x1x8x8xf32>
    %131 = vector.shape_cast %130 : vector<1x1x8x8xf32> to vector<8x8xf32>
    %cst_170 = arith.constant dense<0.000000e+00> : vector<256x8xf32>
    %132 = tpu.matmul %129, %131, %cst_170 {dimension_numbers = #tpu.dot_dimension_numbers<[1], [0], [0], [1], [0, 0, 1, 1], [], []>} : vector<256x8xf32>, vector<8x8xf32>, vector<256x8xf32> -> vector<256x8xf32>
    %133 = arith.addf %127, %132 : vector<256x8xf32>
    %c1_171 = arith.constant 1 : index
    %c0_172 = arith.constant 0 : index
    %c0_173 = arith.constant 0 : index
    %134 = vector.load %arg8[%c1_171, %c0_172, %c0_173] : memref<18x18x8xf32, #tpu.memory_space<vmem>>, vector<16x16x8xf32>
    %135 = vector.shape_cast %134 : vector<16x16x8xf32> to vector<256x8xf32>
    %c2_174 = arith.constant 2 : index
    %c0_175 = arith.constant 0 : index
    %c0_176 = arith.constant 0 : index
    %c0_177 = arith.constant 0 : index
    %136 = vector.load %arg4[%c2_174, %c0_175, %c0_176, %c0_177] : memref<4x3x8x8xf32, #tpu.memory_space<vmem>>, vector<1x1x8x8xf32>
    %137 = vector.shape_cast %136 : vector<1x1x8x8xf32> to vector<8x8xf32>
    %cst_178 = arith.constant dense<0.000000e+00> : vector<256x8xf32>
    %138 = tpu.matmul %135, %137, %cst_178 {dimension_numbers = #tpu.dot_dimension_numbers<[1], [0], [0], [1], [0, 0, 1, 1], [], []>} : vector<256x8xf32>, vector<8x8xf32>, vector<256x8xf32> -> vector<256x8xf32>
    %139 = arith.addf %133, %138 : vector<256x8xf32>
    %c1_179 = arith.constant 1 : index
    %c1_180 = arith.constant 1 : index
    %c0_181 = arith.constant 0 : index
    %140 = vector.load %arg8[%c1_179, %c1_180, %c0_181] : memref<18x18x8xf32, #tpu.memory_space<vmem>>, vector<16x16x8xf32>
    %141 = vector.shape_cast %140 : vector<16x16x8xf32> to vector<256x8xf32>
    %c2_182 = arith.constant 2 : index
    %c1_183 = arith.constant 1 : index
    %c0_184 = arith.constant 0 : index
    %c0_185 = arith.constant 0 : index
    %142 = vector.load %arg4[%c2_182, %c1_183, %c0_184, %c0_185] : memref<4x3x8x8xf32, #tpu.memory_space<vmem>>, vector<1x1x8x8xf32>
    %143 = vector.shape_cast %142 : vector<1x1x8x8xf32> to vector<8x8xf32>
    %cst_186 = arith.constant dense<0.000000e+00> : vector<256x8xf32>
    %144 = tpu.matmul %141, %143, %cst_186 {dimension_numbers = #tpu.dot_dimension_numbers<[1], [0], [0], [1], [0, 0, 1, 1], [], []>} : vector<256x8xf32>, vector<8x8xf32>, vector<256x8xf32> -> vector<256x8xf32>
    %145 = arith.addf %139, %144 : vector<256x8xf32>
    %c1_187 = arith.constant 1 : index
    %c2_188 = arith.constant 2 : index
    %c0_189 = arith.constant 0 : index
    %146 = vector.load %arg8[%c1_187, %c2_188, %c0_189] : memref<18x18x8xf32, #tpu.memory_space<vmem>>, vector<16x16x8xf32>
    %147 = vector.shape_cast %146 : vector<16x16x8xf32> to vector<256x8xf32>
    %c2_190 = arith.constant 2 : index
    %c2_191 = arith.constant 2 : index
    %c0_192 = arith.constant 0 : index
    %c0_193 = arith.constant 0 : index
    %148 = vector.load %arg4[%c2_190, %c2_191, %c0_192, %c0_193] : memref<4x3x8x8xf32, #tpu.memory_space<vmem>>, vector<1x1x8x8xf32>
    %149 = vector.shape_cast %148 : vector<1x1x8x8xf32> to vector<8x8xf32>
    %cst_194 = arith.constant dense<0.000000e+00> : vector<256x8xf32>
    %150 = tpu.matmul %147, %149, %cst_194 {dimension_numbers = #tpu.dot_dimension_numbers<[1], [0], [0], [1], [0, 0, 1, 1], [], []>} : vector<256x8xf32>, vector<8x8xf32>, vector<256x8xf32> -> vector<256x8xf32>
    %151 = arith.addf %145, %150 : vector<256x8xf32>
    %c0_195 = arith.constant 0 : index
    %c0_196 = arith.constant 0 : index
    %152 = vector.load %arg5[%c0_195, %c0_196] : memref<1x8xf32, #tpu.memory_space<vmem>>, vector<1x8xf32>
    %153 = vector.broadcast %152 : vector<1x8xf32> to vector<256x8xf32>
    %154 = arith.addf %151, %153 : vector<256x8xf32>
    %cst_197 = arith.constant 0.000000e+00 : f32
    %155 = vector.broadcast %cst_197 : f32 to vector<256x8xf32>
    %156 = arith.maximumf %154, %155 : vector<256x8xf32>
    %157 = vector.shape_cast %156 : vector<256x8xf32> to vector<16x16x8xf32>
    %c0_198 = arith.constant 0 : index
    %c0_199 = arith.constant 0 : index
    %c1_200 = arith.constant 1 : index
    %c0_201 = arith.constant 0 : index
    %c0_202 = arith.constant 0 : index
    %158 = vector.load %arg6[%c0_198, %c0_199, %c1_200, %c0_201, %c0_202] : memref<1x16x2x16x8xf32, #tpu.memory_space<vmem>>, vector<1x16x1x16x8xf32>
    %159 = vector.shape_cast %158 : vector<1x16x1x16x8xf32> to vector<16x16x8xf32>
    %160 = vector.shape_cast %157 : vector<16x16x8xf32> to vector<1x16x1x16x8xf32>
    tpu.vector_store %arg6[%c0_198, %c0_199, %c1_200, %c0_201, %c0_202], %160 {strides = array<i32>} : memref<1x16x2x16x8xf32, #tpu.memory_space<vmem>>, vector<1x16x1x16x8xf32>,
    return
  }
  func.func @transform_0(%arg0: i32) -> (i32, i32, i32, i32) {
    %c0_i32 = arith.constant 0 : i32
    %c0_i32_0 = arith.constant 0 : i32
    %c0_i32_1 = arith.constant 0 : i32
    %c0_i32_2 = arith.constant 0 : i32
    return %arg0, %c0_i32, %c0_i32_0, %c0_i32_1 : i32, i32, i32, i32
  }
  func.func @transform_1(%arg0: i32) -> (i32, i32, i32, i32) {
    %c0_i32 = arith.constant 0 : i32
    %c0_i32_0 = arith.constant 0 : i32
    %c0_i32_1 = arith.constant 0 : i32
    %c0_i32_2 = arith.constant 0 : i32
    %c0_i32_3 = arith.constant 0 : i32
    return %c0_i32, %c0_i32_0, %c0_i32_1, %c0_i32_2 : i32, i32, i32, i32
  }
  func.func @transform_2(%arg0: i32) -> (i32, i32) {
    %c0_i32 = arith.constant 0 : i32
    %c0_i32_0 = arith.constant 0 : i32
    %c0_i32_1 = arith.constant 0 : i32
    return %c0_i32, %c0_i32_0 : i32, i32
  }
  func.func @transform_3(%arg0: i32) -> (i32, i32, i32, i32) {
    %c0_i32 = arith.constant 0 : i32
    %c0_i32_0 = arith.constant 0 : i32
    %c0_i32_1 = arith.constant 0 : i32
    %c0_i32_2 = arith.constant 0 : i32
    %c0_i32_3 = arith.constant 0 : i32
    return %c0_i32, %c0_i32_0, %c0_i32_1, %c0_i32_2 : i32, i32, i32, i32
  }
  func.func @transform_4(%arg0: i32) -> (i32, i32) {
    %c0_i32 = arith.constant 0 : i32
    %c0_i32_0 = arith.constant 0 : i32
    %c0_i32_1 = arith.constant 0 : i32
    return %c0_i32, %c0_i32_0 : i32, i32
  }
  func.func @transform_5(%arg0: i32) -> (i32, i32, i32, i32, i32) {
    %c0_i32 = arith.constant 0 : i32
    %c0_i32_0 = arith.constant 0 : i32
    %c0_i32_1 = arith.constant 0 : i32
    %c0_i32_2 = arith.constant 0 : i32
    %c0_i32_3 = arith.constant 0 : i32
    return %arg0, %c0_i32, %c0_i32_0, %c0_i32_1, %c0_i32_2 : i32, i32, i32, i32, i32
  }
}

</mosaic_0001>

<bundles_post_ra>
// kernel: decoder_block_forward.1
= control target key start
LH: loop header
LB: loop body
LE: loop exit
PB: predicated region body
PF: predicated region fallthrough
CT: control target
= control target key end

     0   :  { %s11848_s18 = smov 0   ;;  %s14264_s0 = inlined_call_operand.vmem [shape: f32[2,16,16,4], index: 0, kind: input, shape index: {}]   ;;  %s14265_s1 = inlined_call_operand.vmem [shape: f32[3,3,4,8], index: 1, kind: input, shape index: {}]   ;;  %s14266_s2 = inlined_call_operand.vmem [shape: f32[1,8], index: 2, kind: input, shape index: {}]   ;;  %s14267_s3 = inlined_call_operand.vmem [shape: f32[4,3,8,8], index: 3, kind: input, shape index: {}]   ;;  %s14268_s4 = inlined_call_operand.vmem [shape: f32[1,8], index: 4, kind: input, shape index: {}]   ;;  %s14269_s5 = inlined_call_operand.vmem [shape: f32[2,16,2,16,8], index: 5, kind: output, shape index: {}]  }
   0x1 LB: > { %s8731_s19 = sadd.s32 4294967295, %s11815_s18   ;;  %p8735_p0 = scmp.ge.s32.totalorder %s11815_s18, 1  ;;  %s11815_s18 = sphi %s11848_s18, %s15_s18  }
   0x2   : > { %p187_p1 = scmp.lt.s32.totalorder %s11815_s18, 3 }
   0x4   : > { %p188_p2 = pnand %p8735_p0, %p187_p1 }
   0x6   : > { %191 = sbr.rel (%p188_p2) target bundleno = 1703 (0x6a7), region = 40 }
   0xd   : > { %v8740_v0 = vld [vmem:[%s14265_s1 + $0x4] sm:$0xf]  ;;  %vm509_vm0 = vcmask 1043456   ;;  %vm225_vm1 = vcmask 31744   ;;  %vm228_vm2 = vcmask 25600   ;;  %v14270_v1 = vmov 0.0  }
   0xe   : > { %10172 = vmatprep.subr.msk.mxu0 %vm509_vm0, %v8740_v0  ;;  %226 = vst.msk [vmem:[#allocation2] sm:$0xff] %vm225_vm1, %v14270_v1  ;;  %227 = vst.msk [vmem:[#allocation2 + $0x8] sm:$0xff] %vm225_vm1, %v14270_v1  ;;  %v378_v2 = vld [vmem:[%s14265_s1] sm:$0xf]  ;;  %p215_p3 = scmp.lt.s32.totalorder %s8731_s19, 1  ;;  %vm3864_vm3 = vcmask 64512  }
   0xf   : > { %230 = vst.msk [vmem:[#allocation2 + $0x18] sm:$0xff] %vm225_vm1, %v14270_v1  ;;  %231 = vst.msk [vmem:[#allocation2 + $0x20] sm:$0xff] %vm225_vm1, %v14270_v1  ;;  %10173 = vmatpush3.msk.msra.mxu0 %vm509_vm0, %v8740_v0  ;;  %v11991_v6 = vld [vmem:[%s14265_s1 + $0x8] sm:$0xf]  ;;  %vm3867_vm4 = vcmask 58368  }
  0x10   : > { %233 = vst.msk [vmem:[#allocation2 + $0x30] sm:$0xff] %vm225_vm1, %v14270_v1  ;;  %234 = vst.msk [vmem:[#allocation2 + $0x38] sm:$0xff] %vm225_vm1, %v14270_v1  ;;  %10222 = vmatprep.subr.msk.mxu0 %vm509_vm0, %v378_v2  ;;  %s14636_s19 = smov (!%p215_p3, %s8731_s19), 1 }
  0x11   : > { %236 = vst.msk [vmem:[#allocation2 + $0x48] sm:$0xff] %vm225_vm1, %v14270_v1  ;;  %237 = vst.msk [vmem:[#allocation2 + $0x50] sm:$0xff] %vm225_vm1, %v14270_v1  ;;  %s9477_s24 = sshll.u32 %s14636_s19, 8  ;;  %s9478_s22 = sshll.u32 %s14636_s19, 9 }
  0x12   : > { %239 = vst.msk [vmem:[#allocation2 + $0x60] sm:$0xff] %vm225_vm1, %v14270_v1  ;;  %240 = vst.msk [vmem:[#allocation2 + $0x68] sm:$0xff] %vm225_vm1, %v14270_v1  ;;  %s11983_s27 = scalar_lea.vmem %s14264_s0, %s9477_s24  ;;  %s13882_s25 = scalar_lea.vmem %s14269_s5, %s9478_s22 }
  0x13   : > { %242 = vst.msk [vmem:[#allocation2 + $0x78] sm:$0xff] %vm225_vm1, %v14270_v1  ;;  %243 = vst.msk [vmem:[#allocation2 + $0x80] sm:$0xff] %vm225_vm1, %v14270_v1  ;;  %v281_v3 = vld [vmem:[%s11983_s27] sm:$0xff]  ;;  %v282_v4 = vld [vmem:[%s11983_s27 + $0x8] sm:$0xff] }
  0x14   : > { %245 = vst.msk [vmem:[#allocation2 + $0x90] sm:$0xff] %vm225_vm1, %v14270_v1  ;;  %246 = vst.msk [vmem:[#allocation2 + $0x98] sm:$0xff] %vm225_vm1, %v14270_v1  ;;  %v283_v5 = vld [vmem:[%s11983_s27 + $0x10] sm:$0xff]  ;;  %v284_v9 = vld [vmem:[%s11983_s27 + $0x18] sm:$0xff] }
  0x15   : > { %248 = vst.msk [vmem:[#allocation2 + $0xa8] sm:$0xff] %vm225_vm1, %v14270_v1  ;;  %249 = vst.msk [vmem:[#allocation2 + $0xb0] sm:$0xff] %vm225_vm1, %v14270_v1  ;;  %v379_v7 = vld [vmem:[#allocation2 + $0x1] sm:$0xff]  ;;  %v287_v12 = vld [vmem:[%s11983_s27 + $0x30] sm:$0xff] }
  0x16   : > { %251 = vst.msk [vmem:[#allocation2 + $0xc0] sm:$0xff] %vm225_vm1, %v14270_v1  ;;  %252 = vst.msk [vmem:[#allocation2 + $0xc8] sm:$0xff] %vm225_vm1, %v14270_v1  ;;  %10174 = vmatprep.mubr.msk.f32.mxu0 %vm225_vm1, %v379_v7  ;;  %v285_v10 = vld [vmem:[%s11983_s27 + $0x20] sm:$0xff]  ;;  %v286_v11 = vld [vmem:[%s11983_s27 + $0x28] sm:$0xff] }
  0x17   : > { %254 = vst.msk [vmem:[#allocation2 + $0xd8] sm:$0xff] %vm225_vm1, %v14270_v1  ;;  %255 = vst.msk [vmem:[#allocation2 + $0xe0] sm:$0xff] %vm225_vm1, %v14270_v1  ;;  %v288_v13 = vld [vmem:[%s11983_s27 + $0x38] sm:$0xff]  ;;  %v289_v14 = vld [vmem:[%s11983_s27 + $0x40] sm:$0xff] }
  0x18   : > { %257 = vst.msk [vmem:[#allocation2 + $0xf0] sm:$0xff] %vm225_vm1, %v14270_v1  ;;  %258 = vst.msk [vmem:[#allocation2 + $0xf8] sm:$0xff] %vm225_vm1, %v14270_v1  ;;  %v290_v15 = vld [vmem:[%s11983_s27 + $0x48] sm:$0xff]  ;;  %v291_v16 = vld [vmem:[%s11983_s27 + $0x50] sm:$0xff] }
  0x19   : > { %260 = vst.msk [vmem:[#allocation2 + $0x108] sm:$0xff] %vm225_vm1, %v14270_v1  ;;  %261 = vst.msk [vmem:[#allocation2 + $0x110] sm:$0xff] %vm225_vm1, %v14270_v1  ;;  %v292_v17 = vld [vmem:[%s11983_s27 + $0x58] sm:$0xff]  ;;  %v293_v18 = vld [vmem:[%s11983_s27 + $0x60] sm:$0xff] }
  0x1a   : > { %263 = vst.msk [vmem:[#allocation2 + $0x120] sm:$0xff] %vm225_vm1, %v14270_v1  ;;  %264 = vst.msk [vmem:[#allocation2 + $0x128] sm:$0xff] %vm225_vm1, %v14270_v1  ;;  %v294_v19 = vld [vmem:[%s11983_s27 + $0x68] sm:$0xff]  ;;  %v295_v20 = vld [vmem:[%s11983_s27 + $0x70] sm:$0xff] }
  0x1b   : > { %266 = vst.msk [vmem:[#allocation2 + $0x138] sm:$0xff] %vm225_vm1, %v14270_v1  ;;  %267 = vst.msk [vmem:[#allocation2 + $0x140] sm:$0xff] %vm225_vm1, %v14270_v1  ;;  %v296_v21 = vld [vmem:[%s11983_s27 + $0x78] sm:$0xff]  ;;  %v297_v22 = vld [vmem:[%s11983_s27 + $0x80] sm:$0xff] }
  0x1c   : > { %269 = vst.msk [vmem:[#allocation2 + $0x150] sm:$0xff] %vm225_vm1, %v14270_v1  ;;  %270 = vst.msk [vmem:[#allocation2 + $0x158] sm:$0xff] %vm225_vm1, %v14270_v1  ;;  %v298_v23 = vld [vmem:[%s11983_s27 + $0x88] sm:$0xff]  ;;  %v299_v24 = vld [vmem:[%s11983_s27 + $0x90] sm:$0xff] }
  0x1d   : > { %272 = vst.msk [vmem:[#allocation2 + $0x168] sm:$0xff] %vm225_vm1, %v14270_v1  ;;  %273 = vst.msk [vmem:[#allocation2 + $0x170] sm:$0xff] %vm225_vm1, %v14270_v1  ;;  %v300_v25 = vld [vmem:[%s11983_s27 + $0x98] sm:$0xff]  ;;  %v301_v26 = vld [vmem:[%s11983_s27 + $0xa0] sm:$0xff] }
  0x1e   : > { %275 = vst.msk [vmem:[#allocation2 + $0x180] sm:$0xff] %vm225_vm1, %v14270_v1  ;;  %276 = vst.msk [vmem:[#allocation2 + $0x188] sm:$0xff] %vm225_vm1, %v14270_v1  ;;  %v302_v27 = vld [vmem:[%s11983_s27 + $0xa8] sm:$0xff]  ;;  %v303_v31 = vld [vmem:[%s11983_s27 + $0xb0] sm:$0xff] }
  0x1f   : > { %278 = vst.msk [vmem:[#allocation2 + $0x198] sm:$0xff] %vm225_vm1, %v14270_v1  ;;  %279 = vst.msk [vmem:[#allocation2 + $0x1a0] sm:$0xff] %vm225_vm1, %v14270_v1  ;;  %v304_v32 = vld [vmem:[%s11983_s27 + $0xb8] sm:$0xff]  ;;  %v305_v37 = vld [vmem:[%s11983_s27 + $0xc0] sm:$0xff] }
  0x20   : > { %229 = vst.msk [vmem:[#allocation2 + $0x10] sm:$0x3] %vm228_vm2, %v14270_v1  ;;  %232 = vst.msk [vmem:[#allocation2 + $0x28] sm:$0x3] %vm228_vm2, %v14270_v1  ;;  %v306_v38 = vld [vmem:[%s11983_s27 + $0xc8] sm:$0xff]  ;;  %v307_v39 = vld [vmem:[%s11983_s27 + $0xd0] sm:$0xff] }
  0x21   : > { %235 = vst.msk [vmem:[#allocation2 + $0x40] sm:$0x3] %vm228_vm2, %v14270_v1  ;;  %238 = vst.msk [vmem:[#allocation2 + $0x58] sm:$0x3] %vm228_vm2, %v14270_v1  ;;  %v308_v40 = vld [vmem:[%s11983_s27 + $0xd8] sm:$0xff]  ;;  %v309_v41 = vld [vmem:[%s11983_s27 + $0xe0] sm:$0xff] }
  0x22   : > { %241 = vst.msk [vmem:[#allocation2 + $0x70] sm:$0x3] %vm228_vm2, %v14270_v1  ;;  %244 = vst.msk [vmem:[#allocation2 + $0x88] sm:$0x3] %vm228_vm2, %v14270_v1  ;;  %v310_v42 = vld [vmem:[%s11983_s27 + $0xe8] sm:$0xff] }
  0x23   : > { %247 = vst.msk [vmem:[#allocation2 + $0xa0] sm:$0x3] %vm228_vm2, %v14270_v1  ;;  %250 = vst.msk [vmem:[#allocation2 + $0xb8] sm:$0x3] %vm228_vm2, %v14270_v1  ;;  %v12181_v7 = vld [vmem:[%s14265_s1 + $0xc] sm:$0xf] }
  0x24   : > { %253 = vst.msk [vmem:[#allocation2 + $0xd0] sm:$0x3] %vm228_vm2, %v14270_v1  ;;  %256 = vst.msk [vmem:[#allocation2 + $0xe8] sm:$0x3] %vm228_vm2, %v14270_v1 }
  0x25   : > { %259 = vst.msk [vmem:[#allocation2 + $0x100] sm:$0x3] %vm228_vm2, %v14270_v1  ;;  %262 = vst.msk [vmem:[#allocation2 + $0x118] sm:$0x3] %vm228_vm2, %v14270_v1 }
  0x26   : > { %265 = vst.msk [vmem:[#allocation2 + $0x130] sm:$0x3] %vm228_vm2, %v14270_v1  ;;  %268 = vst.msk [vmem:[#allocation2 + $0x148] sm:$0x3] %vm228_vm2, %v14270_v1 }
  0x27   : > { %271 = vst.msk [vmem:[#allocation2 + $0x160] sm:$0x3] %vm228_vm2, %v14270_v1  ;;  %274 = vst.msk [vmem:[#allocation2 + $0x178] sm:$0x3] %vm228_vm2, %v14270_v1  ;;  %v380_v8 = vld [vmem:[#allocation2 + $0x9] sm:$0xff] }
  0x28   : > { %277 = vst.msk [vmem:[#allocation2 + $0x190] sm:$0x3] %vm228_vm2, %v14270_v1  ;;  %280 = vst.msk [vmem:[#allocation2 + $0x1a8] sm:$0x3] %vm228_vm2, %v14270_v1  ;;  %10175 = vmatmul.mubr.msk.f32.vlgmr.msra.gmra.mrb[0].mxu0 %vm225_vm1, %v380_v8 }
  0x29   : > { %314 = vst.msk [vmem:[#allocation2 + $0x19] sm:$0xff] %vm225_vm1, %v281_v3  ;;  %315 = vst.msk [vmem:[#allocation2 + $0x21] sm:$0xff] %vm225_vm1, %v282_v4  ;;  %10223 = vmatpush3.msk.msra.mxu0 %vm509_vm0, %v378_v2  ;;  %v346_v3 = vld [vmem:[#allocation2] sm:$0xff]  ;;  %v347_v4 = vld [vmem:[#allocation2 + $0x8] sm:$0xff] }
  0x2a   : > { %316 = vst.msk [vmem:[#allocation2 + $0x31] sm:$0xff] %vm225_vm1, %v283_v5  ;;  %317 = vst.msk [vmem:[#allocation2 + $0x39] sm:$0xff] %vm225_vm1, %v284_v9  ;;  %10272 = vmatprep.subr.msk.mxu0 %vm509_vm0, %v11991_v6 }
  0x2b   : > { %318 = vst.msk [vmem:[#allocation2 + $0x49] sm:$0xff] %vm225_vm1, %v285_v10  ;;  %319 = vst.msk [vmem:[#allocation2 + $0x51] sm:$0xff] %vm225_vm1, %v286_v11 }
  0x2c   : > { %320 = vst.msk [vmem:[#allocation2 + $0x61] sm:$0xff] %vm225_vm1, %v287_v12  ;;  %321 = vst.msk [vmem:[#allocation2 + $0x69] sm:$0xff] %vm225_vm1, %v288_v13 }
  0x2d   : > { %322 = vst.msk [vmem:[#allocation2 + $0x79] sm:$0xff] %vm225_vm1, %v289_v14  ;;  %323 = vst.msk [vmem:[#allocation2 + $0x81] sm:$0xff] %vm225_vm1, %v290_v15 }
  0x2e   : > { %324 = vst.msk [vmem:[#allocation2 + $0x91] sm:$0xff] %vm225_vm1, %v291_v16  ;;  %325 = vst.msk [vmem:[#allocation2 + $0x99] sm:$0xff] %vm225_vm1, %v292_v17 }
  0x2f   : > { %326 = vst.msk [vmem:[#allocation2 + $0xa9] sm:$0xff] %vm225_vm1, %v293_v18  ;;  %327 = vst.msk [vmem:[#allocation2 + $0xb1] sm:$0xff] %vm225_vm1, %v294_v19 }
  0x30   : > { %328 = vst.msk [vmem:[#allocation2 + $0xc1] sm:$0xff] %vm225_vm1, %v295_v20  ;;  %329 = vst.msk [vmem:[#allocation2 + $0xc9] sm:$0xff] %vm225_vm1, %v296_v21  ;;  %v12036_v28 = vld [vmem:[#allocation2 + $0x19] sm:$0xff]  ;;  %v12038_v29 = vld [vmem:[#allocation2 + $0x21] sm:$0xff] }
  0x31   : > { %330 = vst.msk [vmem:[#allocation2 + $0xd9] sm:$0xff] %vm225_vm1, %v297_v22  ;;  %331 = vst.msk [vmem:[#allocation2 + $0xe1] sm:$0xff] %vm225_vm1, %v298_v23  ;;  %v12040_v30 = vld [vmem:[#allocation2 + $0x31] sm:$0xff]  ;;  %10177 = vmatprep.mubr.msk.f32.mxu0 %vm225_vm1, %v12036_v28  ;;  %v12055_v33 = vld [vmem:[#allocation2 + $0x39] sm:$0xff] }
  0x32   : > { %332 = vst.msk [vmem:[#allocation2 + $0xf1] sm:$0xff] %vm225_vm1, %v299_v24  ;;  %333 = vst.msk [vmem:[#allocation2 + $0xf9] sm:$0xff] %vm225_vm1, %v300_v25  ;;  %10178 = vmatmul.mubr.msk.f32.gmra.mrb[2].mxu0 %vm225_vm1, %v12038_v29  ;;  %v12057_v34 = vld [vmem:[#allocation2 + $0x49] sm:$0xff]  ;;  %v12063_v35 = vld [vmem:[#allocation2 + $0x51] sm:$0xff] }
  0x33   : > { %334 = vst.msk [vmem:[#allocation2 + $0x109] sm:$0xff] %vm225_vm1, %v301_v26  ;;  %335 = vst.msk [vmem:[#allocation2 + $0x111] sm:$0xff] %vm225_vm1, %v302_v27  ;;  %10180 = vmatprep.mubr.msk.f32.mxu0 %vm225_vm1, %v12040_v30  ;;  %v12065_v36 = vld [vmem:[#allocation2 + $0x61] sm:$0xff]  ;;  %v12081_v43 = vld [vmem:[#allocation2 + $0x69] sm:$0xff] }
  0x34   : > { %336 = vst.msk [vmem:[#allocation2 + $0x121] sm:$0xff] %vm225_vm1, %v303_v31  ;;  %337 = vst.msk [vmem:[#allocation2 + $0x129] sm:$0xff] %vm225_vm1, %v304_v32  ;;  %v12085_v44 = vld [vmem:[#allocation2 + $0x79] sm:$0xff]  ;;  %v12091_v45 = vld [vmem:[#allocation2 + $0x81] sm:$0xff] }
  0x35   : > { %338 = vst.msk [vmem:[#allocation2 + $0x139] sm:$0xff] %vm225_vm1, %v305_v37  ;;  %339 = vst.msk [vmem:[#allocation2 + $0x141] sm:$0xff] %vm225_vm1, %v306_v38  ;;  %v12093_v46 = vld [vmem:[#allocation2 + $0x91] sm:$0xff]  ;;  %v12099_v47 = vld [vmem:[#allocation2 + $0x99] sm:$0xff] }
  0x36   : > { %10181 = vmatmul.mubr.msk.f32.gmra.mrb[4].mxu0 %vm225_vm1, %v12055_v33  ;;  %340 = vst.msk [vmem:[#allocation2 + $0x151] sm:$0xff] %vm225_vm1, %v307_v39  ;;  %341 = vst.msk [vmem:[#allocation2 + $0x159] sm:$0xff] %vm225_vm1, %v308_v40  ;;  %v12101_v48 = vld [vmem:[#allocation2 + $0xa9] sm:$0xff]  ;;  %v12107_v49 = vld [vmem:[#allocation2 + $0xb1] sm:$0xff] }
  0x37   : > { %10183 = vmatprep.mubr.msk.f32.mxu0 %vm225_vm1, %v12057_v34  ;;  %342 = vst.msk [vmem:[#allocation2 + $0x169] sm:$0xff] %vm225_vm1, %v309_v41  ;;  %343 = vst.msk [vmem:[#allocation2 + $0x171] sm:$0xff] %vm225_vm1, %v310_v42  ;;  %v12109_v50 = vld [vmem:[#allocation2 + $0xc1] sm:$0xff]  ;;  %v12115_v51 = vld [vmem:[#allocation2 + $0xc9] sm:$0xff] }
  0x38   : > { %v12117_v52 = vld [vmem:[#allocation2 + $0xd9] sm:$0xff]  ;;  %v12123_v53 = vld [vmem:[#allocation2 + $0xe1] sm:$0xff]  ;;  %v12190_v9 = vld [vmem:[#allocation2 + $0x30] sm:$0xff] }
  0x39   : > { %v12125_v54 = vld [vmem:[#allocation2 + $0xf1] sm:$0xff]  ;;  %v12131_v55 = vld [vmem:[#allocation2 + $0xf9] sm:$0xff]  ;;  %v12200_v11 = vld [vmem:[#allocation2 + $0x48] sm:$0xff] }
  0x3a   : > { %10184 = vmatmul.mubr.msk.f32.gmra.mrb[6].mxu0 %vm225_vm1, %v12063_v35  ;;  %v12133_v56 = vld [vmem:[#allocation2 + $0x109] sm:$0xff]  ;;  %v12139_v57 = vld [vmem:[#allocation2 + $0x111] sm:$0xff]  ;;  %v12188_v8 = vld [vmem:[#allocation2 + $0x20] sm:$0xff] }
  0x3b   : > { %10186 = vmatprep.mubr.msk.f32.mxu0 %vm225_vm1, %v12065_v36  ;;  %v12141_v58 = vld [vmem:[#allocation2 + $0x121] sm:$0xff]  ;;  %v12147_v59 = vld [vmem:[#allocation2 + $0x129] sm:$0xff]  ;;  %v12176_v5 = vld [vmem:[#allocation2 + $0x18] sm:$0xff] }
  0x3c   : > { %v12149_v60 = vld [vmem:[#allocation2 + $0x139] sm:$0xff]  ;;  %v12155_v61 = vld [vmem:[#allocation2 + $0x141] sm:$0xff]  ;;  %v12224_v16 = vld [vmem:[#allocation2 + $0x90] sm:$0xff] }
  0x3d   : > { %v12157_v62 = vld [vmem:[#allocation2 + $0x151] sm:$0xff]  ;;  %v12163_v63 = vld [vmem:[#allocation2 + $0x159] sm:$0xff]  ;;  %v12214_v13 = vld [vmem:[#allocation2 + $0x68] sm:$0xff] }
  0x3e   : > { %10187 = vmatmul.mubr.msk.f32.gmra.mrb[8].mxu0 %vm225_vm1, %v12081_v43  ;;  %14396 = vst [vmem:[#allocation4_spill] sm:$0xff] %v12157_v62  ;;  %14397 = vst [vmem:[#allocation5_spill] sm:$0xff] %v12163_v63  ;;  %v12165_v0 = vld [vmem:[#allocation2 + $0x169] sm:$0xff]  ;;  %v12171_v2 = vld [vmem:[#allocation2 + $0x171] sm:$0xff] }
  0x3f   : > { %10189 = vmatprep.mubr.msk.f32.mxu0 %vm225_vm1, %v12085_v44  ;;  %14398 = vst [vmem:[#allocation6_spill] sm:$0xff] %v12165_v0  ;;  %14399 = vst [vmem:[#allocation7_spill] sm:$0xff] %v12171_v2  ;;  %v12198_v10 = vld [vmem:[#allocation2 + $0x38] sm:$0xff]  ;;  %v12208_v12 = vld [vmem:[#allocation2 + $0x60] sm:$0xff] }
  0x40   : > { %v12216_v14 = vld [vmem:[#allocation2 + $0x78] sm:$0xff]  ;;  %v12222_v15 = vld [vmem:[#allocation2 + $0x80] sm:$0xff]  ;;  %v12232_v18 = vld [vmem:[#allocation2 + $0xa8] sm:$0xff] }
  0x41   : > { %v12230_v17 = vld [vmem:[#allocation2 + $0x98] sm:$0xff]  ;;  %v12238_v19 = vld [vmem:[#allocation2 + $0xb0] sm:$0xff]  ;;  %v12240_v20 = vld [vmem:[#allocation2 + $0xc0] sm:$0xff] }
  0x42   : > { %10190 = vmatmul.mubr.msk.f32.gmra.mrb[10].mxu0 %vm225_vm1, %v12091_v45  ;;  %v12246_v21 = vld [vmem:[#allocation2 + $0xc8] sm:$0xff]  ;;  %v12248_v22 = vld [vmem:[#allocation2 + $0xd8] sm:$0xff]  ;;  %v12254_v23 = vld [vmem:[#allocation2 + $0xe0] sm:$0xff] }
  0x43   : > { %10192 = vmatprep.mubr.msk.f32.mxu0 %vm225_vm1, %v12093_v46  ;;  %v12256_v24 = vld [vmem:[#allocation2 + $0xf0] sm:$0xff]  ;;  %v12262_v25 = vld [vmem:[#allocation2 + $0xf8] sm:$0xff]  ;;  %v12264_v26 = vld [vmem:[#allocation2 + $0x108] sm:$0xff] }
  0x44   : > { %v12270_v27 = vld [vmem:[#allocation2 + $0x110] sm:$0xff]  ;;  %v12272_v31 = vld [vmem:[#allocation2 + $0x120] sm:$0xff]  ;;  %v12278_v32 = vld [vmem:[#allocation2 + $0x128] sm:$0xff] }
  0x45   : > { %v12280_v37 = vld [vmem:[#allocation2 + $0x138] sm:$0xff]  ;;  %v12286_v38 = vld [vmem:[#allocation2 + $0x140] sm:$0xff]  ;;  %v12288_v39 = vld [vmem:[#allocation2 + $0x150] sm:$0xff] }
  0x46   : > { %10193 = vmatmul.mubr.msk.f32.gmra.mrb[12].mxu0 %vm225_vm1, %v12099_v47  ;;  %v311_v40 = vld [vmem:[%s11983_s27 + $0xf0] sm:$0xff]  ;;  %v312_v41 = vld [vmem:[%s11983_s27 + $0xf8] sm:$0xff] }
  0x47   : > { %10195 = vmatprep.mubr.msk.f32.mxu0 %vm225_vm1, %v12101_v48  ;;  %344 = vst.msk [vmem:[#allocation2 + $0x181] sm:$0xff] %vm225_vm1, %v311_v40  ;;  %345 = vst.msk [vmem:[#allocation2 + $0x189] sm:$0xff] %vm225_vm1, %v312_v41  ;;  %v12298_v42 = vld [vmem:[#allocation2 + $0x158] sm:$0xff]  ;;  %v1062_v40 = vld [vmem:[#allocation2 + $0x2] sm:$0xff] }
  0x48   : > { %v1063_v41 = vld [vmem:[#allocation2 + $0xa] sm:$0xff]  ;;  %v12311_v1 = vld [vmem:[#allocation2 + $0x1a] sm:$0xff] }
  0x49   : > { %14400 = vst [vmem:[#allocation8_spill] sm:$0xff] %v12311_v1 }
  0x4a   : > { %10196 = vmatmul.mubr.msk.f32.gmra.mrb[14].mxu0 %vm225_vm1, %v12107_v49 }
  0x4b   : > { %10198 = vmatprep.mubr.msk.f32.mxu0 %vm225_vm1, %v12109_v50 }
  0x4e   : > { %10199 = vmatmul.mubr.msk.f32.gmra.mrb[16].mxu0 %vm225_vm1, %v12115_v51 }
  0x4f   : > { %10201 = vmatprep.mubr.msk.f32.mxu0 %vm225_vm1, %v12117_v52 }
  0x52   : > { %10202 = vmatmul.mubr.msk.f32.gmra.mrb[18].mxu0 %vm225_vm1, %v12123_v53 }
  0x53   : > { %10204 = vmatprep.mubr.msk.f32.mxu0 %vm225_vm1, %v12125_v54 }
  0x56   : > { %10205 = vmatmul.mubr.msk.f32.gmra.mrb[20].mxu0 %vm225_vm1, %v12131_v55 }
  0x57   : > { %10207 = vmatprep.mubr.msk.f32.mxu0 %vm225_vm1, %v12133_v56 }
  0x5a   : > { %10208 = vmatmul.mubr.msk.f32.gmra.mrb[22].mxu0 %vm225_vm1, %v12139_v57 }
  0x5b   : > { %10210 = vmatprep.mubr.msk.f32.mxu0 %vm225_vm1, %v12141_v58 }
  0x5e   : > { %10211 = vmatmul.mubr.msk.f32.gmra.mrb[24].mxu0 %vm225_vm1, %v12147_v59 }
  0x5f   : > { %10213 = vmatprep.mubr.msk.f32.mxu0 %vm225_vm1, %v12149_v60 }
  0x62   : > { %10214 = vmatmul.mubr.msk.f32.gmra.mrb[26].mxu0 %vm225_vm1, %v12155_v61 }
  0x63   : > { %10216 = vmatprep.mubr.msk.f32.mxu0 %vm225_vm1, %v12157_v62 }
  0x66   : > { %10217 = vmatmul.mubr.msk.f32.gmra.mrb[28].mxu0 %vm225_vm1, %v12163_v63  ;;  %v12325_v63 = vld [vmem:[#allocation2 + $0x32] sm:$0xff] }
  0x67   : > { %10219 = vmatprep.mubr.msk.f32.mxu0 %vm225_vm1, %v12165_v0  ;;  %v12323_v0 = vld [vmem:[#allocation2 + $0x22] sm:$0xff]  ;;  %14402 = vst [vmem:[#allocation10_spill] sm:$0xff] %v12325_v63 }
  0x68   : > { %14401 = vst [vmem:[#allocation9_spill] sm:$0xff] %v12323_v0 }
  0x6a   : > { %10220 = vmatmul.mubr.msk.f32.gmra.mrb[30].mxu0 %vm225_vm1, %v12171_v2  ;;  %v12316_v2 = vld [vmem:[%s14265_s1 + $0x10] sm:$0xf] }
  0x6b   : > { %10224 = vmatprep.mubr.msk.f32.mxu0 %vm225_vm1, %v346_v3  ;;  %v12300_v3 = vld [vmem:[#allocation2 + $0x168] sm:$0xff] }
  0x6e   : > { %10225 = vmatmul.mubr.msk.f32.vlgmr.msra.gmra.mrb[0].mxu0 %vm225_vm1, %v347_v4  ;;  %v12306_v4 = vld [vmem:[#allocation2 + $0x170] sm:$0xff] }
  0x6f   : > { %10273 = vmatpush3.msk.msra.mxu0 %vm509_vm0, %v11991_v6  ;;  %10227 = vmatprep.mubr.msk.f32.mxu0 %vm225_vm1, %v12176_v5  ;;  %v12206_v6 = vld [vmem:[#allocation2 + $0x50] sm:$0xff] }
  0x70   : > { %10322 = vmatprep.subr.msk.mxu0 %vm509_vm0, %v12181_v7 }
  0x72   : > { %10228 = vmatmul.mubr.msk.f32.gmra.mrb[2].mxu0 %vm225_vm1, %v12188_v8 }
  0x73   : > { %10230 = vmatprep.mubr.msk.f32.mxu0 %vm225_vm1, %v12190_v9 }
  0x76   : > { %10231 = vmatmul.mubr.msk.f32.gmra.mrb[4].mxu0 %vm225_vm1, %v12198_v10 }
  0x77   : > { %10233 = vmatprep.mubr.msk.f32.mxu0 %vm225_vm1, %v12200_v11 }
  0x7a   : > { %10234 = vmatmul.mubr.msk.f32.gmra.mrb[6].mxu0 %vm225_vm1, %v12206_v6 }
  0x7b   : > { %10236 = vmatprep.mubr.msk.f32.mxu0 %vm225_vm1, %v12208_v12 }
  0x7e   : > { %10237 = vmatmul.mubr.msk.f32.gmra.mrb[8].mxu0 %vm225_vm1, %v12214_v13 }
  0x7f   : > { %10239 = vmatprep.mubr.msk.f32.mxu0 %vm225_vm1, %v12216_v14 }
  0x82   : > { %10240 = vmatmul.mubr.msk.f32.gmra.mrb[10].mxu0 %vm225_vm1, %v12222_v15 }
  0x83   : > { %10242 = vmatprep.mubr.msk.f32.mxu0 %vm225_vm1, %v12224_v16 }
  0x86   : > { %10243 = vmatmul.mubr.msk.f32.gmra.mrb[12].mxu0 %vm225_vm1, %v12230_v17 }
  0x87   : > { %10245 = vmatprep.mubr.msk.f32.mxu0 %vm225_vm1, %v12232_v18 }
  0x8a   : > { %10246 = vmatmul.mubr.msk.f32.gmra.mrb[14].mxu0 %vm225_vm1, %v12238_v19 }
  0x8b   : > { %10248 = vmatprep.mubr.msk.f32.mxu0 %vm225_vm1, %v12240_v20 }
  0x8e   : > { %10249 = vmatmul.mubr.msk.f32.gmra.mrb[16].mxu0 %vm225_vm1, %v12246_v21 }
  0x8f   : > { %10251 = vmatprep.mubr.msk.f32.mxu0 %vm225_vm1, %v12248_v22 }
  0x92   : > { %10252 = vmatmul.mubr.msk.f32.gmra.mrb[18].mxu0 %vm225_vm1, %v12254_v23 }
  0x93   : > { %10254 = vmatprep.mubr.msk.f32.mxu0 %vm225_vm1, %v12256_v24 }
  0x96   : > { %10255 = vmatmul.mubr.msk.f32.gmra.mrb[20].mxu0 %vm225_vm1, %v12262_v25 }
  0x97   : > { %10257 = vmatprep.mubr.msk.f32.mxu0 %vm225_vm1, %v12264_v26 }
  0x9a   : > { %10258 = vmatmul.mubr.msk.f32.gmra.mrb[22].mxu0 %vm225_vm1, %v12270_v27 }
  0x9b   : > { %10260 = vmatprep.mubr.msk.f32.mxu0 %vm225_vm1, %v12272_v31 }
  0x9e   : > { %10261 = vmatmul.mubr.msk.f32.gmra.mrb[24].mxu0 %vm225_vm1, %v12278_v32 }
  0x9f   : > { %10263 = vmatprep.mubr.msk.f32.mxu0 %vm225_vm1, %v12280_v37 }
  0xa2   : > { %10264 = vmatmul.mubr.msk.f32.gmra.mrb[26].mxu0 %vm225_vm1, %v12286_v38 }
  0xa3   : > { %10266 = vmatprep.mubr.msk.f32.mxu0 %vm225_vm1, %v12288_v39 }
  0xa6   : > { %10267 = vmatmul.mubr.msk.f32.gmra.mrb[28].mxu0 %vm225_vm1, %v12298_v42 }
  0xa7   : > { %10269 = vmatprep.mubr.msk.f32.mxu0 %vm225_vm1, %v12300_v3 }
  0xaa   : > { %10270 = vmatmul.mubr.msk.f32.gmra.mrb[30].mxu0 %vm225_vm1, %v12306_v4 }
  0xab   : > { %10274 = vmatprep.mubr.msk.f32.mxu0 %vm225_vm1, %v1062_v40  ;;  %v12333_v40 = vld [vmem:[#allocation2 + $0x3a] sm:$0xff] }
  0xac   : > { %14403 = vst [vmem:[#allocation11_spill] sm:$0xff] %v12333_v40 }
  0xae   : > { %10275 = vmatmul.mubr.msk.f32.vlgmr.msra.gmra.mrb[0].mxu0 %vm225_vm1, %v1063_v41  ;;  %v12335_v41 = vld [vmem:[#allocation2 + $0x4a] sm:$0xff] }
  0xaf   : > { %10323 = vmatpush3.msk.msra.mxu0 %vm509_vm0, %v12181_v7  ;;  %10277 = vmatprep.mubr.msk.f32.mxu0 %vm225_vm1, %v12311_v1  ;;  %14404 = vst [vmem:[#allocation12_spill] sm:$0xff] %v12335_v41  ;;  %v12341_v7 = vld [vmem:[#allocation2 + $0x52] sm:$0xff]  ;;  %v12343_v1 = vld [vmem:[#allocation2 + $0x62] sm:$0xff] }
  0xb0   : > { %10372 = vmatprep.subr.msk.mxu0 %vm509_vm0, %v12316_v2  ;;  %14405 = vst [vmem:[#allocation13_spill] sm:$0xff] %v12341_v7  ;;  %14406 = vst [vmem:[#allocation14_spill] sm:$0xff] %v12343_v1 }
  0xb2   : > { %10278 = vmatmul.mubr.msk.f32.gmra.mrb[2].mxu0 %vm225_vm1, %v12323_v0  ;;  %v12351_v0 = vld [vmem:[#allocation2 + $0x7a] sm:$0xff] }
  0xb3   : > { %10280 = vmatprep.mubr.msk.f32.mxu0 %vm225_vm1, %v12325_v63  ;;  %v12349_v63 = vld [vmem:[#allocation2 + $0x6a] sm:$0xff]  ;;  %14408 = vst [vmem:[#allocation16_spill] sm:$0xff] %v12351_v0 }
  0xb4   : > { %14407 = vst [vmem:[#allocation15_spill] sm:$0xff] %v12349_v63 }
  0xb6   : > { %10281 = vmatmul.mubr.msk.f32.gmra.mrb[4].mxu0 %vm225_vm1, %v12333_v40  ;;  %v12359_v40 = vld [vmem:[#allocation2 + $0x92] sm:$0xff] }
  0xb7   : > { %10283 = vmatprep.mubr.msk.f32.mxu0 %vm225_vm1, %v12335_v41  ;;  %v12357_v41 = vld [vmem:[#allocation2 + $0x82] sm:$0xff]  ;;  %14410 = vst [vmem:[#allocation18_spill] sm:$0xff] %v12359_v40 }
  0xb8   : > { %14409 = vst [vmem:[#allocation17_spill] sm:$0xff] %v12357_v41 }
  0xba   : > { %10284 = vmatmul.mubr.msk.f32.gmra.mrb[6].mxu0 %vm225_vm1, %v12341_v7  ;;  %v12367_v7 = vld [vmem:[#allocation2 + $0xaa] sm:$0xff] }
  0xbb   : > { %10286 = vmatprep.mubr.msk.f32.mxu0 %vm225_vm1, %v12343_v1  ;;  %v12365_v1 = vld [vmem:[#allocation2 + $0x9a] sm:$0xff]  ;;  %14412 = vst [vmem:[#allocation20_spill] sm:$0xff] %v12367_v7 }
  0xbc   : > { %14411 = vst [vmem:[#allocation19_spill] sm:$0xff] %v12365_v1 }
  0xbe   : > { %10287 = vmatmul.mubr.msk.f32.gmra.mrb[8].mxu0 %vm225_vm1, %v12349_v63  ;;  %v12375_v63 = vld [vmem:[#allocation2 + $0xc2] sm:$0xff] }
  0xbf   : > { %10289 = vmatprep.mubr.msk.f32.mxu0 %vm225_vm1, %v12351_v0  ;;  %v12373_v0 = vld [vmem:[#allocation2 + $0xb2] sm:$0xff]  ;;  %14414 = vst [vmem:[#allocation22_spill] sm:$0xff] %v12375_v63 }
  0xc0   : > { %14413 = vst [vmem:[#allocation21_spill] sm:$0xff] %v12373_v0 }
  0xc2   : > { %10290 = vmatmul.mubr.msk.f32.gmra.mrb[10].mxu0 %vm225_vm1, %v12357_v41  ;;  %v12383_v41 = vld [vmem:[#allocation2 + $0xda] sm:$0xff] }
  0xc3   : > { %10292 = vmatprep.mubr.msk.f32.mxu0 %vm225_vm1, %v12359_v40  ;;  %v12381_v40 = vld [vmem:[#allocation2 + $0xca] sm:$0xff]  ;;  %14416 = vst [vmem:[#allocation24_spill] sm:$0xff] %v12383_v41 }
  0xc4   : > { %14415 = vst [vmem:[#allocation23_spill] sm:$0xff] %v12381_v40 }
  0xc6   : > { %10293 = vmatmul.mubr.msk.f32.gmra.mrb[12].mxu0 %vm225_vm1, %v12365_v1  ;;  %v12391_v1 = vld [vmem:[#allocation2 + $0xf2] sm:$0xff] }
  0xc7   : > { %10295 = vmatprep.mubr.msk.f32.mxu0 %vm225_vm1, %v12367_v7  ;;  %v12389_v7 = vld [vmem:[#allocation2 + $0xe2] sm:$0xff]  ;;  %14418 = vst [vmem:[#allocation26_spill] sm:$0xff] %v12391_v1 }
  0xc8   : > { %14417 = vst [vmem:[#allocation25_spill] sm:$0xff] %v12389_v7 }
  0xca   : > { %10296 = vmatmul.mubr.msk.f32.gmra.mrb[14].mxu0 %vm225_vm1, %v12373_v0  ;;  %v12399_v0 = vld [vmem:[#allocation2 + $0x10a] sm:$0xff] }
  0xcb   : > { %10298 = vmatprep.mubr.msk.f32.mxu0 %vm225_vm1, %v12375_v63  ;;  %v12397_v63 = vld [vmem:[#allocation2 + $0xfa] sm:$0xff]  ;;  %14420 = vst [vmem:[#allocation28_spill] sm:$0xff] %v12399_v0 }
  0xcc   : > { %14419 = vst [vmem:[#allocation27_spill] sm:$0xff] %v12397_v63 }
  0xce   : > { %10299 = vmatmul.mubr.msk.f32.gmra.mrb[16].mxu0 %vm225_vm1, %v12381_v40  ;;  %v12407_v40 = vld [vmem:[#allocation2 + $0x122] sm:$0xff] }
  0xcf   : > { %10301 = vmatprep.mubr.msk.f32.mxu0 %vm225_vm1, %v12383_v41  ;;  %v12405_v41 = vld [vmem:[#allocation2 + $0x112] sm:$0xff]  ;;  %14422 = vst [vmem:[#allocation30_spill] sm:$0xff] %v12407_v40 }
  0xd0   : > { %14421 = vst [vmem:[#allocation29_spill] sm:$0xff] %v12405_v41 }
  0xd2   : > { %10302 = vmatmul.mubr.msk.f32.gmra.mrb[18].mxu0 %vm225_vm1, %v12389_v7  ;;  %v12415_v7 = vld [vmem:[#allocation2 + $0x13a] sm:$0xff] }
  0xd3   : > { %10304 = vmatprep.mubr.msk.f32.mxu0 %vm225_vm1, %v12391_v1  ;;  %v12413_v1 = vld [vmem:[#allocation2 + $0x12a] sm:$0xff]  ;;  %14423 = vst [vmem:[#allocation31_spill] sm:$0xff] %v12415_v7 }
  0xd6   : > { %10305 = vmatmul.mubr.msk.f32.gmra.mrb[20].mxu0 %vm225_vm1, %v12397_v63  ;;  %v12423_v63 = vld [vmem:[#allocation2 + $0x152] sm:$0xff] }
  0xd7   : > { %10307 = vmatprep.mubr.msk.f32.mxu0 %vm225_vm1, %v12399_v0  ;;  %v12421_v0 = vld [vmem:[#allocation2 + $0x142] sm:$0xff]  ;;  %14424 = vst [vmem:[#allocation32_spill] sm:$0xff] %v12423_v63 }
  0xda   : > { %10308 = vmatmul.mubr.msk.f32.gmra.mrb[22].mxu0 %vm225_vm1, %v12405_v41  ;;  %v12431_v41 = vld [vmem:[#allocation2 + $0x16a] sm:$0xff] }
  0xdb   : > { %10310 = vmatprep.mubr.msk.f32.mxu0 %vm225_vm1, %v12407_v40  ;;  %v12429_v40 = vld [vmem:[#allocation2 + $0x15a] sm:$0xff]  ;;  %14425 = vst [vmem:[#allocation33_spill] sm:$0xff] %v12431_v41 }
  0xde   : > { %10311 = vmatmul.mubr.msk.f32.gmra.mrb[24].mxu0 %vm225_vm1, %v12413_v1 }
  0xdf   : > { %10313 = vmatprep.mubr.msk.f32.mxu0 %vm225_vm1, %v12415_v7  ;;  %v12437_v7 = vld [vmem:[#allocation2 + $0x172] sm:$0xff] }
  0xe2   : > { %10314 = vmatmul.mubr.msk.f32.gmra.mrb[26].mxu0 %vm225_vm1, %v12421_v0 }
  0xe3   : > { %10316 = vmatprep.mubr.msk.f32.mxu0 %vm225_vm1, %v12423_v63  ;;  %v8909_v63 = vld [vmem:[%s14265_s1 + $0x14] sm:$0xf] }
  0xe6   : > { %10317 = vmatmul.mubr.msk.f32.gmra.mrb[28].mxu0 %vm225_vm1, %v12429_v40 }
  0xe7   : > { %10319 = vmatprep.mubr.msk.f32.mxu0 %vm225_vm1, %v12431_v41 }
  0xea   : > { %10320 = vmatmul.mubr.msk.f32.gmra.mrb[30].mxu0 %vm225_vm1, %v12437_v7 }
  0xeb   : > { %10324 = vmatprep.mubr.msk.f32.mxu0 %vm225_vm1, %v12176_v5  ;;  %v12511_v5 = vld [vmem:[#allocation2 + $0x188] sm:$0xff] }
  0xee   : > { %10325 = vmatmul.mubr.msk.f32.vlgmr.msra.gmra.mrb[0].mxu0 %vm225_vm1, %v12188_v8  ;;  %v8943_v8 = vld [vmem:[%s14265_s1 + $0x18] sm:$0xf] }
  0xef   : > { %10373 = vmatpush3.msk.msra.mxu0 %vm509_vm0, %v12316_v2  ;;  %10327 = vmatprep.mubr.msk.f32.mxu0 %vm225_vm1, %v12190_v9  ;;  %v12505_v2 = vld [vmem:[#allocation2 + $0x180] sm:$0xff] }
  0xf0   : > { %10422 = vmatprep.subr.msk.mxu0 %vm509_vm0, %v8909_v63 }
  0xf2   : > { %10328 = vmatmul.mubr.msk.f32.gmra.mrb[2].mxu0 %vm225_vm1, %v12198_v10 }
  0xf3   : > { %10330 = vmatprep.mubr.msk.f32.mxu0 %vm225_vm1, %v12200_v11 }
  0xf6   : > { %10331 = vmatmul.mubr.msk.f32.gmra.mrb[4].mxu0 %vm225_vm1, %v12206_v6 }
  0xf7   : > { %10333 = vmatprep.mubr.msk.f32.mxu0 %vm225_vm1, %v12208_v12 }
  0xfa   : > { %10334 = vmatmul.mubr.msk.f32.gmra.mrb[6].mxu0 %vm225_vm1, %v12214_v13 }
  0xfb   : > { %10336 = vmatprep.mubr.msk.f32.mxu0 %vm225_vm1, %v12216_v14 }
  0xfe   : > { %10337 = vmatmul.mubr.msk.f32.gmra.mrb[8].mxu0 %vm225_vm1, %v12222_v15 }
  0xff   : > { %10339 = vmatprep.mubr.msk.f32.mxu0 %vm225_vm1, %v12224_v16 }
 0x102   : > { %10340 = vmatmul.mubr.msk.f32.gmra.mrb[10].mxu0 %vm225_vm1, %v12230_v17 }
 0x103   : > { %10342 = vmatprep.mubr.msk.f32.mxu0 %vm225_vm1, %v12232_v18 }
 0x106   : > { %10343 = vmatmul.mubr.msk.f32.gmra.mrb[12].mxu0 %vm225_vm1, %v12238_v19 }
 0x107   : > { %10345 = vmatprep.mubr.msk.f32.mxu0 %vm225_vm1, %v12240_v20 }
 0x10a   : > { %10346 = vmatmul.mubr.msk.f32.gmra.mrb[14].mxu0 %vm225_vm1, %v12246_v21 }
 0x10b   : > { %10348 = vmatprep.mubr.msk.f32.mxu0 %vm225_vm1, %v12248_v22 }
 0x10e   : > { %10349 = vmatmul.mubr.msk.f32.gmra.mrb[16].mxu0 %vm225_vm1, %v12254_v23 }
 0x10f   : > { %10351 = vmatprep.mubr.msk.f32.mxu0 %vm225_vm1, %v12256_v24 }
 0x112   : > { %10352 = vmatmul.mubr.msk.f32.gmra.mrb[18].mxu0 %vm225_vm1, %v12262_v25 }
 0x113   : > { %10354 = vmatprep.mubr.msk.f32.mxu0 %vm225_vm1, %v12264_v26 }
 0x116   : > { %10355 = vmatmul.mubr.msk.f32.gmra.mrb[20].mxu0 %vm225_vm1, %v12270_v27 }
 0x117   : > { %10357 = vmatprep.mubr.msk.f32.mxu0 %vm225_vm1, %v12272_v31 }
 0x11a   : > { %10358 = vmatmul.mubr.msk.f32.gmra.mrb[22].mxu0 %vm225_vm1, %v12278_v32 }
 0x11b   : > { %10360 = vmatprep.mubr.msk.f32.mxu0 %vm225_vm1, %v12280_v37 }
 0x11e   : > { %10361 = vmatmul.mubr.msk.f32.gmra.mrb[24].mxu0 %vm225_vm1, %v12286_v38 }
 0x11f   : > { %10363 = vmatprep.mubr.msk.f32.mxu0 %vm225_vm1, %v12288_v39 }
 0x122   : > { %10364 = vmatmul.mubr.msk.f32.gmra.mrb[26].mxu0 %vm225_vm1, %v12298_v42 }
 0x123   : > { %10366 = vmatprep.mubr.msk.f32.mxu0 %vm225_vm1, %v12300_v3 }
 0x126   : > { %10367 = vmatmul.mubr.msk.f32.gmra.mrb[28].mxu0 %vm225_vm1, %v12306_v4 }
 0x127   : > { %10369 = vmatprep.mubr.msk.f32.mxu0 %vm225_vm1, %v12505_v2 }
 0x12a   : > { %10370 = vmatmul.mubr.msk.f32.gmra.mrb[30].mxu0 %vm225_vm1, %v12511_v5 }
 0x12b   : > { %10374 = vmatprep.mubr.msk.f32.mxu0 %vm225_vm1, %v12036_v28  ;;  %v14426_v28 = vld [vmem:[#allocation5_spill] sm:$0xff] }
 0x12e   : > { %10375 = vmatmul.mubr.msk.f32.vlgmr.msra.gmra.mrb[0].mxu0 %vm225_vm1, %v12038_v29  ;;  %v14427_v29 = vld [vmem:[#allocation6_spill] sm:$0xff] }
 0x12f   : > { %10423 = vmatpush3.msk.msra.mxu0 %vm509_vm0, %v8909_v63  ;;  %10377 = vmatprep.mubr.msk.f32.mxu0 %vm225_vm1, %v12040_v30  ;;  %v12578_v30 = vld [vmem:[#allocation2 + $0x181] sm:$0xff]  ;;  %v8977_v63 = vld [vmem:[%s14265_s1 + $0x1c] sm:$0xf] }
 0x130   : > { %10472 = vmatprep.subr.msk.mxu0 %vm509_vm0, %v8943_v8  ;;  %14428 = vst [vmem:[#allocation34_spill] sm:$0xff] %v12578_v30 }
 0x132   : > { %10378 = vmatmul.mubr.msk.f32.gmra.mrb[2].mxu0 %vm225_vm1, %v12055_v33  ;;  %v14429_v33 = vld [vmem:[#allocation7_spill] sm:$0xff] }
 0x133   : > { %10380 = vmatprep.mubr.msk.f32.mxu0 %vm225_vm1, %v12057_v34  ;;  %v12584_v34 = vld [vmem:[#allocation2 + $0x189] sm:$0xff] }
 0x134   : > { %14430 = vst [vmem:[#allocation35_spill] sm:$0xff] %v12584_v34 }
 0x136   : > { %10381 = vmatmul.mubr.msk.f32.gmra.mrb[4].mxu0 %vm225_vm1, %v12063_v35  ;;  %v14431_v35 = vld [vmem:[#allocation8_spill] sm:$0xff] }
 0x137   : > { %10383 = vmatprep.mubr.msk.f32.mxu0 %vm225_vm1, %v12065_v36 }
 0x13a   : > { %10384 = vmatmul.mubr.msk.f32.gmra.mrb[6].mxu0 %vm225_vm1, %v12081_v43 }
 0x13b   : > { %10386 = vmatprep.mubr.msk.f32.mxu0 %vm225_vm1, %v12085_v44 }
 0x13e   : > { %10387 = vmatmul.mubr.msk.f32.gmra.mrb[8].mxu0 %vm225_vm1, %v12091_v45 }
 0x13f   : > { %10389 = vmatprep.mubr.msk.f32.mxu0 %vm225_vm1, %v12093_v46 }
 0x142   : > { %10390 = vmatmul.mubr.msk.f32.gmra.mrb[10].mxu0 %vm225_vm1, %v12099_v47 }
 0x143   : > { %10392 = vmatprep.mubr.msk.f32.mxu0 %vm225_vm1, %v12101_v48 }
 0x146   : > { %10393 = vmatmul.mubr.msk.f32.gmra.mrb[12].mxu0 %vm225_vm1, %v12107_v49 }
 0x147   : > { %10395 = vmatprep.mubr.msk.f32.mxu0 %vm225_vm1, %v12109_v50 }
 0x14a   : > { %10396 = vmatmul.mubr.msk.f32.gmra.mrb[14].mxu0 %vm225_vm1, %v12115_v51 }
 0x14b   : > { %10398 = vmatprep.mubr.msk.f32.mxu0 %vm225_vm1, %v12117_v52 }
 0x14e   : > { %10399 = vmatmul.mubr.msk.f32.gmra.mrb[16].mxu0 %vm225_vm1, %v12123_v53 }
 0x14f   : > { %10401 = vmatprep.mubr.msk.f32.mxu0 %vm225_vm1, %v12125_v54 }
 0x152   : > { %10402 = vmatmul.mubr.msk.f32.gmra.mrb[18].mxu0 %vm225_vm1, %v12131_v55 }
 0x153   : > { %10404 = vmatprep.mubr.msk.f32.mxu0 %vm225_vm1, %v12133_v56 }
 0x156   : > { %10405 = vmatmul.mubr.msk.f32.gmra.mrb[20].mxu0 %vm225_vm1, %v12139_v57 }
 0x157   : > { %10407 = vmatprep.mubr.msk.f32.mxu0 %vm225_vm1, %v12141_v58 }
 0x15a   : > { %10408 = vmatmul.mubr.msk.f32.gmra.mrb[22].mxu0 %vm225_vm1, %v12147_v59 }
 0x15b   : > { %10410 = vmatprep.mubr.msk.f32.mxu0 %vm225_vm1, %v12149_v60 }
 0x15e   : > { %10411 = vmatmul.mubr.msk.f32.gmra.mrb[24].mxu0 %vm225_vm1, %v12155_v61 }
 0x15f   : > { %10413 = vmatprep.mubr.msk.f32.mxu0 %vm225_vm1, %v12157_v62  ;;  %v14441_v62 = vld [vmem:[#allocation18_spill] sm:$0xff] }
 0x162   : > { %10414 = vmatmul.mubr.msk.f32.gmra.mrb[26].mxu0 %vm225_vm1, %v14426_v28  ;;  %v14437_v28 = vld [vmem:[#allocation14_spill] sm:$0xff] }
 0x163   : > { %10416 = vmatprep.mubr.msk.f32.mxu0 %vm225_vm1, %v14427_v29  ;;  %v14432_v29 = vld [vmem:[#allocation9_spill] sm:$0xff] }
 0x166   : > { %10417 = vmatmul.mubr.msk.f32.gmra.mrb[28].mxu0 %vm225_vm1, %v14429_v33  ;;  %v14433_v33 = vld [vmem:[#allocation10_spill] sm:$0xff] }
 0x167   : > { %10419 = vmatprep.mubr.msk.f32.mxu0 %vm225_vm1, %v12578_v30  ;;  %v14434_v30 = vld [vmem:[#allocation11_spill] sm:$0xff] }
 0x16a   : > { %10420 = vmatmul.mubr.msk.f32.gmra.mrb[30].mxu0 %vm225_vm1, %v12584_v34  ;;  %v14435_v34 = vld [vmem:[#allocation12_spill] sm:$0xff] }
 0x16b   : > { %10424 = vmatprep.mubr.msk.f32.mxu0 %vm225_vm1, %v14431_v35  ;;  %v14436_v35 = vld [vmem:[#allocation13_spill] sm:$0xff] }
 0x16e   : > { %10425 = vmatmul.mubr.msk.f32.vlgmr.msra.gmra.mrb[0].mxu0 %vm225_vm1, %v14432_v29  ;;  %v14438_v29 = vld [vmem:[#allocation15_spill] sm:$0xff] }
 0x16f   : > { %10473 = vmatpush3.msk.msra.mxu0 %vm509_vm0, %v8943_v8  ;;  %10427 = vmatprep.mubr.msk.f32.mxu0 %vm225_vm1, %v14433_v33  ;;  %v14439_v8 = vld [vmem:[#allocation16_spill] sm:$0xff]  ;;  %v14440_v33 = vld [vmem:[#allocation17_spill] sm:$0xff] }
 0x170   : > { %10522 = vmatprep.subr.msk.mxu0 %vm509_vm0, %v8977_v63 }
 0x172   : > { %10428 = vmatmul.mubr.msk.f32.gmra.mrb[2].mxu0 %vm225_vm1, %v14434_v30  ;;  %v14442_v30 = vld [vmem:[#allocation19_spill] sm:$0xff] }
 0x173   : > { %10430 = vmatprep.mubr.msk.f32.mxu0 %vm225_vm1, %v14435_v34  ;;  %v14443_v34 = vld [vmem:[#allocation20_spill] sm:$0xff] }
 0x176   : > { %10431 = vmatmul.mubr.msk.f32.gmra.mrb[4].mxu0 %vm225_vm1, %v14436_v35  ;;  %v14444_v35 = vld [vmem:[#allocation21_spill] sm:$0xff] }
 0x177   : > { %10433 = vmatprep.mubr.msk.f32.mxu0 %vm225_vm1, %v14437_v28  ;;  %v14445_v28 = vld [vmem:[#allocation22_spill] sm:$0xff] }
 0x17a   : > { %10434 = vmatmul.mubr.msk.f32.gmra.mrb[6].mxu0 %vm225_vm1, %v14438_v29  ;;  %v14446_v29 = vld [vmem:[#allocation23_spill] sm:$0xff] }
 0x17b   : > { %10436 = vmatprep.mubr.msk.f32.mxu0 %vm225_vm1, %v14439_v8  ;;  %v14447_v8 = vld [vmem:[#allocation24_spill] sm:$0xff] }
 0x17e   : > { %10437 = vmatmul.mubr.msk.f32.gmra.mrb[8].mxu0 %vm225_vm1, %v14440_v33  ;;  %v14448_v33 = vld [vmem:[#allocation25_spill] sm:$0xff] }
 0x17f   : > { %10439 = vmatprep.mubr.msk.f32.mxu0 %vm225_vm1, %v14441_v62  ;;  %v14449_v62 = vld [vmem:[#allocation26_spill] sm:$0xff] }
 0x182   : > { %10440 = vmatmul.mubr.msk.f32.gmra.mrb[10].mxu0 %vm225_vm1, %v14442_v30  ;;  %v14450_v30 = vld [vmem:[#allocation27_spill] sm:$0xff] }
 0x183   : > { %10442 = vmatprep.mubr.msk.f32.mxu0 %vm225_vm1, %v14443_v34  ;;  %v14451_v34 = vld [vmem:[#allocation28_spill] sm:$0xff] }
 0x186   : > { %10443 = vmatmul.mubr.msk.f32.gmra.mrb[12].mxu0 %vm225_vm1, %v14444_v35  ;;  %v14452_v35 = vld [vmem:[#allocation29_spill] sm:$0xff] }
 0x187   : > { %10445 = vmatprep.mubr.msk.f32.mxu0 %vm225_vm1, %v14445_v28  ;;  %v14453_v28 = vld [vmem:[#allocation30_spill] sm:$0xff] }
 0x18a   : > { %10446 = vmatmul.mubr.msk.f32.gmra.mrb[14].mxu0 %vm225_vm1, %v14446_v29 }
 0x18b   : > { %10448 = vmatprep.mubr.msk.f32.mxu0 %vm225_vm1, %v14447_v8  ;;  %v14454_v8 = vld [vmem:[#allocation31_spill] sm:$0xff] }
 0x18e   : > { %10449 = vmatmul.mubr.msk.f32.gmra.mrb[16].mxu0 %vm225_vm1, %v14448_v33 }
 0x18f   : > { %10451 = vmatprep.mubr.msk.f32.mxu0 %vm225_vm1, %v14449_v62  ;;  %v14455_v62 = vld [vmem:[#allocation32_spill] sm:$0xff] }
 0x192   : > { %10452 = vmatmul.mubr.msk.f32.gmra.mrb[18].mxu0 %vm225_vm1, %v14450_v30 }
 0x193   : > { %10454 = vmatprep.mubr.msk.f32.mxu0 %vm225_vm1, %v14451_v34 }
 0x196   : > { %10455 = vmatmul.mubr.msk.f32.gmra.mrb[20].mxu0 %vm225_vm1, %v14452_v35  ;;  %v12651_v35 = vld [vmem:[#allocation2 + $0x182] sm:$0xff] }
 0x197   : > { %10457 = vmatprep.mubr.msk.f32.mxu0 %vm225_vm1, %v14453_v28 }
 0x19a   : > { %10458 = vmatmul.mubr.msk.f32.gmra.mrb[22].mxu0 %vm225_vm1, %v12413_v1 }
 0x19b   : > { %10460 = vmatprep.mubr.msk.f32.mxu0 %vm225_vm1, %v14454_v8  ;;  %v12657_v8 = vld [vmem:[#allocation2 + $0x18a] sm:$0xff] }
 0x19e   : > { %10461 = vmatmul.mubr.msk.f32.gmra.mrb[24].mxu0 %vm225_vm1, %v12421_v0 }
 0x19f   : > { %10463 = vmatprep.mubr.msk.f32.mxu0 %vm225_vm1, %v14455_v62 }
 0x1a2   : > { %10464 = vmatmul.mubr.msk.f32.gmra.mrb[26].mxu0 %vm225_vm1, %v12429_v40 }
 0x1a3   : > { %10466 = vmatprep.mubr.msk.f32.mxu0 %vm225_vm1, %v12431_v41  ;;  %v9011_v41 = vld [vmem:[%s14265_s1 + $0x20] sm:$0xf] }
 0x1a6   : > { %10467 = vmatmul.mubr.msk.f32.gmra.mrb[28].mxu0 %vm225_vm1, %v12437_v7 }
 0x1a7   : > { %10469 = vmatprep.mubr.msk.f32.mxu0 %vm225_vm1, %v12651_v35 }
 0x1aa   : > { %10470 = vmatmul.mubr.msk.f32.gmra.mrb[30].mxu0 %vm225_vm1, %v12657_v8 }
 0x1ab   : > { %10474 = vmatprep.mubr.msk.f32.mxu0 %vm225_vm1, %v12190_v9  ;;  %v2653_v9 = vld [vmem:[#allocation2 + $0x198] sm:$0xff] }
 0x1ae   : > { %10475 = vmatmul.mubr.msk.f32.vlgmr.msra.gmra.mrb[0].mxu0 %vm225_vm1, %v12198_v10  ;;  %v2654_v10 = vld [vmem:[#allocation2 + $0x1a0] sm:$0xff] }
 0x1af   : > { %10523 = vmatpush3.msk.msra.mxu0 %vm509_vm0, %v8977_v63  ;;  %10477 = vmatprep.mubr.msk.f32.mxu0 %vm225_vm1, %v12200_v11  ;;  %v3013_v11 = vld [vmem:[#allocation2 + $0x31] sm:$0xff] }
 0x1b0   : > { %10572 = vmatprep.subr.msk.mxu0 %vm509_vm0, %v9011_v41 }
 0x1b2   : > { %10478 = vmatmul.mubr.msk.f32.gmra.mrb[2].mxu0 %vm225_vm1, %v12206_v6  ;;  %v3014_v6 = vld [vmem:[#allocation2 + $0x39] sm:$0xff] }
 0x1b3   : > { %10480 = vmatprep.mubr.msk.f32.mxu0 %vm225_vm1, %v12208_v12  ;;  %v3015_v12 = vld [vmem:[#allocation2 + $0x49] sm:$0xff] }
 0x1b6   : > { %10481 = vmatmul.mubr.msk.f32.gmra.mrb[4].mxu0 %vm225_vm1, %v12214_v13  ;;  %v3016_v13 = vld [vmem:[#allocation2 + $0x51] sm:$0xff] }
 0x1b7   : > { %10483 = vmatprep.mubr.msk.f32.mxu0 %vm225_vm1, %v12216_v14  ;;  %v14474_v14 = vld [vmem:[#allocation22_spill] sm:$0xff] }
 0x1ba   : > { %10484 = vmatmul.mubr.msk.f32.gmra.mrb[6].mxu0 %vm225_vm1, %v12222_v15  ;;  %v14475_v15 = vld [vmem:[#allocation24_spill] sm:$0xff] }
 0x1bb   : > { %10486 = vmatprep.mubr.msk.f32.mxu0 %vm225_vm1, %v12224_v16  ;;  %v14476_v16 = vld [vmem:[#allocation26_spill] sm:$0xff] }
 0x1be   : > { %10487 = vmatmul.mubr.msk.f32.gmra.mrb[8].mxu0 %vm225_vm1, %v12230_v17  ;;  %v14477_v17 = vld [vmem:[#allocation29_spill] sm:$0xff] }
 0x1bf   : > { %10489 = vmatprep.mubr.msk.f32.mxu0 %vm225_vm1, %v12232_v18  ;;  %v14478_v18 = vld [vmem:[#allocation31_spill] sm:$0xff] }
 0x1c2   : > { %10490 = vmatmul.mubr.msk.f32.gmra.mrb[10].mxu0 %vm225_vm1, %v12238_v19  ;;  %v14479_v19 = vld [vmem:[#allocation33_spill] sm:$0xff] }
 0x1c3   : > { %10492 = vmatprep.mubr.msk.f32.mxu0 %vm225_vm1, %v12240_v20  ;;  %v9047_v20 = vld [vmem:[%s14267_s3 + $0x20] sm:$0xff] }
 0x1c6   : > { %10493 = vmatmul.mubr.msk.f32.gmra.mrb[12].mxu0 %vm225_vm1, %v12246_v21  ;;  %v9046_v21 = vld [vmem:[%s14267_s3 + $0x18] sm:$0xff] }
 0x1c7   : > { %10495 = vmatprep.mubr.msk.f32.mxu0 %vm225_vm1, %v12248_v22  ;;  %11222 = vmatprep.subr.mxu1 %v9046_v21  ;;  %v12966_v22 = vld [vmem:[%s14267_s3 + $0x28] sm:$0xff] }
 0x1c8   : > { %11223 = vmatpush3.msra.mxu1 %v9046_v21 }
 0x1c9   : > { %10722 = vmatprep.subr.mxu1 %v12966_v22 }
 0x1ca   : > { %10496 = vmatmul.mubr.msk.f32.gmra.mrb[14].mxu0 %vm225_vm1, %v12254_v23  ;;  %v12972_v23 = vld [vmem:[%s14266_s2] ss:$0 sm:$0xff] }
 0x1cb   : > { %10498 = vmatprep.mubr.msk.f32.mxu0 %vm225_vm1, %v12256_v24 }
 0x1ce   : > { %10499 = vmatmul.mubr.msk.f32.gmra.mrb[16].mxu0 %vm225_vm1, %v12262_v25 }
 0x1cf   : > { %10501 = vmatprep.mubr.msk.f32.mxu0 %vm225_vm1, %v12264_v26 }
 0x1d2   : > { %10502 = vmatmul.mubr.msk.f32.gmra.mrb[18].mxu0 %vm225_vm1, %v12270_v27 }
 0x1d3   : > { %10504 = vmatprep.mubr.msk.f32.mxu0 %vm225_vm1, %v12272_v31 }
 0x1d6   : > { %10505 = vmatmul.mubr.msk.f32.gmra.mrb[20].mxu0 %vm225_vm1, %v12278_v32 }
 0x1d7   : > { %10507 = vmatprep.mubr.msk.f32.mxu0 %vm225_vm1, %v12280_v37 }
 0x1da   : > { %10508 = vmatmul.mubr.msk.f32.gmra.mrb[22].mxu0 %vm225_vm1, %v12286_v38 }
 0x1db   : > { %10510 = vmatprep.mubr.msk.f32.mxu0 %vm225_vm1, %v12288_v39 }
 0x1de   : > { %10511 = vmatmul.mubr.msk.f32.gmra.mrb[24].mxu0 %vm225_vm1, %v12298_v42 }
 0x1df   : > { %10513 = vmatprep.mubr.msk.f32.mxu0 %vm225_vm1, %v12300_v3 }
 0x1e2   : > { %10514 = vmatmul.mubr.msk.f32.gmra.mrb[26].mxu0 %vm225_vm1, %v12306_v4 }
 0x1e3   : > { %10516 = vmatprep.mubr.msk.f32.mxu0 %vm225_vm1, %v12505_v2 }
 0x1e6   : > { %10517 = vmatmul.mubr.msk.f32.gmra.mrb[28].mxu0 %vm225_vm1, %v12511_v5 }
 0x1e7   : > { %10519 = vmatprep.mubr.msk.f32.mxu0 %vm225_vm1, %v2653_v9 }
 0x1ea   : > { %10520 = vmatmul.mubr.msk.f32.gmra.mrb[30].mxu0 %vm225_vm1, %v2654_v10 }
 0x1eb   : > { %10524 = vmatprep.mubr.msk.f32.mxu0 %vm225_vm1, %v3013_v11 }
 0x1ee   : > { %10525 = vmatmul.mubr.msk.f32.vlgmr.msra.gmra.mrb[0].mxu0 %vm225_vm1, %v3014_v6 }
 0x1ef   : > { %10573 = vmatpush3.msk.msra.mxu0 %vm509_vm0, %v9011_v41  ;;  %10527 = vmatprep.mubr.msk.f32.mxu0 %vm225_vm1, %v3015_v12 }
 0x1f0   : > { %10622 = vmatprep.subr.mxu0 %v9047_v20 }
 0x1f2   : > { %10528 = vmatmul.mubr.msk.f32.gmra.mrb[2].mxu0 %vm225_vm1, %v3016_v13 }
 0x1f3   : > { %10530 = vmatprep.mubr.msk.f32.mxu0 %vm225_vm1, %v12065_v36  ;;  %v14456_v36 = vld [vmem:[#allocation4_spill] sm:$0xff] }
 0x1f6   : > { %10531 = vmatmul.mubr.msk.f32.gmra.mrb[4].mxu0 %vm225_vm1, %v12081_v43  ;;  %v14457_v43 = vld [vmem:[#allocation5_spill] sm:$0xff] }
 0x1f7   : > { %10533 = vmatprep.mubr.msk.f32.mxu0 %vm225_vm1, %v12085_v44  ;;  %v14458_v44 = vld [vmem:[#allocation6_spill] sm:$0xff] }
 0x1fa   : > { %10534 = vmatmul.mubr.msk.f32.gmra.mrb[6].mxu0 %vm225_vm1, %v12091_v45  ;;  %v14459_v45 = vld [vmem:[#allocation7_spill] sm:$0xff] }
 0x1fb   : > { %10536 = vmatprep.mubr.msk.f32.mxu0 %vm225_vm1, %v12093_v46  ;;  %v14460_v46 = vld [vmem:[#allocation34_spill] sm:$0xff] }
 0x1fe   : > { %10537 = vmatmul.mubr.msk.f32.gmra.mrb[8].mxu0 %vm225_vm1, %v12099_v47  ;;  %v3043_v47 = vld [vmem:[#allocation2 + $0x199] sm:$0xff] }
 0x1ff   : > { %10539 = vmatprep.mubr.msk.f32.mxu0 %vm225_vm1, %v12101_v48  ;;  %v14461_v48 = vld [vmem:[#allocation35_spill] sm:$0xff] }
 0x202   : > { %10540 = vmatmul.mubr.msk.f32.gmra.mrb[10].mxu0 %vm225_vm1, %v12107_v49  ;;  %v3044_v49 = vld [vmem:[#allocation2 + $0x1a1] sm:$0xff] }
 0x203   : > { %10542 = vmatprep.mubr.msk.f32.mxu0 %vm225_vm1, %v12109_v50  ;;  %v14462_v50 = vld [vmem:[#allocation10_spill] sm:$0xff] }
 0x206   : > { %10543 = vmatmul.mubr.msk.f32.gmra.mrb[12].mxu0 %vm225_vm1, %v12115_v51  ;;  %v14463_v51 = vld [vmem:[#allocation11_spill] sm:$0xff] }
 0x207   : > { %10545 = vmatprep.mubr.msk.f32.mxu0 %vm225_vm1, %v12117_v52  ;;  %v14464_v52 = vld [vmem:[#allocation12_spill] sm:$0xff] }
 0x20a   : > { %10546 = vmatmul.mubr.msk.f32.gmra.mrb[14].mxu0 %vm225_vm1, %v12123_v53  ;;  %v14465_v53 = vld [vmem:[#allocation13_spill] sm:$0xff] }
 0x20b   : > { %10548 = vmatprep.mubr.msk.f32.mxu0 %vm225_vm1, %v12125_v54  ;;  %v14466_v54 = vld [vmem:[#allocation14_spill] sm:$0xff] }
 0x20e   : > { %10549 = vmatmul.mubr.msk.f32.gmra.mrb[16].mxu0 %vm225_vm1, %v12131_v55  ;;  %v14467_v55 = vld [vmem:[#allocation15_spill] sm:$0xff] }
 0x20f   : > { %10551 = vmatprep.mubr.msk.f32.mxu0 %vm225_vm1, %v12133_v56  ;;  %v14468_v56 = vld [vmem:[#allocation16_spill] sm:$0xff] }
 0x212   : > { %10552 = vmatmul.mubr.msk.f32.gmra.mrb[18].mxu0 %vm225_vm1, %v12139_v57  ;;  %v14469_v57 = vld [vmem:[#allocation17_spill] sm:$0xff] }
 0x213   : > { %10554 = vmatprep.mubr.msk.f32.mxu0 %vm225_vm1, %v12141_v58  ;;  %v14470_v58 = vld [vmem:[#allocation18_spill] sm:$0xff] }
 0x216   : > { %10555 = vmatmul.mubr.msk.f32.gmra.mrb[20].mxu0 %vm225_vm1, %v12147_v59  ;;  %v14471_v59 = vld [vmem:[#allocation19_spill] sm:$0xff] }
 0x217   : > { %10557 = vmatprep.mubr.msk.f32.mxu0 %vm225_vm1, %v12149_v60  ;;  %v14472_v60 = vld [vmem:[#allocation20_spill] sm:$0xff] }
 0x21a   : > { %10558 = vmatmul.mubr.msk.f32.gmra.mrb[22].mxu0 %vm225_vm1, %v12155_v61  ;;  %v14473_v61 = vld [vmem:[#allocation21_spill] sm:$0xff] }
 0x21b   : > { %10560 = vmatprep.mubr.msk.f32.mxu0 %vm225_vm1, %v14456_v36 }
 0x21e   : > { %10561 = vmatmul.mubr.msk.f32.gmra.mrb[24].mxu0 %vm225_vm1, %v14457_v43 }
 0x21f   : > { %10563 = vmatprep.mubr.msk.f32.mxu0 %vm225_vm1, %v14458_v44 }
 0x222   : > { %10564 = vmatmul.mubr.msk.f32.gmra.mrb[26].mxu0 %vm225_vm1, %v14459_v45 }
 0x223   : > { %10566 = vmatprep.mubr.msk.f32.mxu0 %vm225_vm1, %v14460_v46 }
 0x226   : > { %10567 = vmatmul.mubr.msk.f32.gmra.mrb[28].mxu0 %vm225_vm1, %v14461_v48 }
 0x227   : > { %10569 = vmatprep.mubr.msk.f32.mxu0 %vm225_vm1, %v3043_v47 }
 0x22a   : > { %10570 = vmatmul.mubr.msk.f32.gmra.mrb[30].mxu0 %vm225_vm1, %v3044_v49 }
 0x22b   : > { %10574 = vmatprep.mubr.msk.f32.mxu0 %vm225_vm1, %v14462_v50 }
 0x22e   : > { %10575 = vmatmul.mubr.msk.f32.vlgmr.msra.gmra.mrb[0].mxu0 %vm225_vm1, %v14463_v51 }
 0x22f   : > { %10577 = vmatprep.mubr.msk.f32.mxu0 %vm225_vm1, %v14464_v52  ;;  %10623 = vmatpush3.msra.mxu0 %v9047_v20 }
 0x230   : > { %10672 = vmatprep.subr.mxu0 %v9046_v21 }
 0x232   : > { %10578 = vmatmul.mubr.msk.f32.gmra.mrb[2].mxu0 %vm225_vm1, %v14465_v53 }
 0x233   : > { %10580 = vmatprep.mubr.msk.f32.mxu0 %vm225_vm1, %v14466_v54 }
 0x236   : > { %10581 = vmatmul.mubr.msk.f32.gmra.mrb[4].mxu0 %vm225_vm1, %v14467_v55 }
 0x237   : > { %10583 = vmatprep.mubr.msk.f32.mxu0 %vm225_vm1, %v14468_v56 }
 0x23a   : > { %10584 = vmatmul.mubr.msk.f32.gmra.mrb[6].mxu0 %vm225_vm1, %v14469_v57 }
 0x23b   : > { %10586 = vmatprep.mubr.msk.f32.mxu0 %vm225_vm1, %v14470_v58 }
 0x23e   : > { %10587 = vmatmul.mubr.msk.f32.gmra.mrb[8].mxu0 %vm225_vm1, %v14471_v59 }
 0x23f   : > { %10589 = vmatprep.mubr.msk.f32.mxu0 %vm225_vm1, %v14472_v60 }
 0x242   : > { %10590 = vmatmul.mubr.msk.f32.gmra.mrb[10].mxu0 %vm225_vm1, %v14473_v61 }
 0x243   : > { %10592 = vmatprep.mubr.msk.f32.mxu0 %vm225_vm1, %v14474_v14 }
 0x246   : > { %10593 = vmatmul.mubr.msk.f32.gmra.mrb[12].mxu0 %vm225_vm1, %v14446_v29 }
 0x247   : > { %10595 = vmatprep.mubr.msk.f32.mxu0 %vm225_vm1, %v14475_v15 }
 0x24a   : > { %10596 = vmatmul.mubr.msk.f32.gmra.mrb[14].mxu0 %vm225_vm1, %v14448_v33 }
 0x24b   : > { %10598 = vmatprep.mubr.msk.f32.mxu0 %vm225_vm1, %v14476_v16 }
 0x24e   : > { %10599 = vmatmul.mubr.msk.f32.gmra.mrb[16].mxu0 %vm225_vm1, %v14450_v30 }
 0x24f   : > { %10601 = vmatprep.mubr.msk.f32.mxu0 %vm225_vm1, %v14451_v34 }
 0x252   : > { %10602 = vmatmul.mubr.msk.f32.gmra.mrb[18].mxu0 %vm225_vm1, %v14477_v17 }
 0x253   : > { %10604 = vmatprep.mubr.msk.f32.mxu0 %vm225_vm1, %v14453_v28 }
 0x256   : > { %10605 = vmatmul.mubr.msk.f32.gmra.mrb[20].mxu0 %vm225_vm1, %v12413_v1  ;;  %v3433_v1 = vld [vmem:[#allocation2 + $0x19a] sm:$0xff] }
 0x257   : > { %10607 = vmatprep.mubr.msk.f32.mxu0 %vm225_vm1, %v14478_v18 }
 0x25a   : > { %10608 = vmatmul.mubr.msk.f32.gmra.mrb[22].mxu0 %vm225_vm1, %v12421_v0  ;;  %v3434_v0 = vld [vmem:[#allocation2 + $0x1a2] sm:$0xff] }
 0x25b   : > { %10610 = vmatprep.mubr.msk.f32.mxu0 %vm225_vm1, %v14455_v62  ;;  %v14480_v62 = vmov 0.0  }
 0x25c   : > { %3870 = vst.msk [vmem:[#allocation3 + $0x20] sm:$0xff] %vm3864_vm3, %v14480_v62  ;;  %3865 = vst.msk [vmem:[#allocation3] sm:$0xff] %vm3864_vm3, %v14480_v62 }
 0x25d   : > { %3871 = vst.msk [vmem:[#allocation3 + $0x28] sm:$0x3] %vm3867_vm4, %v14480_v62  ;;  %3868 = vst.msk [vmem:[#allocation3 + $0x10] sm:$0x3] %vm3867_vm4, %v14480_v62 }
 0x25e   : > { %10611 = vmatmul.mubr.msk.f32.gmra.mrb[24].mxu0 %vm225_vm1, %v12429_v40  ;;  %3866 = vst.msk [vmem:[#allocation3 + $0x8] sm:$0xff] %vm3864_vm3, %v14480_v62  ;;  %3869 = vst.msk [vmem:[#allocation3 + $0x18] sm:$0xff] %vm3864_vm3, %v14480_v62 }
 0x25f   : > { %10613 = vmatprep.mubr.msk.f32.mxu0 %vm225_vm1, %v14479_v19  ;;  %3872 = vst.msk [vmem:[#allocation3 + $0x30] sm:$0xff] %vm3864_vm3, %v14480_v62  ;;  %3873 = vst.msk [vmem:[#allocation3 + $0x38] sm:$0xff] %vm3864_vm3, %v14480_v62 }
 0x260   : > { %3874 = vst.msk [vmem:[#allocation3 + $0x40] sm:$0x3] %vm3867_vm4, %v14480_v62  ;;  %3877 = vst.msk [vmem:[#allocation3 + $0x58] sm:$0x3] %vm3867_vm4, %v14480_v62 }
 0x261   : > { %3875 = vst.msk [vmem:[#allocation3 + $0x48] sm:$0xff] %vm3864_vm3, %v14480_v62  ;;  %3876 = vst.msk [vmem:[#allocation3 + $0x50] sm:$0xff] %vm3864_vm3, %v14480_v62 }
 0x262   : > { %10614 = vmatmul.mubr.msk.f32.gmra.mrb[26].mxu0 %vm225_vm1, %v12437_v7  ;;  %3878 = vst.msk [vmem:[#allocation3 + $0x60] sm:$0xff] %vm3864_vm3, %v14480_v62  ;;  %3879 = vst.msk [vmem:[#allocation3 + $0x68] sm:$0xff] %vm3864_vm3, %v14480_v62 }
 0x263   : > { %10616 = vmatprep.mubr.msk.f32.mxu0 %vm225_vm1, %v12651_v35  ;;  %3880 = vst.msk [vmem:[#allocation3 + $0x70] sm:$0x3] %vm3867_vm4, %v14480_v62  ;;  %3883 = vst.msk [vmem:[#allocation3 + $0x88] sm:$0x3] %vm3867_vm4, %v14480_v62 }
 0x264   : > { %3881 = vst.msk [vmem:[#allocation3 + $0x78] sm:$0xff] %vm3864_vm3, %v14480_v62  ;;  %3882 = vst.msk [vmem:[#allocation3 + $0x80] sm:$0xff] %vm3864_vm3, %v14480_v62 }
 0x265   : > { %3884 = vst.msk [vmem:[#allocation3 + $0x90] sm:$0xff] %vm3864_vm3, %v14480_v62  ;;  %3885 = vst.msk [vmem:[#allocation3 + $0x98] sm:$0xff] %vm3864_vm3, %v14480_v62 }
 0x266   : > { %10617 = vmatmul.mubr.msk.f32.gmra.mrb[28].mxu0 %vm225_vm1, %v12657_v8  ;;  %3886 = vst.msk [vmem:[#allocation3 + $0xa0] sm:$0x3] %vm3867_vm4, %v14480_v62  ;;  %3889 = vst.msk [vmem:[#allocation3 + $0xb8] sm:$0x3] %vm3867_vm4, %v14480_v62 }
 0x267   : > { %10619 = vmatprep.mubr.msk.f32.mxu0 %vm225_vm1, %v3433_v1  ;;  %3887 = vst.msk [vmem:[#allocation3 + $0xa8] sm:$0xff] %vm3864_vm3, %v14480_v62  ;;  %3888 = vst.msk [vmem:[#allocation3 + $0xb0] sm:$0xff] %vm3864_vm3, %v14480_v62 }
 0x268   : > { %3890 = vst.msk [vmem:[#allocation3 + $0xc0] sm:$0xff] %vm3864_vm3, %v14480_v62  ;;  %3891 = vst.msk [vmem:[#allocation3 + $0xc8] sm:$0xff] %vm3864_vm3, %v14480_v62 }
 0x269   : > { %3892 = vst.msk [vmem:[#allocation3 + $0xd0] sm:$0x3] %vm3867_vm4, %v14480_v62  ;;  %3895 = vst.msk [vmem:[#allocation3 + $0xe8] sm:$0x3] %vm3867_vm4, %v14480_v62 }
 0x26a   : > { %10620 = vmatmul.mubr.msk.f32.gmra.mrb[30].mxu0 %vm225_vm1, %v3434_v0  ;;  %3893 = vst.msk [vmem:[#allocation3 + $0xd8] sm:$0xff] %vm3864_vm3, %v14480_v62  ;;  %3894 = vst.msk [vmem:[#allocation3 + $0xe0] sm:$0xff] %vm3864_vm3, %v14480_v62 }
 0x26b   : > { %3896 = vst.msk [vmem:[#allocation3 + $0xf0] sm:$0xff] %vm3864_vm3, %v14480_v62  ;;  %3897 = vst.msk [vmem:[#allocation3 + $0xf8] sm:$0xff] %vm3864_vm3, %v14480_v62 }
 0x26c   : > { %3898 = vst.msk [vmem:[#allocation3 + $0x100] sm:$0x3] %vm3867_vm4, %v14480_v62  ;;  %3901 = vst.msk [vmem:[#allocation3 + $0x118] sm:$0x3] %vm3867_vm4, %v14480_v62 }
 0x26d   : > { %3899 = vst.msk [vmem:[#allocation3 + $0x108] sm:$0xff] %vm3864_vm3, %v14480_v62  ;;  %3900 = vst.msk [vmem:[#allocation3 + $0x110] sm:$0xff] %vm3864_vm3, %v14480_v62 }
 0x26e   : > { %3902 = vst.msk [vmem:[#allocation3 + $0x120] sm:$0xff] %vm3864_vm3, %v14480_v62  ;;  %3903 = vst.msk [vmem:[#allocation3 + $0x128] sm:$0xff] %vm3864_vm3, %v14480_v62 }
 0x26f   : > { %3904 = vst.msk [vmem:[#allocation3 + $0x130] sm:$0x3] %vm3867_vm4, %v14480_v62  ;;  %3907 = vst.msk [vmem:[#allocation3 + $0x148] sm:$0x3] %vm3867_vm4, %v14480_v62 }
 0x270   : > { %3905 = vst.msk [vmem:[#allocation3 + $0x138] sm:$0xff] %vm3864_vm3, %v14480_v62  ;;  %3906 = vst.msk [vmem:[#allocation3 + $0x140] sm:$0xff] %vm3864_vm3, %v14480_v62 }
 0x271   : > { %3908 = vst.msk [vmem:[#allocation3 + $0x150] sm:$0xff] %vm3864_vm3, %v14480_v62  ;;  %3909 = vst.msk [vmem:[#allocation3 + $0x158] sm:$0xff] %vm3864_vm3, %v14480_v62 }
 0x272   : > { %3910 = vst.msk [vmem:[#allocation3 + $0x160] sm:$0x3] %vm3867_vm4, %v14480_v62  ;;  %3913 = vst.msk [vmem:[#allocation3 + $0x178] sm:$0x3] %vm3867_vm4, %v14480_v62 }
 0x273   : > { %3911 = vst.msk [vmem:[#allocation3 + $0x168] sm:$0xff] %vm3864_vm3, %v14480_v62  ;;  %3912 = vst.msk [vmem:[#allocation3 + $0x170] sm:$0xff] %vm3864_vm3, %v14480_v62 }
 0x274   : > { %3914 = vst.msk [vmem:[#allocation3 + $0x180] sm:$0xff] %vm3864_vm3, %v14480_v62  ;;  %3915 = vst.msk [vmem:[#allocation3 + $0x188] sm:$0xff] %vm3864_vm3, %v14480_v62 }
 0x275   : > { %3916 = vst.msk [vmem:[#allocation3 + $0x190] sm:$0x3] %vm3867_vm4, %v14480_v62  ;;  %3919 = vst.msk [vmem:[#allocation3 + $0x1a8] sm:$0x3] %vm3867_vm4, %v14480_v62 }
 0x276   : > { %3917 = vst.msk [vmem:[#allocation3 + $0x198] sm:$0xff] %vm3864_vm3, %v14480_v62  ;;  %3918 = vst.msk [vmem:[#allocation3 + $0x1a0] sm:$0xff] %vm3864_vm3, %v14480_v62 }
 0x301   : > { %v10576_v24 = vpop.f32.mrb[0].mxu0 }
 0x302   : > { %v3801_v25 = vadd.f32 %v10576_v24, %v12972_v23  ;;  %v3602_v26 = vpop.f32.mrb[1].mxu0 }
 0x303   : > { %v3800_v27 = vadd.f32 %v12972_v23, %v3602_v26 }
 0x304   : > { %v3833_v31 = vmax.f32 %v3801_v25, 0.0 }
 0x305   : > { %v3832_v32 = vmax.f32 %v3800_v27, 0.0  ;;  %v10579_v37 = vpop.f32.mrb[2].mxu0 }
 0x306   : > { %3922 = vst.msk [vmem:[#allocation3 + $0x21] sm:$0xff] %vm3864_vm3, %v3833_v31  ;;  %v3803_v38 = vadd.f32 %v10579_v37, %v12972_v23  ;;  %v3612_v39 = vpop.f32.mrb[3].mxu0 }
 0x307   : > { %3921 = vst.msk [vmem:[#allocation3 + $0x19] sm:$0xff] %vm3864_vm3, %v3832_v32  ;;  %v3802_v42 = vadd.f32 %v12972_v23, %v3612_v39 }
 0x308   : > { %v3835_v3 = vmax.f32 %v3803_v38, 0.0 }
 0x309   : > { %v3834_v4 = vmax.f32 %v3802_v42, 0.0  ;;  %v10582_v40 = vpop.f32.mrb[4].mxu0 }
 0x30a   : > { %3924 = vst.msk [vmem:[#allocation3 + $0x39] sm:$0xff] %vm3864_vm3, %v3835_v3  ;;  %v3805_v41 = vadd.f32 %v10582_v40, %v12972_v23  ;;  %v3622_v7 = vpop.f32.mrb[5].mxu0 }
 0x30b   : > { %3923 = vst.msk [vmem:[#allocation3 + $0x31] sm:$0xff] %vm3864_vm3, %v3834_v4  ;;  %v3804_v2 = vadd.f32 %v12972_v23, %v3622_v7 }
 0x30c   : > { %v3837_v5 = vmax.f32 %v3805_v41, 0.0 }
 0x30d   : > { %v3836_v28 = vmax.f32 %v3804_v2, 0.0  ;;  %v10585_v30 = vpop.f32.mrb[6].mxu0  ;;  %v12992_v29 = vld [vmem:[#allocation3 + $0x21] sm:$0xff] }
 0x30e   : > { %3926 = vst.msk [vmem:[#allocation3 + $0x51] sm:$0xff] %vm3864_vm3, %v3837_v5  ;;  %v3807_v33 = vadd.f32 %v10585_v30, %v12972_v23  ;;  %v3632_v34 = vpop.f32.mrb[7].mxu0  ;;  %v12986_v63 = vld [vmem:[#allocation3 + $0x19] sm:$0xff] }
 0x30f   : > { %3925 = vst.msk [vmem:[#allocation3 + $0x49] sm:$0xff] %vm3864_vm3, %v3836_v28  ;;  %v3806_v35 = vadd.f32 %v12972_v23, %v3632_v34  ;;  %10624 = vmatprep.mubr.msk.f32.mxu0 %vm3864_vm3, %v12986_v63 }
 0x310   : > { %v3839_v8 = vmax.f32 %v3807_v33, 0.0  ;;  %10625 = vmatmul.mubr.msk.f32.vlgmr.msra.gmra.mrb[32].mxu0 %vm3864_vm3, %v12992_v29 }
 0x311   : > { %v3838_v9 = vmax.f32 %v3806_v35, 0.0  ;;  %v10588_v10 = vpop.f32.mrb[8].mxu0  ;;  %10673 = vmatpush3.msra.mxu0 %v9046_v21  ;;  %v13004_v36 = vld [vmem:[#allocation3 + $0x39] sm:$0xff] }
 0x312   : > { %3928 = vst.msk [vmem:[#allocation3 + $0x69] sm:$0xff] %vm3864_vm3, %v3839_v8  ;;  %v3809_v11 = vadd.f32 %v10588_v10, %v12972_v23  ;;  %v3642_v6 = vpop.f32.mrb[9].mxu0  ;;  %v12998_v12 = vld [vmem:[#allocation3 + $0x31] sm:$0xff] }
 0x313   : > { %3927 = vst.msk [vmem:[#allocation3 + $0x61] sm:$0xff] %vm3864_vm3, %v3838_v9  ;;  %v3808_v13 = vadd.f32 %v12972_v23, %v3642_v6  ;;  %10627 = vmatprep.mubr.msk.f32.mxu0 %vm3864_vm3, %v12998_v12 }
 0x314   : > { %v3841_v43 = vmax.f32 %v3809_v11, 0.0  ;;  %10628 = vmatmul.mubr.msk.f32.gmra.mrb[34].mxu0 %vm3864_vm3, %v13004_v36 }
 0x315   : > { %v3840_v44 = vmax.f32 %v3808_v13, 0.0  ;;  %v10591_v45 = vpop.f32.mrb[10].mxu0  ;;  %v13016_v50 = vld [vmem:[#allocation3 + $0x51] sm:$0xff] }
 0x316   : > { %3930 = vst.msk [vmem:[#allocation3 + $0x81] sm:$0xff] %vm3864_vm3, %v3841_v43  ;;  %v3811_v46 = vadd.f32 %v10591_v45, %v12972_v23  ;;  %v3652_v47 = vpop.f32.mrb[11].mxu0  ;;  %v13010_v48 = vld [vmem:[#allocation3 + $0x49] sm:$0xff]  ;;  %v13099_v43 = vld [vmem:[%s14267_s3 + $0x48] sm:$0xff] }
 0x317   : > { %3929 = vst.msk [vmem:[#allocation3 + $0x79] sm:$0xff] %vm3864_vm3, %v3840_v44  ;;  %v3810_v49 = vadd.f32 %v12972_v23, %v3652_v47  ;;  %10630 = vmatprep.mubr.msk.f32.mxu0 %vm3864_vm3, %v13010_v48 }
 0x318   : > { %v3843_v51 = vmax.f32 %v3811_v46, 0.0  ;;  %10631 = vmatmul.mubr.msk.f32.gmra.mrb[36].mxu0 %vm3864_vm3, %v13016_v50 }
 0x319   : > { %v3842_v52 = vmax.f32 %v3810_v49, 0.0  ;;  %v10594_v53 = vpop.f32.mrb[12].mxu0  ;;  %v13028_v58 = vld [vmem:[#allocation3 + $0x69] sm:$0xff] }
 0x31a   : > { %3932 = vst.msk [vmem:[#allocation3 + $0x99] sm:$0xff] %vm3864_vm3, %v3843_v51  ;;  %v3813_v54 = vadd.f32 %v10594_v53, %v12972_v23  ;;  %v3662_v55 = vpop.f32.mrb[13].mxu0  ;;  %v13022_v56 = vld [vmem:[#allocation3 + $0x61] sm:$0xff] }
 0x31b   : > { %3931 = vst.msk [vmem:[#allocation3 + $0x91] sm:$0xff] %vm3864_vm3, %v3842_v52  ;;  %v3812_v57 = vadd.f32 %v12972_v23, %v3662_v55  ;;  %10633 = vmatprep.mubr.msk.f32.mxu0 %vm3864_vm3, %v13022_v56 }
 0x31c   : > { %v3845_v59 = vmax.f32 %v3813_v54, 0.0  ;;  %10634 = vmatmul.mubr.msk.f32.gmra.mrb[38].mxu0 %vm3864_vm3, %v13028_v58 }
 0x31d   : > { %v3844_v60 = vmax.f32 %v3812_v57, 0.0  ;;  %v10597_v61 = vpop.f32.mrb[14].mxu0  ;;  %v13040_v18 = vld [vmem:[#allocation3 + $0x81] sm:$0xff] }
 0x31e   : > { %3934 = vst.msk [vmem:[#allocation3 + $0xb1] sm:$0xff] %vm3864_vm3, %v3845_v59  ;;  %v3815_v14 = vadd.f32 %v10597_v61, %v12972_v23  ;;  %v3672_v15 = vpop.f32.mrb[15].mxu0  ;;  %v13034_v16 = vld [vmem:[#allocation3 + $0x79] sm:$0xff] }
 0x31f   : > { %3933 = vst.msk [vmem:[#allocation3 + $0xa9] sm:$0xff] %vm3864_vm3, %v3844_v60  ;;  %v3814_v17 = vadd.f32 %v12972_v23, %v3672_v15  ;;  %10636 = vmatprep.mubr.msk.f32.mxu0 %vm3864_vm3, %v13034_v16 }
 0x320   : > { %v3847_v19 = vmax.f32 %v3815_v14, 0.0  ;;  %10637 = vmatmul.mubr.msk.f32.gmra.mrb[40].mxu0 %vm3864_vm3, %v13040_v18 }
 0x321   : > { %v3846_v1 = vmax.f32 %v3814_v17, 0.0  ;;  %v10600_v0 = vpop.f32.mrb[16].mxu0  ;;  %v13052_v25 = vld [vmem:[#allocation3 + $0x99] sm:$0xff] }
 0x322   : > { %3936 = vst.msk [vmem:[#allocation3 + $0xc9] sm:$0xff] %vm3864_vm3, %v3847_v19  ;;  %v3817_v62 = vadd.f32 %v10600_v0, %v12972_v23  ;;  %v3682_v20 = vpop.f32.mrb[17].mxu0  ;;  %v13046_v21 = vld [vmem:[#allocation3 + $0x91] sm:$0xff] }
 0x323   : > { %3935 = vst.msk [vmem:[#allocation3 + $0xc1] sm:$0xff] %vm3864_vm3, %v3846_v1  ;;  %v3816_v24 = vadd.f32 %v12972_v23, %v3682_v20  ;;  %10639 = vmatprep.mubr.msk.f32.mxu0 %vm3864_vm3, %v13046_v21 }
 0x324   : > { %v3849_v26 = vmax.f32 %v3817_v62, 0.0  ;;  %10640 = vmatmul.mubr.msk.f32.gmra.mrb[42].mxu0 %vm3864_vm3, %v13052_v25 }
 0x325   : > { %v3848_v27 = vmax.f32 %v3816_v24, 0.0  ;;  %v10603_v31 = vpop.f32.mrb[18].mxu0  ;;  %v13064_v42 = vld [vmem:[#allocation3 + $0xb1] sm:$0xff] }
 0x326   : > { %3938 = vst.msk [vmem:[#allocation3 + $0xe1] sm:$0xff] %vm3864_vm3, %v3849_v26  ;;  %v3819_v32 = vadd.f32 %v10603_v31, %v12972_v23  ;;  %v3692_v37 = vpop.f32.mrb[19].mxu0  ;;  %v13058_v38 = vld [vmem:[#allocation3 + $0xa9] sm:$0xff] }
 0x327   : > { %3937 = vst.msk [vmem:[#allocation3 + $0xd9] sm:$0xff] %vm3864_vm3, %v3848_v27  ;;  %v3818_v39 = vadd.f32 %v12972_v23, %v3692_v37  ;;  %10642 = vmatprep.mubr.msk.f32.mxu0 %vm3864_vm3, %v13058_v38 }
 0x328   : > { %v3851_v3 = vmax.f32 %v3819_v32, 0.0  ;;  %10643 = vmatmul.mubr.msk.f32.gmra.mrb[44].mxu0 %vm3864_vm3, %v13064_v42 }
 0x329   : > { %v3850_v4 = vmax.f32 %v3818_v39, 0.0  ;;  %v10606_v40 = vpop.f32.mrb[20].mxu0  ;;  %v13076_v28 = vld [vmem:[#allocation3 + $0xc9] sm:$0xff] }
 0x32a   : > { %3940 = vst.msk [vmem:[#allocation3 + $0xf9] sm:$0xff] %vm3864_vm3, %v3851_v3  ;;  %v3821_v41 = vadd.f32 %v10606_v40, %v12972_v23  ;;  %v3702_v7 = vpop.f32.mrb[21].mxu0  ;;  %v13070_v2 = vld [vmem:[#allocation3 + $0xc1] sm:$0xff] }
 0x32b   : > { %3939 = vst.msk [vmem:[#allocation3 + $0xf1] sm:$0xff] %vm3864_vm3, %v3850_v4  ;;  %v3820_v5 = vadd.f32 %v12972_v23, %v3702_v7  ;;  %10645 = vmatprep.mubr.msk.f32.mxu0 %vm3864_vm3, %v13070_v2 }
 0x32c   : > { %v3853_v30 = vmax.f32 %v3821_v41, 0.0  ;;  %10646 = vmatmul.mubr.msk.f32.gmra.mrb[46].mxu0 %vm3864_vm3, %v13076_v28 }
 0x32d   : > { %v3852_v33 = vmax.f32 %v3820_v5, 0.0  ;;  %v10609_v34 = vpop.f32.mrb[22].mxu0  ;;  %v13094_v13 = vld [vmem:[#allocation3 + $0xe1] sm:$0xff] }
 0x32e   : > { %3942 = vst.msk [vmem:[#allocation3 + $0x111] sm:$0xff] %vm3864_vm3, %v3853_v30  ;;  %v3823_v35 = vadd.f32 %v10609_v34, %v12972_v23  ;;  %v3712_v8 = vpop.f32.mrb[23].mxu0  ;;  %v13082_v9 = vld [vmem:[#allocation3 + $0xd9] sm:$0xff] }
 0x32f   : > { %v13084_v10 = vld [vmem:[#allocation3 + $0xd8] sm:$0xff]  ;;  %v13086_v11 = vld [vmem:[#allocation3 + $0xe0] sm:$0xff]  ;;  %3941 = vst.msk [vmem:[#allocation3 + $0x109] sm:$0xff] %vm3864_vm3, %v3852_v33  ;;  %v3822_v6 = vadd.f32 %v12972_v23, %v3712_v8  ;;  %10648 = vmatprep.mubr.msk.f32.mxu0 %vm3864_vm3, %v13082_v9 }
 0x330   : > { %10698 = vmatprep.mubr.msk.f32.mxu1 %vm3864_vm3, %v13084_v10  ;;  %v3855_v44 = vmax.f32 %v3823_v35, 0.0  ;;  %10649 = vmatmul.mubr.msk.f32.gmra.mrb[48].mxu0 %vm3864_vm3, %v13094_v13 }
 0x331   : > { %10699 = vmatmul.mubr.msk.f32.vlgmr.msra.gmra.mrb[0].mxu1 %vm3864_vm3, %v13086_v11  ;;  %v3854_v45 = vmax.f32 %v3822_v6, 0.0  ;;  %v10612_v46 = vpop.f32.mrb[24].mxu0 }
 0x332   : > { %10723 = vmatpush3.msra.mxu1 %v12966_v22  ;;  %3944 = vst.msk [vmem:[#allocation3 + $0x129] sm:$0xff] %vm3864_vm3, %v3855_v44  ;;  %v3825_v47 = vadd.f32 %v10612_v46, %v12972_v23  ;;  %v3722_v49 = vpop.f32.mrb[25].mxu0  ;;  %v13108_v51 = vld [vmem:[#allocation3 + $0xf1] sm:$0xff]  ;;  %v13121_v22 = vld [vmem:[#allocation3 + $0xf9] sm:$0xff] }
 0x333   : > { %v13110_v52 = vld [vmem:[#allocation3 + $0xf0] sm:$0xff]  ;;  %v13112_v53 = vld [vmem:[#allocation3 + $0xf8] sm:$0xff]  ;;  %10772 = vmatprep.subr.mxu1 %v13099_v43  ;;  %3943 = vst.msk [vmem:[#allocation3 + $0x121] sm:$0xff] %vm3864_vm3, %v3854_v45  ;;  %v3824_v54 = vadd.f32 %v12972_v23, %v3722_v49  ;;  %10651 = vmatprep.mubr.msk.f32.mxu0 %vm3864_vm3, %v13108_v51 }
 0x334   : > { %10701 = vmatprep.mubr.msk.f32.mxu1 %vm3864_vm3, %v13110_v52  ;;  %v3857_v55 = vmax.f32 %v3825_v47, 0.0  ;;  %10652 = vmatmul.mubr.msk.f32.gmra.mrb[50].mxu0 %vm3864_vm3, %v13121_v22 }
 0x335   : > { %10702 = vmatmul.mubr.msk.f32.gmra.mrb[2].mxu1 %vm3864_vm3, %v13112_v53  ;;  %v3856_v57 = vmax.f32 %v3824_v54, 0.0  ;;  %v10615_v59 = vpop.f32.mrb[26].mxu0  ;;  %v13141_v1 = vld [vmem:[#allocation3 + $0x111] sm:$0xff] }
 0x336   : > { %3946 = vst.msk [vmem:[#allocation3 + $0x141] sm:$0xff] %vm3864_vm3, %v3857_v55  ;;  %v3827_v60 = vadd.f32 %v10615_v59, %v12972_v23  ;;  %v3732_v61 = vpop.f32.mrb[27].mxu0  ;;  %v13129_v14 = vld [vmem:[#allocation3 + $0x109] sm:$0xff] }
 0x337   : > { %v13131_v15 = vld [vmem:[#allocation3 + $0x108] sm:$0xff]  ;;  %v13133_v17 = vld [vmem:[#allocation3 + $0x110] sm:$0xff]  ;;  %3945 = vst.msk [vmem:[#allocation3 + $0x139] sm:$0xff] %vm3864_vm3, %v3856_v57  ;;  %v3826_v19 = vadd.f32 %v12972_v23, %v3732_v61  ;;  %10654 = vmatprep.mubr.msk.f32.mxu0 %vm3864_vm3, %v13129_v14 }
 0x338   : > { %10704 = vmatprep.mubr.msk.f32.mxu1 %vm3864_vm3, %v13131_v15  ;;  %v3859_v0 = vmax.f32 %v3827_v60, 0.0  ;;  %10655 = vmatmul.mubr.msk.f32.gmra.mrb[52].mxu0 %vm3864_vm3, %v13141_v1 }
 0x339   : > { %10705 = vmatmul.mubr.msk.f32.gmra.mrb[4].mxu1 %vm3864_vm3, %v13133_v17  ;;  %v3858_v62 = vmax.f32 %v3826_v19, 0.0  ;;  %v10618_v20 = vpop.f32.mrb[28].mxu0  ;;  %v13161_v39 = vld [vmem:[#allocation3 + $0x129] sm:$0xff]  ;;  %v13237_v19 = vld [vmem:[#allocation3 + $0x18] sm:$0xff] }
 0x33a   : > { %3948 = vst.msk [vmem:[#allocation3 + $0x159] sm:$0xff] %vm3864_vm3, %v3859_v0  ;;  %v3829_v24 = vadd.f32 %v10618_v20, %v12972_v23  ;;  %v3742_v26 = vpop.f32.mrb[29].mxu0  ;;  %v13149_v27 = vld [vmem:[#allocation3 + $0x121] sm:$0xff] }
 0x33b   : > { %v13151_v31 = vld [vmem:[#allocation3 + $0x120] sm:$0xff]  ;;  %v13153_v32 = vld [vmem:[#allocation3 + $0x128] sm:$0xff]  ;;  %3947 = vst.msk [vmem:[#allocation3 + $0x151] sm:$0xff] %vm3864_vm3, %v3858_v62  ;;  %v3828_v37 = vadd.f32 %v12972_v23, %v3742_v26  ;;  %10657 = vmatprep.mubr.msk.f32.mxu0 %vm3864_vm3, %v13149_v27  ;;  %v13258_v26 = vld [vmem:[#allocation3 + $0x30] sm:$0xff] }
 0x33c   : > { %10707 = vmatprep.mubr.msk.f32.mxu1 %vm3864_vm3, %v13151_v31  ;;  %v3861_v3 = vmax.f32 %v3829_v24, 0.0  ;;  %10658 = vmatmul.mubr.msk.f32.gmra.mrb[54].mxu0 %vm3864_vm3, %v13161_v39  ;;  %v13239_v0 = vld [vmem:[#allocation3 + $0x1a] sm:$0xff]  ;;  %v13247_v20 = vld [vmem:[#allocation3 + $0x22] sm:$0xff] }
 0x33d   : > { %10708 = vmatmul.mubr.msk.f32.gmra.mrb[6].mxu1 %vm3864_vm3, %v13153_v32  ;;  %v3860_v4 = vmax.f32 %v3828_v37, 0.0  ;;  %v10621_v40 = vpop.f32.mrb[30].mxu0  ;;  %v13181_v35 = vld [vmem:[#allocation3 + $0x141] sm:$0xff]  ;;  %14489 = vst [vmem:[#allocation4_spill] sm:$0xff] %v13239_v0  ;;  %14490 = vst [vmem:[#allocation5_spill] sm:$0xff] %v13247_v20  ;;  %v13263_v37 = vld [vmem:[#allocation3 + $0x32] sm:$0xff] }
 0x33e   : > { %3950 = vst.msk [vmem:[#allocation3 + $0x171] sm:$0xff] %vm3864_vm3, %v3861_v3  ;;  %v3831_v41 = vadd.f32 %v10621_v40, %v12972_v23  ;;  %v3752_v7 = vpop.f32.mrb[31].mxu0  ;;  %v13169_v5 = vld [vmem:[#allocation3 + $0x139] sm:$0xff]  ;;  %14491 = vst [vmem:[#allocation6_spill] sm:$0xff] %v13263_v37  ;;  %v13278_v40 = vld [vmem:[#allocation3 + $0x4a] sm:$0xff] }
 0x33f   : > { %v13171_v30 = vld [vmem:[#allocation3 + $0x138] sm:$0xff]  ;;  %v13173_v33 = vld [vmem:[#allocation3 + $0x140] sm:$0xff]  ;;  %3949 = vst.msk [vmem:[#allocation3 + $0x169] sm:$0xff] %vm3864_vm3, %v3860_v4  ;;  %v3830_v34 = vadd.f32 %v12972_v23, %v3752_v7  ;;  %10660 = vmatprep.mubr.msk.f32.mxu0 %vm3864_vm3, %v13169_v5  ;;  %14493 = vst [vmem:[#allocation34_spill] sm:$0xff] %v13278_v40 }
 0x340   : > { %10710 = vmatprep.mubr.msk.f32.mxu1 %vm3864_vm3, %v13171_v30  ;;  %v3863_v8 = vmax.f32 %v3831_v41, 0.0  ;;  %10661 = vmatmul.mubr.msk.f32.gmra.mrb[56].mxu0 %vm3864_vm3, %v13181_v35  ;;  %v13245_v62 = vld [vmem:[#allocation3 + $0x20] sm:$0xff]  ;;  %v13268_v3 = vld [vmem:[#allocation3 + $0x38] sm:$0xff]  ;;  %v13284_v41 = vld [vmem:[#allocation3 + $0x50] sm:$0xff] }
 0x341   : > { %10711 = vmatmul.mubr.msk.f32.gmra.mrb[8].mxu1 %vm3864_vm3, %v13173_v33  ;;  %v3862_v6 = vmax.f32 %v3830_v34, 0.0  ;;  %v13199_v46 = vld [vmem:[#allocation3 + $0x159] sm:$0xff] }
 0x342   : > { %3952 = vst.msk [vmem:[#allocation3 + $0x189] sm:$0xff] %vm3864_vm3, %v3863_v8  ;;  %v13188_v44 = vld [vmem:[#allocation3 + $0x151] sm:$0xff]  ;;  %14482 = vst [vmem:[#allocation9_spill] sm:$0xff] %v13199_v46  ;;  %v13252_v24 = vld [vmem:[%s14267_s3 + $0x50] sm:$0xff] }
 0x343   : > { %14481 = vst [vmem:[#allocation8_spill] sm:$0xff] %v13188_v44  ;;  %v13190_v23 = vld [vmem:[#allocation3 + $0x150] sm:$0xff]  ;;  %v13192_v45 = vld [vmem:[#allocation3 + $0x158] sm:$0xff]  ;;  %3951 = vst.msk [vmem:[#allocation3 + $0x181] sm:$0xff] %vm3864_vm3, %v3862_v6  ;;  %10663 = vmatprep.mubr.msk.f32.mxu0 %vm3864_vm3, %v13188_v44 }
 0x344   : > { %10713 = vmatprep.mubr.msk.f32.mxu1 %vm3864_vm3, %v13190_v23  ;;  %10664 = vmatmul.mubr.msk.f32.gmra.mrb[58].mxu0 %vm3864_vm3, %v13199_v46  ;;  %v13270_v4 = vld [vmem:[#allocation3 + $0x3a] sm:$0xff]  ;;  %v13286_v7 = vld [vmem:[#allocation3 + $0x52] sm:$0xff]  ;;  %v13294_v8 = vld [vmem:[#allocation3 + $0x62] sm:$0xff] }
 0x345   : > { %10714 = vmatmul.mubr.msk.f32.gmra.mrb[10].mxu1 %vm3864_vm3, %v13192_v45  ;;  %v13215_v55 = vld [vmem:[#allocation3 + $0x171] sm:$0xff]  ;;  %14492 = vst [vmem:[#allocation7_spill] sm:$0xff] %v13270_v4  ;;  %14494 = vst [vmem:[#allocation35_spill] sm:$0xff] %v13286_v7  ;;  %v13292_v34 = vld [vmem:[#allocation3 + $0x60] sm:$0xff] }
 0x346   : > { %v13205_v47 = vld [vmem:[#allocation3 + $0x169] sm:$0xff]  ;;  %14484 = vst [vmem:[#allocation25_spill] sm:$0xff] %v13215_v55  ;;  %14495 = vst [vmem:[#allocation10_spill] sm:$0xff] %v13294_v8  ;;  %v5050_v46 = vld [vmem:[#allocation3] sm:$0xff] }
 0x347   : > { %14483 = vst [vmem:[#allocation23_spill] sm:$0xff] %v13205_v47  ;;  %v13207_v49 = vld [vmem:[#allocation3 + $0x168] sm:$0xff]  ;;  %v13209_v54 = vld [vmem:[#allocation3 + $0x170] sm:$0xff]  ;;  %10666 = vmatprep.mubr.msk.f32.mxu0 %vm3864_vm3, %v13205_v47  ;;  %v13384_v47 = vld [vmem:[#allocation3 + $0xfa] sm:$0xff] }
 0x348   : > { %10716 = vmatprep.mubr.msk.f32.mxu1 %vm3864_vm3, %v13207_v49  ;;  %10667 = vmatmul.mubr.msk.f32.gmra.mrb[60].mxu0 %vm3864_vm3, %v13215_v55  ;;  %v13300_v6 = vld [vmem:[#allocation3 + $0x68] sm:$0xff]  ;;  %14508 = vst [vmem:[#allocation24_spill] sm:$0xff] %v13384_v47 }
 0x349   : > { %10717 = vmatmul.mubr.msk.f32.gmra.mrb[12].mxu1 %vm3864_vm3, %v13209_v54  ;;  %v13231_v61 = vld [vmem:[#allocation3 + $0x189] sm:$0xff] }
 0x34a   : > { %v13221_v57 = vld [vmem:[#allocation3 + $0x181] sm:$0xff]  ;;  %14488 = vst [vmem:[#allocation32_spill] sm:$0xff] %v13231_v61 }
 0x34b   : > { %14485 = vst [vmem:[#allocation27_spill] sm:$0xff] %v13221_v57  ;;  %v13223_v59 = vld [vmem:[#allocation3 + $0x180] sm:$0xff]  ;;  %v13225_v60 = vld [vmem:[#allocation3 + $0x188] sm:$0xff]  ;;  %10669 = vmatprep.mubr.msk.f32.mxu0 %vm3864_vm3, %v13221_v57 }
 0x34c   : > { %14486 = vst [vmem:[#allocation28_spill] sm:$0xff] %v13223_v59  ;;  %14487 = vst [vmem:[#allocation30_spill] sm:$0xff] %v13225_v60  ;;  %10719 = vmatprep.mubr.msk.f32.mxu1 %vm3864_vm3, %v13223_v59  ;;  %10670 = vmatmul.mubr.msk.f32.gmra.mrb[62].mxu0 %vm3864_vm3, %v13231_v61  ;;  %v13308_v59 = vld [vmem:[#allocation3 + $0x78] sm:$0xff]  ;;  %v13316_v57 = vld [vmem:[#allocation3 + $0x80] sm:$0xff] }
 0x34d   : > { %10720 = vmatmul.mubr.msk.f32.gmra.mrb[14].mxu1 %vm3864_vm3, %v13225_v60  ;;  %10674 = vmatprep.mubr.msk.f32.mxu0 %vm3864_vm3, %v13237_v19  ;;  %v13302_v60 = vld [vmem:[#allocation3 + $0x6a] sm:$0xff]  ;;  %v13310_v61 = vld [vmem:[#allocation3 + $0x7a] sm:$0xff]  ;;  %v13376_v55 = vld [vmem:[#allocation3 + $0xe2] sm:$0xff] }
 0x34e   : > { %10724 = vmatprep.mubr.msk.f32.mxu1 %vm3864_vm3, %v13239_v0  ;;  %14496 = vst [vmem:[#allocation11_spill] sm:$0xff] %v13302_v60  ;;  %14497 = vst [vmem:[#allocation12_spill] sm:$0xff] %v13310_v61  ;;  %v13366_v0 = vld [vmem:[#allocation3 + $0xca] sm:$0xff] }
 0x34f   : > { %14504 = vst [vmem:[#allocation19_spill] sm:$0xff] %v13366_v0  ;;  %14506 = vst [vmem:[#allocation21_spill] sm:$0xff] %v13376_v55  ;;  %v9211_v44 = vld [vmem:[%s14267_s3 + $0x58] sm:$0xff] }
 0x350   : > { %10675 = vmatmul.mubr.msk.f32.vlgmr.msra.gmra.mrb[32].mxu0 %vm3864_vm3, %v13245_v62 }
 0x351   : > { %10725 = vmatmul.mubr.msk.f32.vlgmr.msra.gmra.mrb[16].mxu1 %vm3864_vm3, %v13247_v20  ;;  %10677 = vmatprep.mubr.msk.f32.mxu0 %vm3864_vm3, %v13258_v26  ;;  %v13358_v20 = vld [vmem:[#allocation3 + $0xc2] sm:$0xff] }
 0x352   : > { %10773 = vmatpush3.msra.mxu1 %v13099_v43  ;;  %10727 = vmatprep.mubr.msk.f32.mxu1 %vm3864_vm3, %v13263_v37  ;;  %v13276_v43 = vld [vmem:[#allocation3 + $0x48] sm:$0xff]  ;;  %v13350_v37 = vld [vmem:[#allocation3 + $0xb2] sm:$0xff]  ;;  %14503 = vst [vmem:[#allocation18_spill] sm:$0xff] %v13358_v20 }
 0x353   : > { %10822 = vmatprep.subr.mxu1 %v13252_v24  ;;  %14502 = vst [vmem:[#allocation17_spill] sm:$0xff] %v13350_v37 }
 0x354   : > { %10678 = vmatmul.mubr.msk.f32.gmra.mrb[34].mxu0 %vm3864_vm3, %v13268_v3 }
 0x355   : > { %10728 = vmatmul.mubr.msk.f32.gmra.mrb[18].mxu1 %vm3864_vm3, %v13270_v4  ;;  %10680 = vmatprep.mubr.msk.f32.mxu0 %vm3864_vm3, %v13276_v43  ;;  %v13342_v4 = vld [vmem:[#allocation3 + $0xaa] sm:$0xff] }
 0x356   : > { %10730 = vmatprep.mubr.msk.f32.mxu1 %vm3864_vm3, %v13278_v40  ;;  %v13334_v40 = vld [vmem:[#allocation3 + $0x9a] sm:$0xff]  ;;  %14501 = vst [vmem:[#allocation16_spill] sm:$0xff] %v13342_v4 }
 0x357   : > { %14500 = vst [vmem:[#allocation15_spill] sm:$0xff] %v13334_v40 }
 0x358   : > { %10681 = vmatmul.mubr.msk.f32.gmra.mrb[36].mxu0 %vm3864_vm3, %v13284_v41 }
 0x359   : > { %10731 = vmatmul.mubr.msk.f32.gmra.mrb[20].mxu1 %vm3864_vm3, %v13286_v7  ;;  %10683 = vmatprep.mubr.msk.f32.mxu0 %vm3864_vm3, %v13292_v34  ;;  %v13326_v7 = vld [vmem:[#allocation3 + $0x92] sm:$0xff] }
 0x35a   : > { %10733 = vmatprep.mubr.msk.f32.mxu1 %vm3864_vm3, %v13294_v8  ;;  %v13318_v8 = vld [vmem:[#allocation3 + $0x82] sm:$0xff]  ;;  %14499 = vst [vmem:[#allocation14_spill] sm:$0xff] %v13326_v7 }
 0x35b   : > { %14498 = vst [vmem:[#allocation13_spill] sm:$0xff] %v13318_v8 }
 0x35c   : > { %10684 = vmatmul.mubr.msk.f32.gmra.mrb[38].mxu0 %vm3864_vm3, %v13300_v6 }
 0x35d   : > { %10734 = vmatmul.mubr.msk.f32.gmra.mrb[22].mxu1 %vm3864_vm3, %v13302_v60  ;;  %10686 = vmatprep.mubr.msk.f32.mxu0 %vm3864_vm3, %v13308_v59  ;;  %v13324_v60 = vld [vmem:[#allocation3 + $0x90] sm:$0xff] }
 0x35e   : > { %10736 = vmatprep.mubr.msk.f32.mxu1 %vm3864_vm3, %v13310_v61  ;;  %v13332_v61 = vld [vmem:[#allocation3 + $0x98] sm:$0xff] }
 0x360   : > { %10687 = vmatmul.mubr.msk.f32.gmra.mrb[40].mxu0 %vm3864_vm3, %v13316_v57 }
 0x361   : > { %10737 = vmatmul.mubr.msk.f32.gmra.mrb[24].mxu1 %vm3864_vm3, %v13318_v8  ;;  %10689 = vmatprep.mubr.msk.f32.mxu0 %vm3864_vm3, %v13324_v60  ;;  %v13340_v8 = vld [vmem:[#allocation3 + $0xa8] sm:$0xff] }
 0x362   : > { %10739 = vmatprep.mubr.msk.f32.mxu1 %vm3864_vm3, %v13326_v7  ;;  %v13348_v7 = vld [vmem:[#allocation3 + $0xb0] sm:$0xff] }
 0x364   : > { %10690 = vmatmul.mubr.msk.f32.gmra.mrb[42].mxu0 %vm3864_vm3, %v13332_v61 }
 0x365   : > { %10740 = vmatmul.mubr.msk.f32.gmra.mrb[26].mxu1 %vm3864_vm3, %v13334_v40  ;;  %10692 = vmatprep.mubr.msk.f32.mxu0 %vm3864_vm3, %v13340_v8  ;;  %v13356_v40 = vld [vmem:[#allocation3 + $0xc0] sm:$0xff] }
 0x366   : > { %10742 = vmatprep.mubr.msk.f32.mxu1 %vm3864_vm3, %v13342_v4  ;;  %v13364_v4 = vld [vmem:[#allocation3 + $0xc8] sm:$0xff] }
 0x368   : > { %10693 = vmatmul.mubr.msk.f32.gmra.mrb[44].mxu0 %vm3864_vm3, %v13348_v7 }
 0x369   : > { %10743 = vmatmul.mubr.msk.f32.gmra.mrb[28].mxu1 %vm3864_vm3, %v13350_v37  ;;  %10695 = vmatprep.mubr.msk.f32.mxu0 %vm3864_vm3, %v13356_v40  ;;  %v13372_v37 = vld [vmem:[#allocation3 + $0xda] sm:$0xff] }
 0x36a   : > { %10745 = vmatprep.mubr.msk.f32.mxu1 %vm3864_vm3, %v13358_v20  ;;  %14505 = vst [vmem:[#allocation20_spill] sm:$0xff] %v13372_v37  ;;  %v13380_v20 = vld [vmem:[#allocation3 + $0xf2] sm:$0xff] }
 0x36b   : > { %14507 = vst [vmem:[#allocation22_spill] sm:$0xff] %v13380_v20 }
 0x36c   : > { %10696 = vmatmul.mubr.msk.f32.gmra.mrb[46].mxu0 %vm3864_vm3, %v13364_v4 }
 0x36d   : > { %10746 = vmatmul.mubr.msk.f32.gmra.mrb[30].mxu1 %vm3864_vm3, %v13366_v0  ;;  %v13388_v0 = vld [vmem:[#allocation3 + $0x10a] sm:$0xff] }
 0x36e   : > { %10748 = vmatprep.mubr.msk.f32.mxu1 %vm3864_vm3, %v13372_v37  ;;  %14509 = vst [vmem:[#allocation26_spill] sm:$0xff] %v13388_v0  ;;  %v13392_v37 = vld [vmem:[#allocation3 + $0x112] sm:$0xff] }
 0x36f   : > { %14510 = vst [vmem:[#allocation29_spill] sm:$0xff] %v13392_v37 }
 0x371   : > { %10749 = vmatmul.mubr.msk.f32.gmra.mrb[0].mxu1 %vm3864_vm3, %v13376_v55  ;;  %v13396_v55 = vld [vmem:[#allocation3 + $0x122] sm:$0xff] }
 0x372   : > { %10751 = vmatprep.mubr.msk.f32.mxu1 %vm3864_vm3, %v13380_v20  ;;  %14511 = vst [vmem:[#allocation31_spill] sm:$0xff] %v13396_v55  ;;  %v13400_v20 = vld [vmem:[#allocation3 + $0x12a] sm:$0xff] }
 0x373   : > { %14512 = vst [vmem:[#allocation33_spill] sm:$0xff] %v13400_v20 }
 0x375   : > { %10752 = vmatmul.mubr.msk.f32.gmra.mrb[2].mxu1 %vm3864_vm3, %v13384_v47  ;;  %v13404_v47 = vld [vmem:[#allocation3 + $0x13a] sm:$0xff] }
 0x376   : > { %10754 = vmatprep.mubr.msk.f32.mxu1 %vm3864_vm3, %v13388_v0  ;;  %14513 = vst [vmem:[#allocation36_spill] sm:$0xff] %v13404_v47  ;;  %v13408_v0 = vld [vmem:[#allocation3 + $0x142] sm:$0xff] }
 0x377   : > { %14514 = vst [vmem:[#allocation37_spill] sm:$0xff] %v13408_v0 }
 0x379   : > { %10755 = vmatmul.mubr.msk.f32.gmra.mrb[4].mxu1 %vm3864_vm3, %v13392_v37  ;;  %v13412_v37 = vld [vmem:[#allocation3 + $0x152] sm:$0xff] }
 0x37a   : > { %10757 = vmatprep.mubr.msk.f32.mxu1 %vm3864_vm3, %v13396_v55  ;;  %14515 = vst [vmem:[#allocation38_spill] sm:$0xff] %v13412_v37  ;;  %v13416_v55 = vld [vmem:[#allocation3 + $0x15a] sm:$0xff] }
 0x37b   : > { %14516 = vst [vmem:[#allocation39_spill] sm:$0xff] %v13416_v55 }
 0x37d   : > { %10758 = vmatmul.mubr.msk.f32.gmra.mrb[6].mxu1 %vm3864_vm3, %v13400_v20  ;;  %v13420_v20 = vld [vmem:[#allocation3 + $0x16a] sm:$0xff] }
 0x37e   : > { %10760 = vmatprep.mubr.msk.f32.mxu1 %vm3864_vm3, %v13404_v47  ;;  %v13424_v47 = vld [vmem:[#allocation3 + $0x172] sm:$0xff] }
 0x381   : > { %10761 = vmatmul.mubr.msk.f32.gmra.mrb[8].mxu1 %vm3864_vm3, %v13408_v0  ;;  %v4693_v0 = vld [vmem:[#allocation3 + $0x182] sm:$0xff] }
 0x382   : > { %10763 = vmatprep.mubr.msk.f32.mxu1 %vm3864_vm3, %v13412_v37  ;;  %v4694_v37 = vld [vmem:[#allocation3 + $0x18a] sm:$0xff] }
 0x385   : > { %10764 = vmatmul.mubr.msk.f32.gmra.mrb[10].mxu1 %vm3864_vm3, %v13416_v55  ;;  %v5051_v55 = vld [vmem:[#allocation3 + $0x8] sm:$0xff] }
 0x386   : > { %10766 = vmatprep.mubr.msk.f32.mxu1 %vm3864_vm3, %v13420_v20 }
 0x389   : > { %10767 = vmatmul.mubr.msk.f32.gmra.mrb[12].mxu1 %vm3864_vm3, %v13424_v47 }
 0x38a   : > { %10769 = vmatprep.mubr.msk.f32.mxu1 %vm3864_vm3, %v4693_v0  ;;  %v14526_v0 = vld [vmem:[#allocation25_spill] sm:$0xff] }
 0x38d   : > { %10770 = vmatmul.mubr.msk.f32.gmra.mrb[14].mxu1 %vm3864_vm3, %v4694_v37  ;;  %v13579_v37 = vld [vmem:[%s14267_s3] sm:$0xff] }
 0x38e   : > { %10774 = vmatprep.mubr.msk.f32.mxu1 %vm3864_vm3, %v5050_v46  ;;  %v5824_v46 = vld [vmem:[#allocation3 + $0x2] sm:$0xff] }
 0x391   : > { %10775 = vmatmul.mubr.msk.f32.vlgmr.msra.gmra.mrb[16].mxu1 %vm3864_vm3, %v5051_v55 }
 0x392   : > { %10823 = vmatpush3.msra.mxu1 %v13252_v24  ;;  %10777 = vmatprep.mubr.msk.f32.mxu1 %vm3864_vm3, %v13237_v19 }
 0x393   : > { %10872 = vmatprep.subr.mxu1 %v9211_v44 }
 0x395   : > { %10778 = vmatmul.mubr.msk.f32.gmra.mrb[18].mxu1 %vm3864_vm3, %v13245_v62  ;;  %v5825_v62 = vld [vmem:[#allocation3 + $0xa] sm:$0xff] }
 0x396   : > { %10780 = vmatprep.mubr.msk.f32.mxu1 %vm3864_vm3, %v13258_v26 }
 0x399   : > { %10781 = vmatmul.mubr.msk.f32.gmra.mrb[20].mxu1 %vm3864_vm3, %v13268_v3 }
 0x39a   : > { %10783 = vmatprep.mubr.msk.f32.mxu1 %vm3864_vm3, %v13276_v43 }
 0x39d   : > { %10784 = vmatmul.mubr.msk.f32.gmra.mrb[22].mxu1 %vm3864_vm3, %v13284_v41 }
 0x39e   : > { %10786 = vmatprep.mubr.msk.f32.mxu1 %vm3864_vm3, %v13292_v34 }
 0x3a1   : > { %10787 = vmatmul.mubr.msk.f32.gmra.mrb[24].mxu1 %vm3864_vm3, %v13300_v6 }
 0x3a2   : > { %10789 = vmatprep.mubr.msk.f32.mxu1 %vm3864_vm3, %v13308_v59 }
 0x3a5   : > { %10790 = vmatmul.mubr.msk.f32.gmra.mrb[26].mxu1 %vm3864_vm3, %v13316_v57 }
 0x3a6   : > { %10792 = vmatprep.mubr.msk.f32.mxu1 %vm3864_vm3, %v13324_v60 }
 0x3a9   : > { %10793 = vmatmul.mubr.msk.f32.gmra.mrb[28].mxu1 %vm3864_vm3, %v13332_v61 }
 0x3aa   : > { %10795 = vmatprep.mubr.msk.f32.mxu1 %vm3864_vm3, %v13340_v8 }
 0x3ad   : > { %10796 = vmatmul.mubr.msk.f32.gmra.mrb[30].mxu1 %vm3864_vm3, %v13348_v7 }
 0x3ae   : > { %10798 = vmatprep.mubr.msk.f32.mxu1 %vm3864_vm3, %v13356_v40 }
 0x3b1   : > { %10799 = vmatmul.mubr.msk.f32.gmra.mrb[0].mxu1 %vm3864_vm3, %v13364_v4 }
 0x3b2   : > { %10801 = vmatprep.mubr.msk.f32.mxu1 %vm3864_vm3, %v13084_v10  ;;  %v5437_v10 = vld [vmem:[#allocation3 + $0x1] sm:$0xff] }
 0x3b5   : > { %10802 = vmatmul.mubr.msk.f32.gmra.mrb[2].mxu1 %vm3864_vm3, %v13086_v11  ;;  %v5438_v11 = vld [vmem:[#allocation3 + $0x9] sm:$0xff] }
 0x3b6   : > { %10804 = vmatprep.mubr.msk.f32.mxu1 %vm3864_vm3, %v13110_v52  ;;  %v9245_v52 = vld [vmem:[%s14267_s3 + $0x8] sm:$0xff] }
 0x3b9   : > { %10805 = vmatmul.mubr.msk.f32.gmra.mrb[4].mxu1 %vm3864_vm3, %v13112_v53 }
 0x3ba   : > { %10807 = vmatprep.mubr.msk.f32.mxu1 %vm3864_vm3, %v13131_v15 }
 0x3bd   : > { %10808 = vmatmul.mubr.msk.f32.gmra.mrb[6].mxu1 %vm3864_vm3, %v13133_v17 }
 0x3be   : > { %10810 = vmatprep.mubr.msk.f32.mxu1 %vm3864_vm3, %v13151_v31 }
 0x3c1   : > { %10811 = vmatmul.mubr.msk.f32.gmra.mrb[8].mxu1 %vm3864_vm3, %v13153_v32 }
 0x3c2   : > { %10813 = vmatprep.mubr.msk.f32.mxu1 %vm3864_vm3, %v13171_v30 }
 0x3c5   : > { %10814 = vmatmul.mubr.msk.f32.gmra.mrb[10].mxu1 %vm3864_vm3, %v13173_v33 }
 0x3c6   : > { %10816 = vmatprep.mubr.msk.f32.mxu1 %vm3864_vm3, %v13190_v23 }
 0x3c9   : > { %10817 = vmatmul.mubr.msk.f32.gmra.mrb[12].mxu1 %vm3864_vm3, %v13192_v45 }
 0x3ca   : > { %10819 = vmatprep.mubr.msk.f32.mxu1 %vm3864_vm3, %v13207_v49 }
 0x3cd   : > { %10820 = vmatmul.mubr.msk.f32.gmra.mrb[14].mxu1 %vm3864_vm3, %v13209_v54 }
 0x3ce   : > { %10824 = vmatprep.mubr.msk.f32.mxu1 %vm3864_vm3, %v5437_v10 }
 0x3d1   : > { %10825 = vmatmul.mubr.msk.f32.vlgmr.msra.gmra.mrb[16].mxu1 %vm3864_vm3, %v5438_v11  ;;  %v14529_v11 = vld [vmem:[#allocation4_spill] sm:$0xff] }
 0x3d2   : > { %10873 = vmatpush3.msra.mxu1 %v9211_v44  ;;  %10827 = vmatprep.mubr.msk.f32.mxu1 %vm3864_vm3, %v12986_v63  ;;  %v14523_v44 = vld [vmem:[#allocation23_spill] sm:$0xff] }
 0x3d3   : > { %10922 = vmatprep.subr.mxu1 %v9245_v52 }
 0x3d5   : > { %10828 = vmatmul.mubr.msk.f32.gmra.mrb[18].mxu1 %vm3864_vm3, %v12992_v29 }
 0x3d6   : > { %10830 = vmatprep.mubr.msk.f32.mxu1 %vm3864_vm3, %v12998_v12  ;;  %v14519_v12 = vld [vmem:[#allocation8_spill] sm:$0xff] }
 0x3d9   : > { %10831 = vmatmul.mubr.msk.f32.gmra.mrb[20].mxu1 %vm3864_vm3, %v13004_v36 }
 0x3da   : > { %10833 = vmatprep.mubr.msk.f32.mxu1 %vm3864_vm3, %v13010_v48 }
 0x3dd   : > { %10834 = vmatmul.mubr.msk.f32.gmra.mrb[22].mxu1 %vm3864_vm3, %v13016_v50  ;;  %v14522_v50 = vld [vmem:[#allocation9_spill] sm:$0xff] }
 0x3de   : > { %10836 = vmatprep.mubr.msk.f32.mxu1 %vm3864_vm3, %v13022_v56 }
 0x3e1   : > { %10837 = vmatmul.mubr.msk.f32.gmra.mrb[24].mxu1 %vm3864_vm3, %v13028_v58 }
 0x3e2   : > { %10839 = vmatprep.mubr.msk.f32.mxu1 %vm3864_vm3, %v13034_v16 }
 0x3e5   : > { %10840 = vmatmul.mubr.msk.f32.gmra.mrb[26].mxu1 %vm3864_vm3, %v13040_v18 }
 0x3e6   : > { %10842 = vmatprep.mubr.msk.f32.mxu1 %vm3864_vm3, %v13046_v21 }
 0x3e9   : > { %10843 = vmatmul.mubr.msk.f32.gmra.mrb[28].mxu1 %vm3864_vm3, %v13052_v25 }
 0x3ea   : > { %10845 = vmatprep.mubr.msk.f32.mxu1 %vm3864_vm3, %v13058_v38 }
 0x3ed   : > { %10846 = vmatmul.mubr.msk.f32.gmra.mrb[30].mxu1 %vm3864_vm3, %v13064_v42 }
 0x3ee   : > { %10848 = vmatprep.mubr.msk.f32.mxu1 %vm3864_vm3, %v13070_v2 }
 0x3f1   : > { %10849 = vmatmul.mubr.msk.f32.gmra.mrb[0].mxu1 %vm3864_vm3, %v13076_v28 }
 0x3f2   : > { %10851 = vmatprep.mubr.msk.f32.mxu1 %vm3864_vm3, %v13082_v9 }
 0x3f5   : > { %10852 = vmatmul.mubr.msk.f32.gmra.mrb[2].mxu1 %vm3864_vm3, %v13094_v13 }
 0x3f6   : > { %10854 = vmatprep.mubr.msk.f32.mxu1 %vm3864_vm3, %v13108_v51 }
 0x3f9   : > { %10855 = vmatmul.mubr.msk.f32.gmra.mrb[4].mxu1 %vm3864_vm3, %v13121_v22 }
 0x3fa   : > { %10857 = vmatprep.mubr.msk.f32.mxu1 %vm3864_vm3, %v13129_v14 }
 0x3fd   : > { %10858 = vmatmul.mubr.msk.f32.gmra.mrb[6].mxu1 %vm3864_vm3, %v13141_v1 }
 0x3fe   : > { %10860 = vmatprep.mubr.msk.f32.mxu1 %vm3864_vm3, %v13149_v27 }
 0x401   : > { %10861 = vmatmul.mubr.msk.f32.gmra.mrb[8].mxu1 %vm3864_vm3, %v13161_v39 }
 0x402   : > { %10863 = vmatprep.mubr.msk.f32.mxu1 %vm3864_vm3, %v13169_v5 }
 0x403   : > { %v13551_v63 = vpop.f32.mrb[48].mxu0 }
 0x404   : > { %14517 = vst [vmem:[#allocation40_spill] sm:$0xff] %v13551_v63  ;;  %v13553_v29 = vpop.f32.mrb[49].mxu0 }
 0x405   : > { %14518 = vst [vmem:[#allocation41_spill] sm:$0xff] %v13553_v29  ;;  %10864 = vmatmul.mubr.msk.f32.gmra.mrb[10].mxu1 %vm3864_vm3, %v13181_v35  ;;  %v14545_v29 = vld [vmem:[#allocation12_spill] sm:$0xff] }
 0x406   : > { %10866 = vmatprep.mubr.msk.f32.mxu1 %vm3864_vm3, %v14519_v12 }
 0x407   : > { %v13559_v36 = vpop.f32.mrb[50].mxu0 }
 0x408   : > { %14520 = vst [vmem:[#allocation8_spill] sm:$0xff] %v13559_v36  ;;  %v13561_v48 = vpop.f32.mrb[51].mxu0 }
 0x409   : > { %14521 = vst [vmem:[#allocation42_spill] sm:$0xff] %v13561_v48  ;;  %10867 = vmatmul.mubr.msk.f32.gmra.mrb[12].mxu1 %vm3864_vm3, %v14522_v50 }
 0x40a   : > { %10869 = vmatprep.mubr.msk.f32.mxu1 %vm3864_vm3, %v14523_v44 }
 0x40b   : > { %v13567_v55 = vpop.f32.mrb[52].mxu0 }
 0x40c   : > { %14524 = vst [vmem:[#allocation9_spill] sm:$0xff] %v13567_v55  ;;  %v13569_v19 = vpop.f32.mrb[53].mxu0  ;;  %v14533_v55 = vld [vmem:[#allocation6_spill] sm:$0xff] }
 0x40d   : > { %14525 = vst [vmem:[#allocation23_spill] sm:$0xff] %v13569_v19  ;;  %10870 = vmatmul.mubr.msk.f32.gmra.mrb[14].mxu1 %vm3864_vm3, %v14526_v0 }
 0x40e   : > { %10874 = vmatprep.mubr.msk.f32.mxu1 %vm3864_vm3, %v5824_v46 }
 0x40f   : > { %v13574_v24 = vpop.f32.mrb[54].mxu0 }
 0x410   : > { %14527 = vst [vmem:[#allocation25_spill] sm:$0xff] %v13574_v24  ;;  %v13581_v10 = vpop.f32.mrb[55].mxu0  ;;  %v14532_v24 = vld [vmem:[#allocation5_spill] sm:$0xff] }
 0x411   : > { %14528 = vst [vmem:[#allocation43_spill] sm:$0xff] %v13581_v10  ;;  %10875 = vmatmul.mubr.msk.f32.vlgmr.msra.gmra.mrb[16].mxu1 %vm3864_vm3, %v5825_v62  ;;  %v14537_v62 = vld [vmem:[#allocation34_spill] sm:$0xff] }
 0x412   : > { %10923 = vmatpush3.msra.mxu1 %v9245_v52  ;;  %10877 = vmatprep.mubr.msk.f32.mxu1 %vm3864_vm3, %v14529_v11  ;;  %v14536_v52 = vld [vmem:[#allocation7_spill] sm:$0xff] }
 0x413   : > { %10972 = vmatprep.subr.mxu1 %v13579_v37  ;;  %v13587_v19 = vpop.f32.mrb[56].mxu0 }
 0x414   : > { %14530 = vst [vmem:[#allocation4_spill] sm:$0xff] %v13587_v19  ;;  %v13589_v46 = vpop.f32.mrb[57].mxu0 }
 0x415   : > { %14531 = vst [vmem:[#allocation44_spill] sm:$0xff] %v13589_v46  ;;  %10878 = vmatmul.mubr.msk.f32.gmra.mrb[18].mxu1 %vm3864_vm3, %v14532_v24  ;;  %v14540_v46 = vld [vmem:[#allocation35_spill] sm:$0xff]  ;;  %v14541_v24 = vld [vmem:[#allocation10_spill] sm:$0xff] }
 0x416   : > { %10880 = vmatprep.mubr.msk.f32.mxu1 %vm3864_vm3, %v14533_v55 }
 0x417   : > { %v13595_v48 = vpop.f32.mrb[58].mxu0 }
 0x418   : > { %14534 = vst [vmem:[#allocation5_spill] sm:$0xff] %v13595_v48  ;;  %v13597_v10 = vpop.f32.mrb[59].mxu0 }
 0x419   : > { %14535 = vst [vmem:[#allocation6_spill] sm:$0xff] %v13597_v10  ;;  %10881 = vmatmul.mubr.msk.f32.gmra.mrb[20].mxu1 %vm3864_vm3, %v14536_v52  ;;  %v14544_v10 = vld [vmem:[#allocation11_spill] sm:$0xff] }
 0x41a   : > { %10883 = vmatprep.mubr.msk.f32.mxu1 %vm3864_vm3, %v14537_v62 }
 0x41b   : > { %v13603_v11 = vpop.f32.mrb[60].mxu0 }
 0x41c   : > { %14538 = vst [vmem:[#allocation7_spill] sm:$0xff] %v13603_v11  ;;  %v13605_v19 = vpop.f32.mrb[61].mxu0 }
 0x41d   : > { %14539 = vst [vmem:[#allocation34_spill] sm:$0xff] %v13605_v19  ;;  %10884 = vmatmul.mubr.msk.f32.gmra.mrb[22].mxu1 %vm3864_vm3, %v14540_v46  ;;  %v14548_v19 = vld [vmem:[#allocation13_spill] sm:$0xff]  ;;  %v14549_v46 = vld [vmem:[#allocation14_spill] sm:$0xff] }
 0x41e   : > { %10886 = vmatprep.mubr.msk.f32.mxu1 %vm3864_vm3, %v14541_v24 }
 0x41f   : > { %v13611_v36 = vpop.f32.mrb[62].mxu0 }
 0x420   : > { %14542 = vst [vmem:[#allocation45_spill] sm:$0xff] %v13611_v36  ;;  %v13613_v48 = vpop.f32.mrb[63].mxu0 }
 0x421   : > { %14543 = vst [vmem:[#allocation46_spill] sm:$0xff] %v13613_v48  ;;  %10887 = vmatmul.mubr.msk.f32.gmra.mrb[24].mxu1 %vm3864_vm3, %v14544_v10  ;;  %v14552_v48 = vld [vmem:[#allocation15_spill] sm:$0xff]  ;;  %v14553_v10 = vld [vmem:[#allocation16_spill] sm:$0xff] }
 0x422   : > { %10889 = vmatprep.mubr.msk.f32.mxu1 %vm3864_vm3, %v14545_v29 }
 0x423   : > { %v13619_v63 = vpop.f32.mrb[32].mxu0 }
 0x424   : > { %14546 = vst [vmem:[#allocation47_spill] sm:$0xff] %v13619_v63  ;;  %v13621_v11 = vpop.f32.mrb[33].mxu0 }
 0x425   : > { %14547 = vst [vmem:[#allocation48_spill] sm:$0xff] %v13621_v11  ;;  %10890 = vmatmul.mubr.msk.f32.gmra.mrb[26].mxu1 %vm3864_vm3, %v14548_v19  ;;  %v14556_v11 = vld [vmem:[#allocation17_spill] sm:$0xff]  ;;  %v14557_v19 = vld [vmem:[#allocation18_spill] sm:$0xff] }
 0x426   : > { %10892 = vmatprep.mubr.msk.f32.mxu1 %vm3864_vm3, %v14549_v46 }
 0x427   : > { %v13627_v24 = vpop.f32.mrb[34].mxu0 }
 0x428   : > { %14550 = vst [vmem:[#allocation49_spill] sm:$0xff] %v13627_v24  ;;  %v13629_v36 = vpop.f32.mrb[35].mxu0 }
 0x429   : > { %14551 = vst [vmem:[#allocation50_spill] sm:$0xff] %v13629_v36  ;;  %10893 = vmatmul.mubr.msk.f32.gmra.mrb[28].mxu1 %vm3864_vm3, %v14552_v48  ;;  %v14560_v36 = vld [vmem:[#allocation19_spill] sm:$0xff]  ;;  %v14561_v48 = vld [vmem:[#allocation20_spill] sm:$0xff] }
 0x42a   : > { %10895 = vmatprep.mubr.msk.f32.mxu1 %vm3864_vm3, %v14553_v10 }
 0x42b   : > { %v13635_v29 = vpop.f32.mrb[36].mxu0 }
 0x42c   : > { %14554 = vst [vmem:[#allocation51_spill] sm:$0xff] %v13635_v29  ;;  %v13637_v63 = vpop.f32.mrb[37].mxu0 }
 0x42d   : > { %14555 = vst [vmem:[#allocation52_spill] sm:$0xff] %v13637_v63  ;;  %10896 = vmatmul.mubr.msk.f32.gmra.mrb[30].mxu1 %vm3864_vm3, %v14556_v11  ;;  %v14564_v63 = vld [vmem:[#allocation21_spill] sm:$0xff]  ;;  %v14565_v11 = vld [vmem:[#allocation22_spill] sm:$0xff] }
 0x42e   : > { %10898 = vmatprep.mubr.msk.f32.mxu1 %vm3864_vm3, %v14557_v19 }
 0x42f   : > { %v13643_v46 = vpop.f32.mrb[38].mxu0 }
 0x430   : > { %14558 = vst [vmem:[#allocation53_spill] sm:$0xff] %v13643_v46  ;;  %v13645_v24 = vpop.f32.mrb[39].mxu0 }
 0x431   : > { %14559 = vst [vmem:[#allocation54_spill] sm:$0xff] %v13645_v24  ;;  %10899 = vmatmul.mubr.msk.f32.gmra.mrb[0].mxu1 %vm3864_vm3, %v14560_v36  ;;  %v14568_v24 = vld [vmem:[#allocation24_spill] sm:$0xff]  ;;  %v14569_v36 = vld [vmem:[#allocation26_spill] sm:$0xff] }
 0x432   : > { %10901 = vmatprep.mubr.msk.f32.mxu1 %vm3864_vm3, %v14561_v48 }
 0x433   : > { %v13651_v10 = vpop.f32.mrb[40].mxu0 }
 0x434   : > { %14562 = vst [vmem:[#allocation55_spill] sm:$0xff] %v13651_v10  ;;  %v13653_v29 = vpop.f32.mrb[41].mxu0 }
 0x435   : > { %14563 = vst [vmem:[#allocation56_spill] sm:$0xff] %v13653_v29  ;;  %10902 = vmatmul.mubr.msk.f32.gmra.mrb[2].mxu1 %vm3864_vm3, %v14564_v63  ;;  %v14572_v29 = vld [vmem:[#allocation29_spill] sm:$0xff]  ;;  %v14573_v63 = vld [vmem:[#allocation31_spill] sm:$0xff] }
 0x436   : > { %10904 = vmatprep.mubr.msk.f32.mxu1 %vm3864_vm3, %v14565_v11 }
 0x437   : > { %v13659_v19 = vpop.f32.mrb[42].mxu0 }
 0x438   : > { %14566 = vst [vmem:[#allocation57_spill] sm:$0xff] %v13659_v19  ;;  %v13661_v46 = vpop.f32.mrb[43].mxu0 }
 0x439   : > { %14567 = vst [vmem:[#allocation58_spill] sm:$0xff] %v13661_v46  ;;  %10905 = vmatmul.mubr.msk.f32.gmra.mrb[4].mxu1 %vm3864_vm3, %v14568_v24  ;;  %v14576_v46 = vld [vmem:[#allocation33_spill] sm:$0xff]  ;;  %v14577_v24 = vld [vmem:[#allocation36_spill] sm:$0xff] }
 0x43a   : > { %10907 = vmatprep.mubr.msk.f32.mxu1 %vm3864_vm3, %v14569_v36  ;;  %v14578_v36 = vld [vmem:[#allocation37_spill] sm:$0xff] }
 0x43b   : > { %v13667_v48 = vpop.f32.mrb[44].mxu0 }
 0x43c   : > { %14570 = vst [vmem:[#allocation59_spill] sm:$0xff] %v13667_v48  ;;  %v13669_v10 = vpop.f32.mrb[45].mxu0  ;;  %v14580_v48 = vld [vmem:[#allocation39_spill] sm:$0xff] }
 0x43d   : > { %14571 = vst [vmem:[#allocation60_spill] sm:$0xff] %v13669_v10  ;;  %10908 = vmatmul.mubr.msk.f32.gmra.mrb[6].mxu1 %vm3864_vm3, %v14572_v29  ;;  %v14579_v10 = vld [vmem:[#allocation38_spill] sm:$0xff] }
 0x43e   : > { %10910 = vmatprep.mubr.msk.f32.mxu1 %vm3864_vm3, %v14573_v63 }
 0x43f   : > { %v13675_v11 = vpop.f32.mrb[46].mxu0 }
 0x440   : > { %14574 = vst [vmem:[#allocation29_spill] sm:$0xff] %v13675_v11  ;;  %v13677_v19 = vpop.f32.mrb[47].mxu0  ;;  %v13697_v11 = vld [vmem:[#allocation3 + $0x39] sm:$0xff] }
 0x441   : > { %14575 = vst [vmem:[#allocation31_spill] sm:$0xff] %v13677_v19  ;;  %10911 = vmatmul.mubr.msk.f32.gmra.mrb[8].mxu1 %vm3864_vm3, %v14576_v46  ;;  %v13693_v19 = vld [vmem:[#allocation3 + $0x31] sm:$0xff] }
 0x442   : > { %10913 = vmatprep.mubr.msk.f32.mxu1 %vm3864_vm3, %v14577_v24 }
 0x445   : > { %10914 = vmatmul.mubr.msk.f32.gmra.mrb[10].mxu1 %vm3864_vm3, %v14578_v36 }
 0x446   : > { %10916 = vmatprep.mubr.msk.f32.mxu1 %vm3864_vm3, %v14579_v10  ;;  %v9310_v10 = vld [vmem:[%s14267_s3 + $0x10] sm:$0xff] }
 0x449   : > { %10917 = vmatmul.mubr.msk.f32.gmra.mrb[12].mxu1 %vm3864_vm3, %v14580_v48  ;;  %v13704_v48 = vld [vmem:[#allocation3 + $0x49] sm:$0xff] }
 0x44a   : > { %10919 = vmatprep.mubr.msk.f32.mxu1 %vm3864_vm3, %v13420_v20 }
 0x44d   : > { %10920 = vmatmul.mubr.msk.f32.gmra.mrb[14].mxu1 %vm3864_vm3, %v13424_v47  ;;  %v13709_v47 = vld [vmem:[#allocation3 + $0x51] sm:$0xff] }
 0x44e   : > { %10924 = vmatprep.mubr.msk.f32.mxu1 %vm3864_vm3, %v13693_v19 }
 0x451   : > { %10925 = vmatmul.mubr.msk.f32.vlgmr.msra.gmra.mrb[32].mxu1 %vm3864_vm3, %v13697_v11 }
 0x452   : > { %10973 = vmatpush3.msra.mxu1 %v13579_v37  ;;  %10927 = vmatprep.mubr.msk.f32.mxu1 %vm3864_vm3, %v13704_v48 }
 0x453   : > { %11022 = vmatprep.subr.mxu1 %v9310_v10 }
 0x455   : > { %10928 = vmatmul.mubr.msk.f32.gmra.mrb[34].mxu1 %vm3864_vm3, %v13709_v47 }
 0x456   : > { %10930 = vmatprep.mubr.msk.f32.mxu1 %vm3864_vm3, %v13022_v56  ;;  %v14581_v56 = vld [vmem:[#allocation27_spill] sm:$0xff] }
 0x459   : > { %10931 = vmatmul.mubr.msk.f32.gmra.mrb[36].mxu1 %vm3864_vm3, %v13028_v58  ;;  %v6378_v58 = vld [vmem:[#allocation3 + $0x199] sm:$0xff] }
 0x45a   : > { %10933 = vmatprep.mubr.msk.f32.mxu1 %vm3864_vm3, %v13034_v16  ;;  %v14582_v16 = vld [vmem:[#allocation32_spill] sm:$0xff] }
 0x45d   : > { %10934 = vmatmul.mubr.msk.f32.gmra.mrb[38].mxu1 %vm3864_vm3, %v13040_v18  ;;  %v6379_v18 = vld [vmem:[#allocation3 + $0x1a1] sm:$0xff] }
 0x45e   : > { %10936 = vmatprep.mubr.msk.f32.mxu1 %vm3864_vm3, %v13046_v21  ;;  %v9343_v21 = vld [vmem:[%s14267_s3 + $0x30] sm:$0xff] }
 0x461   : > { %10937 = vmatmul.mubr.msk.f32.gmra.mrb[40].mxu1 %vm3864_vm3, %v13052_v25  ;;  %v13798_v25 = vld [vmem:[#allocation3 + $0xd8] sm:$0xff] }
 0x462   : > { %10939 = vmatprep.mubr.msk.f32.mxu1 %vm3864_vm3, %v13058_v38  ;;  %v13802_v38 = vld [vmem:[#allocation3 + $0xe0] sm:$0xff] }
 0x465   : > { %10940 = vmatmul.mubr.msk.f32.gmra.mrb[42].mxu1 %vm3864_vm3, %v13064_v42  ;;  %v13806_v42 = vld [vmem:[#allocation3 + $0xf0] sm:$0xff] }
 0x466   : > { %10942 = vmatprep.mubr.msk.f32.mxu1 %vm3864_vm3, %v13070_v2  ;;  %v14583_v2 = vld [vmem:[#allocation28_spill] sm:$0xff] }
 0x469   : > { %10943 = vmatmul.mubr.msk.f32.gmra.mrb[44].mxu1 %vm3864_vm3, %v13076_v28  ;;  %v6345_v28 = vld [vmem:[#allocation3 + $0x198] sm:$0xff] }
 0x46a   : > { %10945 = vmatprep.mubr.msk.f32.mxu1 %vm3864_vm3, %v13082_v9  ;;  %v14584_v9 = vld [vmem:[#allocation30_spill] sm:$0xff] }
 0x46d   : > { %10946 = vmatmul.mubr.msk.f32.gmra.mrb[46].mxu1 %vm3864_vm3, %v13094_v13  ;;  %v6346_v13 = vld [vmem:[#allocation3 + $0x1a0] sm:$0xff] }
 0x46e   : > { %10948 = vmatprep.mubr.msk.f32.mxu1 %vm3864_vm3, %v13108_v51  ;;  %v13843_v51 = vld [vmem:[%s14267_s3 + $0x38] sm:$0xff] }
 0x471   : > { %10949 = vmatmul.mubr.msk.f32.gmra.mrb[48].mxu1 %vm3864_vm3, %v13121_v22  ;;  %v14586_v22 = vld [vmem:[#allocation10_spill] sm:$0xff] }
 0x472   : > { %10951 = vmatprep.mubr.msk.f32.mxu1 %vm3864_vm3, %v13129_v14  ;;  %v14587_v14 = vld [vmem:[#allocation11_spill] sm:$0xff] }
 0x475   : > { %10952 = vmatmul.mubr.msk.f32.gmra.mrb[50].mxu1 %vm3864_vm3, %v13141_v1  ;;  %v14590_v1 = vld [vmem:[#allocation14_spill] sm:$0xff] }
 0x476   : > { %10954 = vmatprep.mubr.msk.f32.mxu1 %vm3864_vm3, %v13149_v27  ;;  %v14591_v27 = vld [vmem:[#allocation15_spill] sm:$0xff] }
 0x479   : > { %10955 = vmatmul.mubr.msk.f32.gmra.mrb[52].mxu1 %vm3864_vm3, %v13161_v39  ;;  %v13869_v39 = vld [vmem:[%s14268_s4] ss:$0 sm:$0xff] }
 0x47a   : > { %10957 = vmatprep.mubr.msk.f32.mxu1 %vm3864_vm3, %v13169_v5  ;;  %v14593_v5 = vld [vmem:[#allocation47_spill] sm:$0xff] }
 0x47d   : > { %10958 = vmatmul.mubr.msk.f32.gmra.mrb[54].mxu1 %vm3864_vm3, %v13181_v35  ;;  %v14594_v35 = vld [vmem:[#allocation17_spill] sm:$0xff] }
 0x47e   : > { %10960 = vmatprep.mubr.msk.f32.mxu1 %vm3864_vm3, %v14519_v12 }
 0x481   : > { %10961 = vmatmul.mubr.msk.f32.gmra.mrb[56].mxu1 %vm3864_vm3, %v14522_v50  ;;  %v14601_v50 = vld [vmem:[#allocation51_spill] sm:$0xff] }
 0x482   : > { %10963 = vmatprep.mubr.msk.f32.mxu1 %vm3864_vm3, %v14523_v44 }
 0x485   : > { %10964 = vmatmul.mubr.msk.f32.gmra.mrb[58].mxu1 %vm3864_vm3, %v14526_v0  ;;  %v14602_v0 = vld [vmem:[#allocation21_spill] sm:$0xff] }
 0x486   : > { %10966 = vmatprep.mubr.msk.f32.mxu1 %vm3864_vm3, %v14581_v56 }
 0x489   : > { %10967 = vmatmul.mubr.msk.f32.gmra.mrb[60].mxu1 %vm3864_vm3, %v14582_v16 }
 0x48a   : > { %10969 = vmatprep.mubr.msk.f32.mxu1 %vm3864_vm3, %v6378_v58 }
 0x48d   : > { %10970 = vmatmul.mubr.msk.f32.gmra.mrb[62].mxu1 %vm3864_vm3, %v6379_v18 }
 0x48e   : > { %10974 = vmatprep.mubr.msk.f32.mxu1 %vm3864_vm3, %v13258_v26 }
 0x491   : > { %10975 = vmatmul.mubr.msk.f32.vlgmr.msra.gmra.mrb[32].mxu1 %vm3864_vm3, %v13268_v3 }
 0x492   : > { %11023 = vmatpush3.msra.mxu1 %v9310_v10  ;;  %10977 = vmatprep.mubr.msk.f32.mxu1 %vm3864_vm3, %v13276_v43  ;;  %v14603_v10 = vld [vmem:[#allocation52_spill] sm:$0xff] }
 0x493   : > { %11072 = vmatprep.subr.mxu1 %v9343_v21 }
 0x495   : > { %10978 = vmatmul.mubr.msk.f32.gmra.mrb[34].mxu1 %vm3864_vm3, %v13284_v41 }
 0x496   : > { %10980 = vmatprep.mubr.msk.f32.mxu1 %vm3864_vm3, %v13292_v34 }
 0x499   : > { %10981 = vmatmul.mubr.msk.f32.gmra.mrb[36].mxu1 %vm3864_vm3, %v13300_v6 }
 0x49a   : > { %10983 = vmatprep.mubr.msk.f32.mxu1 %vm3864_vm3, %v13308_v59 }
 0x49d   : > { %10984 = vmatmul.mubr.msk.f32.gmra.mrb[38].mxu1 %vm3864_vm3, %v13316_v57 }
 0x49e   : > { %10986 = vmatprep.mubr.msk.f32.mxu1 %vm3864_vm3, %v13324_v60 }
 0x4a1   : > { %10987 = vmatmul.mubr.msk.f32.gmra.mrb[40].mxu1 %vm3864_vm3, %v13332_v61  ;;  %v14597_v61 = vld [vmem:[#allocation49_spill] sm:$0xff] }
 0x4a2   : > { %10989 = vmatprep.mubr.msk.f32.mxu1 %vm3864_vm3, %v13340_v8 }
 0x4a5   : > { %10990 = vmatmul.mubr.msk.f32.gmra.mrb[42].mxu1 %vm3864_vm3, %v13348_v7  ;;  %v14600_v7 = vld [vmem:[#allocation20_spill] sm:$0xff] }
 0x4a6   : > { %10992 = vmatprep.mubr.msk.f32.mxu1 %vm3864_vm3, %v13356_v40  ;;  %v14599_v40 = vld [vmem:[#allocation50_spill] sm:$0xff] }
 0x4a9   : > { %10993 = vmatmul.mubr.msk.f32.gmra.mrb[44].mxu1 %vm3864_vm3, %v13364_v4  ;;  %v14598_v4 = vld [vmem:[#allocation19_spill] sm:$0xff] }
 0x4aa   : > { %10995 = vmatprep.mubr.msk.f32.mxu1 %vm3864_vm3, %v13798_v25 }
 0x4ad   : > { %10996 = vmatmul.mubr.msk.f32.gmra.mrb[46].mxu1 %vm3864_vm3, %v13802_v38 }
 0x4ae   : > { %10998 = vmatprep.mubr.msk.f32.mxu1 %vm3864_vm3, %v13806_v42 }
 0x4b1   : > { %10999 = vmatmul.mubr.msk.f32.gmra.mrb[48].mxu1 %vm3864_vm3, %v13112_v53  ;;  %v14585_v53 = vld [vmem:[#allocation35_spill] sm:$0xff] }
 0x4b2   : > { %11001 = vmatprep.mubr.msk.f32.mxu1 %vm3864_vm3, %v13131_v15  ;;  %v14588_v15 = vld [vmem:[#allocation12_spill] sm:$0xff] }
 0x4b5   : > { %11002 = vmatmul.mubr.msk.f32.gmra.mrb[50].mxu1 %vm3864_vm3, %v13133_v17  ;;  %v14589_v17 = vld [vmem:[#allocation13_spill] sm:$0xff] }
 0x4b6   : > { %11004 = vmatprep.mubr.msk.f32.mxu1 %vm3864_vm3, %v13151_v31  ;;  %v14592_v31 = vld [vmem:[#allocation16_spill] sm:$0xff] }
 0x4b9   : > { %11005 = vmatmul.mubr.msk.f32.gmra.mrb[52].mxu1 %vm3864_vm3, %v13153_v32 }
 0x4ba   : > { %11007 = vmatprep.mubr.msk.f32.mxu1 %vm3864_vm3, %v13171_v30 }
 0x4bd   : > { %11008 = vmatmul.mubr.msk.f32.gmra.mrb[54].mxu1 %vm3864_vm3, %v13173_v33 }
 0x4be   : > { %11010 = vmatprep.mubr.msk.f32.mxu1 %vm3864_vm3, %v13190_v23  ;;  %v14595_v23 = vld [vmem:[#allocation48_spill] sm:$0xff] }
 0x4c1   : > { %11011 = vmatmul.mubr.msk.f32.gmra.mrb[56].mxu1 %vm3864_vm3, %v13192_v45 }
 0x4c2   : > { %11013 = vmatprep.mubr.msk.f32.mxu1 %vm3864_vm3, %v13207_v49  ;;  %v14596_v49 = vld [vmem:[#allocation18_spill] sm:$0xff] }
 0x4c5   : > { %11014 = vmatmul.mubr.msk.f32.gmra.mrb[58].mxu1 %vm3864_vm3, %v13209_v54 }
 0x4c6   : > { %11016 = vmatprep.mubr.msk.f32.mxu1 %vm3864_vm3, %v14583_v2 }
 0x4c9   : > { %11017 = vmatmul.mubr.msk.f32.gmra.mrb[60].mxu1 %vm3864_vm3, %v14584_v9  ;;  %v14606_v9 = vld [vmem:[#allocation24_spill] sm:$0xff] }
 0x4ca   : > { %11019 = vmatprep.mubr.msk.f32.mxu1 %vm3864_vm3, %v6345_v28 }
 0x4cd   : > { %11020 = vmatmul.mubr.msk.f32.gmra.mrb[62].mxu1 %vm3864_vm3, %v6346_v13 }
 0x4ce   : > { %11024 = vmatprep.mubr.msk.f32.mxu1 %vm3864_vm3, %v14533_v55 }
 0x4d1   : > { %11025 = vmatmul.mubr.msk.f32.vlgmr.msra.gmra.mrb[32].mxu1 %vm3864_vm3, %v14536_v52 }
 0x4d2   : > { %11073 = vmatpush3.msra.mxu1 %v9343_v21  ;;  %11027 = vmatprep.mubr.msk.f32.mxu1 %vm3864_vm3, %v14537_v62  ;;  %v14604_v62 = vld [vmem:[#allocation22_spill] sm:$0xff]  ;;  %v14605_v21 = vld [vmem:[#allocation53_spill] sm:$0xff] }
 0x4d3   : > { %11122 = vmatprep.subr.mxu1 %v13843_v51 }
 0x4d5   : > { %11028 = vmatmul.mubr.msk.f32.gmra.mrb[34].mxu1 %vm3864_vm3, %v14585_v53  ;;  %v14607_v53 = vld [vmem:[#allocation54_spill] sm:$0xff] }
 0x4d6   : > { %11030 = vmatprep.mubr.msk.f32.mxu1 %vm3864_vm3, %v14586_v22 }
 0x4d9   : > { %11031 = vmatmul.mubr.msk.f32.gmra.mrb[36].mxu1 %vm3864_vm3, %v14587_v14  ;;  %v14608_v14 = vld [vmem:[#allocation26_spill] sm:$0xff] }
 0x4da   : > { %11033 = vmatprep.mubr.msk.f32.mxu1 %vm3864_vm3, %v14588_v15 }
 0x4dd   : > { %11034 = vmatmul.mubr.msk.f32.gmra.mrb[38].mxu1 %vm3864_vm3, %v14589_v17 }
 0x4de   : > { %11036 = vmatprep.mubr.msk.f32.mxu1 %vm3864_vm3, %v14590_v1 }
 0x4e1   : > { %11037 = vmatmul.mubr.msk.f32.gmra.mrb[40].mxu1 %vm3864_vm3, %v14591_v27 }
 0x4e2   : > { %11039 = vmatprep.mubr.msk.f32.mxu1 %vm3864_vm3, %v14592_v31  ;;  %v14609_v31 = vld [vmem:[#allocation55_spill] sm:$0xff] }
 0x4e4   : > { %v10876_v32 = vpop.f32.mrb[16].mxu1 }
 0x4e5   : > { %v11224_v30 = vadd.f32 %v10876_v32, %v14593_v5  ;;  %v6020_v33 = vpop.f32.mrb[17].mxu1  ;;  %11040 = vmatmul.mubr.msk.f32.gmra.mrb[42].mxu1 %vm3864_vm3, %v14594_v35 }
 0x4e6   : > { %v11225_v45 = vadd.f32 %v6020_v33, %v14595_v23  ;;  %11042 = vmatprep.mubr.msk.f32.mxu1 %vm3864_vm3, %v14596_v49  ;;  %v14610_v33 = vld [vmem:[#allocation56_spill] sm:$0xff] }
 0x4e7   : > { %v6219_v54 = vadd.f32 %v11224_v30, %v13869_v39 }
 0x4e8   : > { %v6218_v57 = vadd.f32 %v11225_v45, %v13869_v39  ;;  %v10879_v59 = vpop.f32.mrb[18].mxu1 }
 0x4e9   : > { %v6251_v60 = vmax.f32 %v6219_v54, 0.0  ;;  %v11226_v26 = vadd.f32 %v10879_v59, %v14597_v61  ;;  %v6030_v3 = vpop.f32.mrb[19].mxu1  ;;  %11043 = vmatmul.mubr.msk.f32.gmra.mrb[44].mxu1 %vm3864_vm3, %v14598_v4  ;;  %v14612_v61 = vld [vmem:[#allocation58_spill] sm:$0xff] }
 0x4ea   : > { %v6250_v43 = vmax.f32 %v6218_v57, 0.0  ;;  %v11227_v41 = vadd.f32 %v6030_v3, %v14599_v40  ;;  %11045 = vmatprep.mubr.msk.f32.mxu1 %vm3864_vm3, %v14600_v7  ;;  %v14611_v57 = vld [vmem:[#allocation57_spill] sm:$0xff]  ;;  %v14613_v40 = vld [vmem:[#allocation59_spill] sm:$0xff] }
 0x4eb   : > { %6283 = vst.msk [vmem:[%s13882_s25 + $0x8] sm:$0xff] %vm3864_vm3, %v6251_v60  ;;  %v6221_v34 = vadd.f32 %v11226_v26, %v13869_v39 }
 0x4ec   : > { %6282 = vst.msk [vmem:[%s13882_s25] sm:$0xff] %vm3864_vm3, %v6250_v43  ;;  %v6220_v8 = vadd.f32 %v11227_v41, %v13869_v39  ;;  %v10882_v6 = vpop.f32.mrb[20].mxu1 }
 0x4ed   : > { %v6253_v12 = vmax.f32 %v6221_v34, 0.0  ;;  %v11228_v44 = vadd.f32 %v10882_v6, %v14601_v50  ;;  %v6040_v55 = vpop.f32.mrb[21].mxu1  ;;  %11046 = vmatmul.mubr.msk.f32.gmra.mrb[46].mxu1 %vm3864_vm3, %v14602_v0  ;;  %v14614_v34 = vld [vmem:[#allocation60_spill] sm:$0xff] }
 0x4ee   : > { %v6252_v37 = vmax.f32 %v6220_v8, 0.0  ;;  %v11229_v52 = vadd.f32 %v6040_v55, %v14603_v10  ;;  %11048 = vmatprep.mubr.msk.f32.mxu1 %vm3864_vm3, %v14604_v62  ;;  %v14615_v8 = vld [vmem:[#allocation38_spill] sm:$0xff]  ;;  %v14616_v55 = vld [vmem:[#allocation29_spill] sm:$0xff] }
 0x4ef   : > { %6285 = vst.msk [vmem:[%s13882_s25 + $0x28] sm:$0xff] %vm3864_vm3, %v6253_v12  ;;  %v6223_v56 = vadd.f32 %v11228_v44, %v13869_v39 }
 0x4f0   : > { %6284 = vst.msk [vmem:[%s13882_s25 + $0x20] sm:$0xff] %vm3864_vm3, %v6252_v37  ;;  %v6222_v58 = vadd.f32 %v11229_v52, %v13869_v39  ;;  %v10885_v16 = vpop.f32.mrb[22].mxu1  ;;  %v14617_v37 = vld [vmem:[#allocation39_spill] sm:$0xff] }
 0x4f1   : > { %v6255_v18 = vmax.f32 %v6223_v56, 0.0  ;;  %v11230_v2 = vadd.f32 %v10885_v16, %v14605_v21  ;;  %v6050_v28 = vpop.f32.mrb[23].mxu1  ;;  %11049 = vmatmul.mubr.msk.f32.gmra.mrb[48].mxu1 %vm3864_vm3, %v14606_v9  ;;  %v14618_v52 = vld [vmem:[#allocation31_spill] sm:$0xff] }
 0x4f2   : > { %v6254_v13 = vmax.f32 %v6222_v58, 0.0  ;;  %v11231_v22 = vadd.f32 %v6050_v28, %v14607_v53  ;;  %11051 = vmatprep.mubr.msk.f32.mxu1 %vm3864_vm3, %v14608_v14  ;;  %v14620_v53 = vld [vmem:[#allocation41_spill] sm:$0xff] }
 0x4f3   : > { %6287 = vst.msk [vmem:[%s13882_s25 + $0x48] sm:$0xff] %vm3864_vm3, %v6255_v18  ;;  %v6225_v15 = vadd.f32 %v11230_v2, %v13869_v39  ;;  %v13969_v18 = vld [vmem:[#allocation3 + $0x172] sm:$0xff] }
 0x4f4   : > { %6286 = vst.msk [vmem:[%s13882_s25 + $0x40] sm:$0xff] %vm3864_vm3, %v6254_v13  ;;  %v6224_v17 = vadd.f32 %v11231_v22, %v13869_v39  ;;  %v10888_v1 = vpop.f32.mrb[24].mxu1  ;;  %v14619_v2 = vld [vmem:[#allocation40_spill] sm:$0xff] }
 0x4f5   : > { %v6257_v27 = vmax.f32 %v6225_v15, 0.0  ;;  %v11232_v32 = vadd.f32 %v10888_v1, %v14609_v31  ;;  %v6060_v5 = vpop.f32.mrb[25].mxu1  ;;  %11052 = vmatmul.mubr.msk.f32.gmra.mrb[50].mxu1 %vm3864_vm3, %v14572_v29  ;;  %v7054_v15 = vld [vmem:[#allocation3 + $0x19a] sm:$0xff] }
 0x4f6   : > { %v6256_v30 = vmax.f32 %v6224_v17, 0.0  ;;  %v11233_v35 = vadd.f32 %v6060_v5, %v14610_v33  ;;  %11054 = vmatprep.mubr.msk.f32.mxu1 %vm3864_vm3, %v14573_v63 }
 0x4f7   : > { %6289 = vst.msk [vmem:[%s13882_s25 + $0x68] sm:$0xff] %vm3864_vm3, %v6257_v27  ;;  %v6227_v23 = vadd.f32 %v11232_v32, %v13869_v39  ;;  %v13985_v27 = vld [vmem:[#allocation3 + $0x18a] sm:$0xff] }
 0x4f8   : > { %6288 = vst.msk [vmem:[%s13882_s25 + $0x60] sm:$0xff] %vm3864_vm3, %v6256_v30  ;;  %v6226_v45 = vadd.f32 %v11233_v35, %v13869_v39  ;;  %v10891_v49 = vpop.f32.mrb[26].mxu1  ;;  %v14621_v32 = vld [vmem:[#allocation8_spill] sm:$0xff]  ;;  %v14622_v35 = vld [vmem:[#allocation42_spill] sm:$0xff] }
 0x4f9   : > { %v6259_v54 = vmax.f32 %v6227_v23, 0.0  ;;  %v11234_v29 = vadd.f32 %v10891_v49, %v14611_v57  ;;  %v6070_v59 = vpop.f32.mrb[27].mxu1  ;;  %11055 = vmatmul.mubr.msk.f32.gmra.mrb[52].mxu1 %vm3864_vm3, %v14576_v46 }
 0x4fa   : > { %v6258_v60 = vmax.f32 %v6226_v45, 0.0  ;;  %v11235_v63 = vadd.f32 %v6070_v59, %v14612_v61  ;;  %11057 = vmatprep.mubr.msk.f32.mxu1 %vm3864_vm3, %v14577_v24  ;;  %v7055_v45 = vld [vmem:[#allocation3 + $0x1a2] sm:$0xff]  ;;  %v14623_v59 = vld [vmem:[#allocation9_spill] sm:$0xff] }
 0x4fb   : > { %6291 = vst.msk [vmem:[%s13882_s25 + $0x88] sm:$0xff] %vm3864_vm3, %v6259_v54  ;;  %v6229_v26 = vadd.f32 %v11234_v29, %v13869_v39 }
 0x4fc   : > { %6290 = vst.msk [vmem:[%s13882_s25 + $0x80] sm:$0xff] %vm3864_vm3, %v6258_v60  ;;  %v6228_v3 = vadd.f32 %v11235_v63, %v13869_v39  ;;  %v10894_v4 = vpop.f32.mrb[28].mxu1  ;;  %v7411_v63 = vld [vmem:[#allocation3 + $0x18] sm:$0xff] }
 0x4fd   : > { %v6261_v43 = vmax.f32 %v6229_v26, 0.0  ;;  %v11236_v46 = vadd.f32 %v10894_v4, %v14613_v40  ;;  %v6080_v41 = vpop.f32.mrb[29].mxu1  ;;  %11058 = vmatmul.mubr.msk.f32.gmra.mrb[54].mxu1 %vm3864_vm3, %v14578_v36 }
 0x4fe   : > { %v6260_v7 = vmax.f32 %v6228_v3, 0.0  ;;  %v11237_v24 = vadd.f32 %v6080_v41, %v14614_v34  ;;  %11060 = vmatprep.mubr.msk.f32.mxu1 %vm3864_vm3, %v14615_v8  ;;  %v14624_v3 = vld [vmem:[#allocation23_spill] sm:$0xff]  ;;  %v7412_v41 = vld [vmem:[#allocation3 + $0x20] sm:$0xff] }
 0x4ff   : > { %6293 = vst.msk [vmem:[%s13882_s25 + $0xa8] sm:$0xff] %vm3864_vm3, %v6261_v43  ;;  %v6231_v6 = vadd.f32 %v11236_v46, %v13869_v39 }
 0x500   : > { %6292 = vst.msk [vmem:[%s13882_s25 + $0xa0] sm:$0xff] %vm3864_vm3, %v6260_v7  ;;  %v6230_v12 = vadd.f32 %v11237_v24, %v13869_v39  ;;  %v10897_v50 = vpop.f32.mrb[30].mxu1  ;;  %v14011_v7 = vld [vmem:[%s14267_s3 + $0x40] sm:$0xff]  ;;  %v14625_v24 = vld [vmem:[#allocation25_spill] sm:$0xff] }
 0x501   : > { %v6263_v44 = vmax.f32 %v6231_v6, 0.0  ;;  %v11238_v36 = vadd.f32 %v10897_v50, %v14616_v55  ;;  %v6090_v0 = vpop.f32.mrb[31].mxu1  ;;  %11061 = vmatmul.mubr.msk.f32.gmra.mrb[56].mxu1 %vm3864_vm3, %v14617_v37 }
 0x502   : > { %v6262_v10 = vmax.f32 %v6230_v12, 0.0  ;;  %v11239_v62 = vadd.f32 %v6090_v0, %v14618_v52  ;;  %11063 = vmatprep.mubr.msk.f32.mxu1 %vm3864_vm3, %v13420_v20  ;;  %v13974_v20 = vld [vmem:[#allocation3 + $0x182] sm:$0xff]  ;;  %v7413_v12 = vld [vmem:[#allocation3 + $0x30] sm:$0xff] }
 0x503   : > { %6295 = vst.msk [vmem:[%s13882_s25 + $0xc8] sm:$0xff] %vm3864_vm3, %v6263_v44  ;;  %v6233_v56 = vadd.f32 %v11238_v36, %v13869_v39  ;;  %v14626_v44 = vld [vmem:[#allocation43_spill] sm:$0xff] }
 0x504   : > { %6294 = vst.msk [vmem:[%s13882_s25 + $0xc0] sm:$0xff] %vm3864_vm3, %v6262_v10  ;;  %v6232_v58 = vadd.f32 %v11239_v62, %v13869_v39  ;;  %v10900_v16 = vpop.f32.mrb[0].mxu1  ;;  %v7414_v10 = vld [vmem:[#allocation3 + $0x38] sm:$0xff]  ;;  %v14627_v62 = vld [vmem:[#allocation4_spill] sm:$0xff] }
 0x505   : > { %v6265_v21 = vmax.f32 %v6233_v56, 0.0  ;;  %v11240_v28 = vadd.f32 %v10900_v16, %v14619_v2  ;;  %v6100_v9 = vpop.f32.mrb[1].mxu1  ;;  %11064 = vmatmul.mubr.msk.f32.gmra.mrb[58].mxu1 %vm3864_vm3, %v13969_v18 }
 0x506   : > { %v6264_v13 = vmax.f32 %v6232_v58, 0.0  ;;  %v11241_v22 = vadd.f32 %v6100_v9, %v14620_v53  ;;  %11066 = vmatprep.mubr.msk.f32.mxu1 %vm3864_vm3, %v13974_v20  ;;  %v7415_v58 = vld [vmem:[#allocation3 + $0x48] sm:$0xff]  ;;  %v7416_v53 = vld [vmem:[#allocation3 + $0x50] sm:$0xff] }
 0x507   : > { %6297 = vst.msk [vmem:[%s13882_s25 + $0xe8] sm:$0xff] %vm3864_vm3, %v6265_v21  ;;  %v6235_v14 = vadd.f32 %v11240_v28, %v13869_v39  ;;  %v14628_v21 = vld [vmem:[#allocation44_spill] sm:$0xff] }
 0x508   : > { %6296 = vst.msk [vmem:[%s13882_s25 + $0xe0] sm:$0xff] %vm3864_vm3, %v6264_v13  ;;  %v6234_v17 = vadd.f32 %v11241_v22, %v13869_v39  ;;  %v10903_v1 = vpop.f32.mrb[2].mxu1 }
 0x509   : > { %v6267_v31 = vmax.f32 %v6235_v14, 0.0  ;;  %v11242_v5 = vadd.f32 %v10903_v1, %v14621_v32  ;;  %v6110_v30 = vpop.f32.mrb[3].mxu1  ;;  %11067 = vmatmul.mubr.msk.f32.gmra.mrb[60].mxu1 %vm3864_vm3, %v13985_v27  ;;  %v14629_v14 = vld [vmem:[#allocation5_spill] sm:$0xff]  ;;  %v7417_v1 = vld [vmem:[#allocation3 + $0x60] sm:$0xff] }
 0x50a   : > { %v6266_v33 = vmax.f32 %v6234_v17, 0.0  ;;  %v11243_v23 = vadd.f32 %v6110_v30, %v14622_v35  ;;  %11069 = vmatprep.mubr.msk.f32.mxu1 %vm3864_vm3, %v7054_v15  ;;  %v14630_v32 = vld [vmem:[#allocation6_spill] sm:$0xff] }
 0x50b   : > { %6299 = vst.msk [vmem:[%s13882_s25 + $0x108] sm:$0xff] %vm3864_vm3, %v6267_v31  ;;  %v6237_v49 = vadd.f32 %v11242_v5, %v13869_v39 }
 0x50c   : > { %6298 = vst.msk [vmem:[%s13882_s25 + $0x100] sm:$0xff] %vm3864_vm3, %v6266_v33  ;;  %v6236_v54 = vadd.f32 %v11243_v23, %v13869_v39  ;;  %v10906_v57 = vpop.f32.mrb[4].mxu1  ;;  %v7418_v23 = vld [vmem:[#allocation3 + $0x68] sm:$0xff] }
 0x50d   : > { %v6269_v29 = vmax.f32 %v6237_v49, 0.0  ;;  %v11244_v60 = vadd.f32 %v10906_v57, %v14623_v59  ;;  %v6120_v61 = vpop.f32.mrb[5].mxu1  ;;  %11070 = vmatmul.mubr.msk.f32.gmra.mrb[62].mxu1 %vm3864_vm3, %v7055_v45  ;;  %v14631_v49 = vld [vmem:[#allocation7_spill] sm:$0xff] }
 0x50e   : > { %v6268_v26 = vmax.f32 %v6236_v54, 0.0  ;;  %v11245_v4 = vadd.f32 %v6120_v61, %v14624_v3  ;;  %11074 = vmatprep.mubr.msk.f32.mxu1 %vm3864_vm3, %v7411_v63 }
 0x50f   : > { %6301 = vst.msk [vmem:[%s13882_s25 + $0x128] sm:$0xff] %vm3864_vm3, %v6269_v29  ;;  %v6239_v43 = vadd.f32 %v11244_v60, %v13869_v39  ;;  %v7419_v29 = vld [vmem:[#allocation3 + $0x78] sm:$0xff]  ;;  %v14632_v60 = vld [vmem:[#allocation34_spill] sm:$0xff] }
 0x510   : > { %6300 = vst.msk [vmem:[%s13882_s25 + $0x120] sm:$0xff] %vm3864_vm3, %v6268_v26  ;;  %v6238_v40 = vadd.f32 %v11245_v4, %v13869_v39  ;;  %v10909_v46 = vpop.f32.mrb[6].mxu1  ;;  %v7420_v4 = vld [vmem:[#allocation3 + $0x80] sm:$0xff] }
 0x511   : > { %v6271_v34 = vmax.f32 %v6239_v43, 0.0  ;;  %v11246_v8 = vadd.f32 %v10909_v46, %v14625_v24  ;;  %v6130_v6 = vpop.f32.mrb[7].mxu1  ;;  %11075 = vmatmul.mubr.msk.f32.vlgmr.msra.gmra.mrb[32].mxu1 %vm3864_vm3, %v7412_v41 }
 0x512   : > { %v6270_v50 = vmax.f32 %v6238_v40, 0.0  ;;  %v11247_v55 = vadd.f32 %v6130_v6, %v14626_v44  ;;  %11123 = vmatpush3.msra.mxu1 %v13843_v51  ;;  %11077 = vmatprep.mubr.msk.f32.mxu1 %vm3864_vm3, %v7413_v12  ;;  %v14633_v40 = vld [vmem:[#allocation45_spill] sm:$0xff] }
 0x513   : > { %6303 = vst.msk [vmem:[%s13882_s25 + $0x148] sm:$0xff] %vm3864_vm3, %v6271_v34  ;;  %v6241_v36 = vadd.f32 %v11246_v8, %v13869_v39  ;;  %11172 = vmatprep.subr.mxu1 %v14011_v7  ;;  %v7421_v34 = vld [vmem:[#allocation3 + $0x90] sm:$0xff]  ;;  %v14634_v8 = vld [vmem:[#allocation46_spill] sm:$0xff]  ;;  %v7422_v44 = vld [vmem:[#allocation3 + $0x98] sm:$0xff] }
 0x514   : > { %6302 = vst.msk [vmem:[%s13882_s25 + $0x140] sm:$0xff] %vm3864_vm3, %v6270_v50  ;;  %v6240_v0 = vadd.f32 %v11247_v55, %v13869_v39  ;;  %v10912_v37 = vpop.f32.mrb[8].mxu1 }
 0x515   : > { %v6273_v52 = vmax.f32 %v6241_v36, 0.0  ;;  %v11248_v56 = vadd.f32 %v10912_v37, %v14627_v62  ;;  %v6140_v51 = vpop.f32.mrb[9].mxu1  ;;  %11078 = vmatmul.mubr.msk.f32.gmra.mrb[34].mxu1 %vm3864_vm3, %v7414_v10  ;;  %v7423_v36 = vld [vmem:[#allocation3 + $0xa8] sm:$0xff]  ;;  %v7424_v37 = vld [vmem:[#allocation3 + $0xb0] sm:$0xff]  ;;  %v7425_v10 = vld [vmem:[#allocation3 + $0xc0] sm:$0xff] }
 0x516   : > { %v6272_v16 = vmax.f32 %v6240_v0, 0.0  ;;  %v11249_v2 = vadd.f32 %v6140_v51, %v14628_v21  ;;  %11080 = vmatprep.mubr.msk.f32.mxu1 %vm3864_vm3, %v7415_v58  ;;  %v7430_v62 = vld [vmem:[#allocation3 + $0xf8] sm:$0xff]  ;;  %v7432_v51 = vld [vmem:[#allocation3 + $0x110] sm:$0xff]  ;;  %v7433_v58 = vld [vmem:[#allocation3 + $0x120] sm:$0xff] }
 0x517   : > { %6305 = vst.msk [vmem:[%s13882_s25 + $0x168] sm:$0xff] %vm3864_vm3, %v6273_v52  ;;  %v6243_v28 = vadd.f32 %v11248_v56, %v13869_v39  ;;  %v7426_v52 = vld [vmem:[#allocation3 + $0xc8] sm:$0xff]  ;;  %v7438_v21 = vld [vmem:[#allocation3 + $0x158] sm:$0xff] }
 0x518   : > { %6304 = vst.msk [vmem:[%s13882_s25 + $0x160] sm:$0xff] %vm3864_vm3, %v6272_v16  ;;  %v6242_v9 = vadd.f32 %v11249_v2, %v13869_v39  ;;  %v10915_v13 = vpop.f32.mrb[10].mxu1  ;;  %v7431_v56 = vld [vmem:[#allocation3 + $0x108] sm:$0xff] }
 0x519   : > { %v6275_v22 = vmax.f32 %v6243_v28, 0.0  ;;  %v11250_v15 = vadd.f32 %v10915_v13, %v14629_v14  ;;  %v6150_v17 = vpop.f32.mrb[11].mxu1  ;;  %11081 = vmatmul.mubr.msk.f32.gmra.mrb[36].mxu1 %vm3864_vm3, %v7416_v53  ;;  %v7434_v16 = vld [vmem:[#allocation3 + $0x128] sm:$0xff]  ;;  %v7440_v28 = vld [vmem:[#allocation3 + $0x170] sm:$0xff]  ;;  %v7798_v53 = vld [vmem:[#allocation3 + $0x19] sm:$0xff] }
 0x51a   : > { %v6274_v31 = vmax.f32 %v6242_v9, 0.0  ;;  %v11251_v5 = vadd.f32 %v6150_v17, %v14630_v32  ;;  %11083 = vmatprep.mubr.msk.f32.mxu1 %vm3864_vm3, %v7417_v1  ;;  %v7439_v2 = vld [vmem:[#allocation3 + $0x168] sm:$0xff]  ;;  %v7441_v9 = vld [vmem:[#allocation3 + $0x180] sm:$0xff] }
 0x51b   : > { %6307 = vst.msk [vmem:[%s13882_s25 + $0x188] sm:$0xff] %vm3864_vm3, %v6275_v22  ;;  %v6245_v30 = vadd.f32 %v11250_v15, %v13869_v39  ;;  %v7442_v13 = vld [vmem:[#allocation3 + $0x188] sm:$0xff]  ;;  %v7806_v17 = vld [vmem:[#allocation3 + $0x79] sm:$0xff] }
 0x51c   : > { %6306 = vst.msk [vmem:[%s13882_s25 + $0x180] sm:$0xff] %vm3864_vm3, %v6274_v31  ;;  %v6244_v33 = vadd.f32 %v11251_v5, %v13869_v39  ;;  %v10918_v35 = vpop.f32.mrb[12].mxu1  ;;  %v7799_v22 = vld [vmem:[#allocation3 + $0x21] sm:$0xff]  ;;  %v7805_v15 = vld [vmem:[#allocation3 + $0x69] sm:$0xff]  ;;  %v7814_v32 = vld [vmem:[#allocation3 + $0xd9] sm:$0xff] }
 0x51d   : > { %v6277_v45 = vmax.f32 %v6245_v30, 0.0  ;;  %v11252_v54 = vadd.f32 %v10918_v35, %v14631_v49  ;;  %v6160_v57 = vpop.f32.mrb[13].mxu1  ;;  %11084 = vmatmul.mubr.msk.f32.gmra.mrb[38].mxu1 %vm3864_vm3, %v7418_v23  ;;  %v7804_v14 = vld [vmem:[#allocation3 + $0x61] sm:$0xff]  ;;  %v7813_v31 = vld [vmem:[#allocation3 + $0xc9] sm:$0xff]  ;;  %v7816_v30 = vld [vmem:[#allocation3 + $0xf1] sm:$0xff] }
 0x51e   : > { %v6276_v59 = vmax.f32 %v6244_v33, 0.0  ;;  %v11253_v61 = vadd.f32 %v6160_v57, %v14632_v60  ;;  %11086 = vmatprep.mubr.msk.f32.mxu1 %vm3864_vm3, %v7419_v29  ;;  %v7812_v1 = vld [vmem:[#allocation3 + $0xc1] sm:$0xff]  ;;  %v7817_v33 = vld [vmem:[#allocation3 + $0xf9] sm:$0xff]  ;;  %v7818_v35 = vld [vmem:[#allocation3 + $0x109] sm:$0xff] }
 0x51f   : > { %6309 = vst.msk [vmem:[%s13882_s25 + $0x1a8] sm:$0xff] %vm3864_vm3, %v6277_v45  ;;  %v6247_v63 = vadd.f32 %v11252_v54, %v13869_v39  ;;  %v7815_v5 = vld [vmem:[#allocation3 + $0xe1] sm:$0xff]  ;;  %v7819_v23 = vld [vmem:[#allocation3 + $0x111] sm:$0xff]  ;;  %v7821_v49 = vld [vmem:[#allocation3 + $0x129] sm:$0xff] }
 0x520   : > { %6308 = vst.msk [vmem:[%s13882_s25 + $0x1a0] sm:$0xff] %vm3864_vm3, %v6276_v59  ;;  %v6246_v26 = vadd.f32 %v11253_v61, %v13869_v39  ;;  %v10921_v3 = vpop.f32.mrb[14].mxu1  ;;  %v7820_v45 = vld [vmem:[#allocation3 + $0x121] sm:$0xff]  ;;  %v7822_v54 = vld [vmem:[#allocation3 + $0x139] sm:$0xff]  ;;  %v7824_v29 = vld [vmem:[#allocation3 + $0x151] sm:$0xff] }
 0x521   : > { %v6279_v43 = vmax.f32 %v6247_v63, 0.0  ;;  %v11254_v46 = vadd.f32 %v10921_v3, %v14633_v40  ;;  %v6170_v41 = vpop.f32.mrb[15].mxu1  ;;  %11087 = vmatmul.mubr.msk.f32.gmra.mrb[40].mxu1 %vm3864_vm3, %v7420_v4  ;;  %v7823_v57 = vld [vmem:[#allocation3 + $0x141] sm:$0xff]  ;;  %v7825_v59 = vld [vmem:[#allocation3 + $0x159] sm:$0xff]  ;;  %v7826_v60 = vld [vmem:[#allocation3 + $0x169] sm:$0xff] }
 0x522   : > { %v6278_v24 = vmax.f32 %v6246_v26, 0.0  ;;  %v11255_v6 = vadd.f32 %v6170_v41, %v14634_v8  ;;  %11089 = vmatprep.mubr.msk.f32.mxu1 %vm3864_vm3, %v7421_v34  ;;  %v7827_v61 = vld [vmem:[#allocation3 + $0x171] sm:$0xff]  ;;  %v7828_v63 = vld [vmem:[#allocation3 + $0x181] sm:$0xff]  ;;  %v7829_v26 = vld [vmem:[#allocation3 + $0x189] sm:$0xff] }
 0x523   : > { %6311 = vst.msk [vmem:[%s13882_s25 + $0x1c8] sm:$0xff] %vm3864_vm3, %v6279_v43  ;;  %v6249_v12 = vadd.f32 %v11254_v46, %v13869_v39  ;;  %v8185_v3 = vld [vmem:[#allocation3 + $0x1a] sm:$0xff]  ;;  %v8186_v4 = vld [vmem:[#allocation3 + $0x22] sm:$0xff]  ;;  %v8187_v43 = vld [vmem:[#allocation3 + $0x32] sm:$0xff] }
 0x524   : > { %6310 = vst.msk [vmem:[%s13882_s25 + $0x1c0] sm:$0xff] %vm3864_vm3, %v6278_v24  ;;  %v6248_v50 = vadd.f32 %v11255_v6, %v13869_v39  ;;  %v8188_v40 = vld [vmem:[#allocation3 + $0x3a] sm:$0xff]  ;;  %v8189_v46 = vld [vmem:[#allocation3 + $0x4a] sm:$0xff]  ;;  %v8190_v41 = vld [vmem:[#allocation3 + $0x52] sm:$0xff] }
 0x525   : > { %v6281_v55 = vmax.f32 %v6249_v12, 0.0  ;;  %11090 = vmatmul.mubr.msk.f32.gmra.mrb[42].mxu1 %vm3864_vm3, %v7422_v44  ;;  %v8191_v34 = vld [vmem:[#allocation3 + $0x62] sm:$0xff]  ;;  %v8192_v24 = vld [vmem:[#allocation3 + $0x6a] sm:$0xff]  ;;  %v8193_v8 = vld [vmem:[#allocation3 + $0x7a] sm:$0xff] }
 0x526   : > { %v6280_v0 = vmax.f32 %v6248_v50, 0.0  ;;  %11092 = vmatprep.mubr.msk.f32.mxu1 %vm3864_vm3, %v7423_v36  ;;  %v8194_v6 = vld [vmem:[#allocation3 + $0x82] sm:$0xff]  ;;  %v8195_v12 = vld [vmem:[#allocation3 + $0x92] sm:$0xff]  ;;  %v8196_v50 = vld [vmem:[#allocation3 + $0x9a] sm:$0xff] }
 0x527   : > { %6313 = vst.msk [vmem:[%s13882_s25 + $0x1e8] sm:$0xff] %vm3864_vm3, %v6281_v55  ;;  %v8197_v44 = vld [vmem:[#allocation3 + $0xaa] sm:$0xff]  ;;  %v8198_v55 = vld [vmem:[#allocation3 + $0xb2] sm:$0xff]  ;;  %v8199_v36 = vld [vmem:[#allocation3 + $0xc2] sm:$0xff] }
 0x528   : > { %6312 = vst.msk [vmem:[%s13882_s25 + $0x1e0] sm:$0xff] %vm3864_vm3, %v6280_v0  ;;  %v8200_v0 = vld [vmem:[#allocation3 + $0xca] sm:$0xff] }
 0x529   : > { %11093 = vmatmul.mubr.msk.f32.gmra.mrb[44].mxu1 %vm3864_vm3, %v7424_v37  ;;  %v8201_v37 = vld [vmem:[#allocation3 + $0xda] sm:$0xff] }
 0x52a   : > { %11095 = vmatprep.mubr.msk.f32.mxu1 %vm3864_vm3, %v7425_v10  ;;  %v8202_v10 = vld [vmem:[#allocation3 + $0xe2] sm:$0xff] }
 0x52d   : > { %11096 = vmatmul.mubr.msk.f32.gmra.mrb[46].mxu1 %vm3864_vm3, %v7426_v52  ;;  %v8203_v52 = vld [vmem:[#allocation3 + $0xf2] sm:$0xff] }
 0x52e   : > { %11098 = vmatprep.mubr.msk.f32.mxu1 %vm3864_vm3, %v13798_v25  ;;  %v7435_v25 = vld [vmem:[#allocation3 + $0x138] sm:$0xff] }
 0x531   : > { %11099 = vmatmul.mubr.msk.f32.gmra.mrb[48].mxu1 %vm3864_vm3, %v13802_v38  ;;  %v7436_v38 = vld [vmem:[#allocation3 + $0x140] sm:$0xff] }
 0x532   : > { %11101 = vmatprep.mubr.msk.f32.mxu1 %vm3864_vm3, %v13806_v42  ;;  %v7437_v42 = vld [vmem:[#allocation3 + $0x150] sm:$0xff] }
 0x535   : > { %11102 = vmatmul.mubr.msk.f32.gmra.mrb[50].mxu1 %vm3864_vm3, %v7430_v62  ;;  %v8204_v62 = vld [vmem:[#allocation3 + $0xfa] sm:$0xff] }
 0x536   : > { %11104 = vmatprep.mubr.msk.f32.mxu1 %vm3864_vm3, %v7431_v56  ;;  %v8205_v56 = vld [vmem:[#allocation3 + $0x10a] sm:$0xff] }
 0x539   : > { %11105 = vmatmul.mubr.msk.f32.gmra.mrb[52].mxu1 %vm3864_vm3, %v7432_v51  ;;  %v8206_v51 = vld [vmem:[#allocation3 + $0x112] sm:$0xff] }
 0x53a   : > { %11107 = vmatprep.mubr.msk.f32.mxu1 %vm3864_vm3, %v7433_v58  ;;  %v8207_v58 = vld [vmem:[#allocation3 + $0x122] sm:$0xff] }
 0x53d   : > { %11108 = vmatmul.mubr.msk.f32.gmra.mrb[54].mxu1 %vm3864_vm3, %v7434_v16  ;;  %v8208_v16 = vld [vmem:[#allocation3 + $0x12a] sm:$0xff] }
 0x53e   : > { %11110 = vmatprep.mubr.msk.f32.mxu1 %vm3864_vm3, %v7435_v25  ;;  %v8209_v25 = vld [vmem:[#allocation3 + $0x13a] sm:$0xff] }
 0x541   : > { %11111 = vmatmul.mubr.msk.f32.gmra.mrb[56].mxu1 %vm3864_vm3, %v7436_v38  ;;  %v8210_v38 = vld [vmem:[#allocation3 + $0x142] sm:$0xff] }
 0x542   : > { %11113 = vmatprep.mubr.msk.f32.mxu1 %vm3864_vm3, %v7437_v42  ;;  %v8211_v42 = vld [vmem:[#allocation3 + $0x152] sm:$0xff] }
 0x545   : > { %11114 = vmatmul.mubr.msk.f32.gmra.mrb[58].mxu1 %vm3864_vm3, %v7438_v21  ;;  %v8212_v21 = vld [vmem:[#allocation3 + $0x15a] sm:$0xff] }
 0x546   : > { %11116 = vmatprep.mubr.msk.f32.mxu1 %vm3864_vm3, %v7439_v2  ;;  %v8213_v2 = vld [vmem:[#allocation3 + $0x16a] sm:$0xff] }
 0x549   : > { %11117 = vmatmul.mubr.msk.f32.gmra.mrb[60].mxu1 %vm3864_vm3, %v7440_v28 }
 0x54a   : > { %11119 = vmatprep.mubr.msk.f32.mxu1 %vm3864_vm3, %v7441_v9 }
 0x54d   : > { %11120 = vmatmul.mubr.msk.f32.gmra.mrb[62].mxu1 %vm3864_vm3, %v7442_v13 }
 0x54e   : > { %11124 = vmatprep.mubr.msk.f32.mxu1 %vm3864_vm3, %v7798_v53 }
 0x551   : > { %11125 = vmatmul.mubr.msk.f32.vlgmr.msra.gmra.mrb[32].mxu1 %vm3864_vm3, %v7799_v22 }
 0x552   : > { %11173 = vmatpush3.msra.mxu1 %v14011_v7  ;;  %11127 = vmatprep.mubr.msk.f32.mxu1 %vm3864_vm3, %v13693_v19  ;;  %v7807_v7 = vld [vmem:[#allocation3 + $0x81] sm:$0xff]  ;;  %v7808_v19 = vld [vmem:[#allocation3 + $0x91] sm:$0xff] }
 0x555   : > { %11128 = vmatmul.mubr.msk.f32.gmra.mrb[34].mxu1 %vm3864_vm3, %v13697_v11  ;;  %v7809_v11 = vld [vmem:[#allocation3 + $0x99] sm:$0xff] }
 0x556   : > { %11130 = vmatprep.mubr.msk.f32.mxu1 %vm3864_vm3, %v13704_v48  ;;  %v7810_v48 = vld [vmem:[#allocation3 + $0xa9] sm:$0xff] }
 0x559   : > { %11131 = vmatmul.mubr.msk.f32.gmra.mrb[36].mxu1 %vm3864_vm3, %v13709_v47  ;;  %v7811_v47 = vld [vmem:[#allocation3 + $0xb1] sm:$0xff] }
 0x55a   : > { %11133 = vmatprep.mubr.msk.f32.mxu1 %vm3864_vm3, %v7804_v14 }
 0x55d   : > { %11134 = vmatmul.mubr.msk.f32.gmra.mrb[38].mxu1 %vm3864_vm3, %v7805_v15 }
 0x55e   : > { %11136 = vmatprep.mubr.msk.f32.mxu1 %vm3864_vm3, %v7806_v17 }
 0x561   : > { %11137 = vmatmul.mubr.msk.f32.gmra.mrb[40].mxu1 %vm3864_vm3, %v7807_v7 }
 0x562   : > { %11139 = vmatprep.mubr.msk.f32.mxu1 %vm3864_vm3, %v7808_v19 }
 0x565   : > { %11140 = vmatmul.mubr.msk.f32.gmra.mrb[42].mxu1 %vm3864_vm3, %v7809_v11 }
 0x566   : > { %11142 = vmatprep.mubr.msk.f32.mxu1 %vm3864_vm3, %v7810_v48 }
 0x569   : > { %11143 = vmatmul.mubr.msk.f32.gmra.mrb[44].mxu1 %vm3864_vm3, %v7811_v47 }
 0x56a   : > { %11145 = vmatprep.mubr.msk.f32.mxu1 %vm3864_vm3, %v7812_v1 }
 0x56d   : > { %11146 = vmatmul.mubr.msk.f32.gmra.mrb[46].mxu1 %vm3864_vm3, %v7813_v31 }
 0x56e   : > { %11148 = vmatprep.mubr.msk.f32.mxu1 %vm3864_vm3, %v7814_v32 }
 0x571   : > { %11149 = vmatmul.mubr.msk.f32.gmra.mrb[48].mxu1 %vm3864_vm3, %v7815_v5 }
 0x572   : > { %11151 = vmatprep.mubr.msk.f32.mxu1 %vm3864_vm3, %v7816_v30 }
 0x575   : > { %11152 = vmatmul.mubr.msk.f32.gmra.mrb[50].mxu1 %vm3864_vm3, %v7817_v33 }
 0x576   : > { %11154 = vmatprep.mubr.msk.f32.mxu1 %vm3864_vm3, %v7818_v35 }
 0x579   : > { %11155 = vmatmul.mubr.msk.f32.gmra.mrb[52].mxu1 %vm3864_vm3, %v7819_v23 }
 0x57a   : > { %11157 = vmatprep.mubr.msk.f32.mxu1 %vm3864_vm3, %v7820_v45 }
 0x57d   : > { %11158 = vmatmul.mubr.msk.f32.gmra.mrb[54].mxu1 %vm3864_vm3, %v7821_v49 }
 0x57e   : > { %11160 = vmatprep.mubr.msk.f32.mxu1 %vm3864_vm3, %v7822_v54 }
 0x581   : > { %11161 = vmatmul.mubr.msk.f32.gmra.mrb[56].mxu1 %vm3864_vm3, %v7823_v57 }
 0x582   : > { %11163 = vmatprep.mubr.msk.f32.mxu1 %vm3864_vm3, %v7824_v29 }
 0x585   : > { %11164 = vmatmul.mubr.msk.f32.gmra.mrb[58].mxu1 %vm3864_vm3, %v7825_v59 }
 0x586   : > { %11166 = vmatprep.mubr.msk.f32.mxu1 %vm3864_vm3, %v7826_v60 }
 0x589   : > { %11167 = vmatmul.mubr.msk.f32.gmra.mrb[60].mxu1 %vm3864_vm3, %v7827_v61 }
 0x58a   : > { %11169 = vmatprep.mubr.msk.f32.mxu1 %vm3864_vm3, %v7828_v63 }
 0x58d   : > { %11170 = vmatmul.mubr.msk.f32.gmra.mrb[62].mxu1 %vm3864_vm3, %v7829_v26 }
 0x58e   : > { %11174 = vmatprep.mubr.msk.f32.mxu1 %vm3864_vm3, %v8185_v3 }
 0x591   : > { %11175 = vmatmul.mubr.msk.f32.vlgmr.msra.gmra.mrb[32].mxu1 %vm3864_vm3, %v8186_v4 }
 0x592   : > { %11177 = vmatprep.mubr.msk.f32.mxu1 %vm3864_vm3, %v8187_v43 }
 0x595   : > { %11178 = vmatmul.mubr.msk.f32.gmra.mrb[34].mxu1 %vm3864_vm3, %v8188_v40 }
 0x596   : > { %11180 = vmatprep.mubr.msk.f32.mxu1 %vm3864_vm3, %v8189_v46 }
 0x599   : > { %11181 = vmatmul.mubr.msk.f32.gmra.mrb[36].mxu1 %vm3864_vm3, %v8190_v41 }
 0x59a   : > { %11183 = vmatprep.mubr.msk.f32.mxu1 %vm3864_vm3, %v8191_v34 }
 0x59d   : > { %11184 = vmatmul.mubr.msk.f32.gmra.mrb[38].mxu1 %vm3864_vm3, %v8192_v24 }
 0x59e   : > { %11186 = vmatprep.mubr.msk.f32.mxu1 %vm3864_vm3, %v8193_v8 }
 0x5a1   : > { %11187 = vmatmul.mubr.msk.f32.gmra.mrb[40].mxu1 %vm3864_vm3, %v8194_v6 }
 0x5a2   : > { %11189 = vmatprep.mubr.msk.f32.mxu1 %vm3864_vm3, %v8195_v12 }
 0x5a5   : > { %11190 = vmatmul.mubr.msk.f32.gmra.mrb[42].mxu1 %vm3864_vm3, %v8196_v50 }
 0x5a6   : > { %11192 = vmatprep.mubr.msk.f32.mxu1 %vm3864_vm3, %v8197_v44 }
 0x5a9   : > { %11193 = vmatmul.mubr.msk.f32.gmra.mrb[44].mxu1 %vm3864_vm3, %v8198_v55 }
 0x5aa   : > { %11195 = vmatprep.mubr.msk.f32.mxu1 %vm3864_vm3, %v8199_v36 }
 0x5ad   : > { %11196 = vmatmul.mubr.msk.f32.gmra.mrb[46].mxu1 %vm3864_vm3, %v8200_v0 }
 0x5ae   : > { %11198 = vmatprep.mubr.msk.f32.mxu1 %vm3864_vm3, %v8201_v37 }
 0x5b1   : > { %11199 = vmatmul.mubr.msk.f32.gmra.mrb[48].mxu1 %vm3864_vm3, %v8202_v10 }
 0x5b2   : > { %11201 = vmatprep.mubr.msk.f32.mxu1 %vm3864_vm3, %v8203_v52 }
 0x5b5   : > { %11202 = vmatmul.mubr.msk.f32.gmra.mrb[50].mxu1 %vm3864_vm3, %v8204_v62 }
 0x5b6   : > { %11204 = vmatprep.mubr.msk.f32.mxu1 %vm3864_vm3, %v8205_v56 }
 0x5b9   : > { %11205 = vmatmul.mubr.msk.f32.gmra.mrb[52].mxu1 %vm3864_vm3, %v8206_v51 }
 0x5ba   : > { %11207 = vmatprep.mubr.msk.f32.mxu1 %vm3864_vm3, %v8207_v58 }
 0x5bd   : > { %11208 = vmatmul.mubr.msk.f32.gmra.mrb[54].mxu1 %vm3864_vm3, %v8208_v16 }
 0x5be   : > { %11210 = vmatprep.mubr.msk.f32.mxu1 %vm3864_vm3, %v8209_v25 }
 0x5c1   : > { %11211 = vmatmul.mubr.msk.f32.gmra.mrb[56].mxu1 %vm3864_vm3, %v8210_v38 }
 0x5c2   : > { %11213 = vmatprep.mubr.msk.f32.mxu1 %vm3864_vm3, %v8211_v42 }
 0x5c5   : > { %11214 = vmatmul.mubr.msk.f32.gmra.mrb[58].mxu1 %vm3864_vm3, %v8212_v21 }
 0x5c6   : > { %11216 = vmatprep.mubr.msk.f32.mxu1 %vm3864_vm3, %v8213_v2 }
 0x5c9   : > { %11217 = vmatmul.mubr.msk.f32.gmra.mrb[60].mxu1 %vm3864_vm3, %v13969_v18 }
 0x5ca   : > { %11219 = vmatprep.mubr.msk.f32.mxu1 %vm3864_vm3, %v13974_v20 }
 0x5cd   : > { %11220 = vmatmul.mubr.msk.f32.gmra.mrb[62].mxu1 %vm3864_vm3, %v13985_v27 }
 0x664   : > { %v11176_v28 = vpop.f32.mrb[32].mxu1 }
 0x665   : > { %v8580_v9 = vadd.f32 %v11176_v28, %v13869_v39  ;;  %v8381_v13 = vpop.f32.mrb[33].mxu1 }
 0x666   : > { %v8579_v53 = vadd.f32 %v13869_v39, %v8381_v13 }
 0x667   : > { %v8612_v22 = vmax.f32 %v8580_v9, 0.0 }
 0x668   : > { %v8611_v14 = vmax.f32 %v8579_v53, 0.0  ;;  %v11179_v15 = vpop.f32.mrb[34].mxu1 }
 0x669   : > { %9444 = vst.msk [vmem:[%s13882_s25 + $0x18] sm:$0xff] %vm3864_vm3, %v8612_v22  ;;  %v8582_v18 = vadd.f32 %v11179_v15, %v13869_v39  ;;  %v8391_v20 = vpop.f32.mrb[35].mxu1 }
 0x66a   : > { %9443 = vst.msk [vmem:[%s13882_s25 + $0x10] sm:$0xff] %vm3864_vm3, %v8611_v14  ;;  %v8581_v27 = vadd.f32 %v13869_v39, %v8391_v20 }
 0x66b   : > { %v8614_v17 = vmax.f32 %v8582_v18, 0.0 }
 0x66c   : > { %v8613_v7 = vmax.f32 %v8581_v27, 0.0  ;;  %v11182_v19 = vpop.f32.mrb[36].mxu1 }
 0x66d   : > { %9446 = vst.msk [vmem:[%s13882_s25 + $0x38] sm:$0xff] %vm3864_vm3, %v8614_v17  ;;  %v8584_v11 = vadd.f32 %v11182_v19, %v13869_v39  ;;  %v8401_v48 = vpop.f32.mrb[37].mxu1 }
 0x66e   : > { %9445 = vst.msk [vmem:[%s13882_s25 + $0x30] sm:$0xff] %vm3864_vm3, %v8613_v7  ;;  %v8583_v47 = vadd.f32 %v13869_v39, %v8401_v48 }
 0x66f   : > { %v8616_v1 = vmax.f32 %v8584_v11, 0.0 }
 0x670   : > { %v8615_v31 = vmax.f32 %v8583_v47, 0.0  ;;  %v11185_v32 = vpop.f32.mrb[38].mxu1 }
 0x671   : > { %9448 = vst.msk [vmem:[%s13882_s25 + $0x58] sm:$0xff] %vm3864_vm3, %v8616_v1  ;;  %v8586_v5 = vadd.f32 %v11185_v32, %v13869_v39  ;;  %v8411_v30 = vpop.f32.mrb[39].mxu1 }
 0x672   : > { %9447 = vst.msk [vmem:[%s13882_s25 + $0x50] sm:$0xff] %vm3864_vm3, %v8615_v31  ;;  %v8585_v33 = vadd.f32 %v13869_v39, %v8411_v30 }
 0x673   : > { %v8618_v35 = vmax.f32 %v8586_v5, 0.0 }
 0x674   : > { %v8617_v23 = vmax.f32 %v8585_v33, 0.0  ;;  %v11188_v45 = vpop.f32.mrb[40].mxu1 }
 0x675   : > { %9450 = vst.msk [vmem:[%s13882_s25 + $0x78] sm:$0xff] %vm3864_vm3, %v8618_v35  ;;  %v8588_v49 = vadd.f32 %v11188_v45, %v13869_v39  ;;  %v8421_v54 = vpop.f32.mrb[41].mxu1 }
 0x676   : > { %9449 = vst.msk [vmem:[%s13882_s25 + $0x70] sm:$0xff] %vm3864_vm3, %v8617_v23  ;;  %v8587_v57 = vadd.f32 %v13869_v39, %v8421_v54 }
 0x677   : > { %v8620_v29 = vmax.f32 %v8588_v49, 0.0 }
 0x678   : > { %v8619_v59 = vmax.f32 %v8587_v57, 0.0  ;;  %v11191_v60 = vpop.f32.mrb[42].mxu1 }
 0x679   : > { %9452 = vst.msk [vmem:[%s13882_s25 + $0x98] sm:$0xff] %vm3864_vm3, %v8620_v29  ;;  %v8590_v61 = vadd.f32 %v11191_v60, %v13869_v39  ;;  %v8431_v63 = vpop.f32.mrb[43].mxu1 }
 0x67a   : > { %9451 = vst.msk [vmem:[%s13882_s25 + $0x90] sm:$0xff] %vm3864_vm3, %v8619_v59  ;;  %v8589_v26 = vadd.f32 %v13869_v39, %v8431_v63 }
 0x67b   : > { %v8622_v3 = vmax.f32 %v8590_v61, 0.0 }
 0x67c   : > { %v8621_v4 = vmax.f32 %v8589_v26, 0.0  ;;  %v11194_v43 = vpop.f32.mrb[44].mxu1 }
 0x67d   : > { %9454 = vst.msk [vmem:[%s13882_s25 + $0xb8] sm:$0xff] %vm3864_vm3, %v8622_v3  ;;  %v8592_v40 = vadd.f32 %v11194_v43, %v13869_v39  ;;  %v8441_v46 = vpop.f32.mrb[45].mxu1 }
 0x67e   : > { %9453 = vst.msk [vmem:[%s13882_s25 + $0xb0] sm:$0xff] %vm3864_vm3, %v8621_v4  ;;  %v8591_v41 = vadd.f32 %v13869_v39, %v8441_v46 }
 0x67f   : > { %v8624_v34 = vmax.f32 %v8592_v40, 0.0 }
 0x680   : > { %v8623_v24 = vmax.f32 %v8591_v41, 0.0  ;;  %v11197_v8 = vpop.f32.mrb[46].mxu1 }
 0x681   : > { %9456 = vst.msk [vmem:[%s13882_s25 + $0xd8] sm:$0xff] %vm3864_vm3, %v8624_v34  ;;  %v8594_v6 = vadd.f32 %v11197_v8, %v13869_v39  ;;  %v8451_v12 = vpop.f32.mrb[47].mxu1 }
 0x682   : > { %9455 = vst.msk [vmem:[%s13882_s25 + $0xd0] sm:$0xff] %vm3864_vm3, %v8623_v24  ;;  %v8593_v50 = vadd.f32 %v13869_v39, %v8451_v12 }
 0x683   : > { %v8626_v44 = vmax.f32 %v8594_v6, 0.0 }
 0x684   : > { %v8625_v55 = vmax.f32 %v8593_v50, 0.0  ;;  %v11200_v36 = vpop.f32.mrb[48].mxu1 }
 0x685   : > { %9458 = vst.msk [vmem:[%s13882_s25 + $0xf8] sm:$0xff] %vm3864_vm3, %v8626_v44  ;;  %v8596_v0 = vadd.f32 %v11200_v36, %v13869_v39  ;;  %v8461_v37 = vpop.f32.mrb[49].mxu1 }
 0x686   : > { %9457 = vst.msk [vmem:[%s13882_s25 + $0xf0] sm:$0xff] %vm3864_vm3, %v8625_v55  ;;  %v8595_v10 = vadd.f32 %v13869_v39, %v8461_v37 }
 0x687   : > { %v8628_v52 = vmax.f32 %v8596_v0, 0.0 }
 0x688   : > { %v8627_v62 = vmax.f32 %v8595_v10, 0.0  ;;  %v11203_v56 = vpop.f32.mrb[50].mxu1 }
 0x689   : > { %9460 = vst.msk [vmem:[%s13882_s25 + $0x118] sm:$0xff] %vm3864_vm3, %v8628_v52  ;;  %v8598_v51 = vadd.f32 %v11203_v56, %v13869_v39  ;;  %v8471_v58 = vpop.f32.mrb[51].mxu1 }
 0x68a   : > { %9459 = vst.msk [vmem:[%s13882_s25 + $0x110] sm:$0xff] %vm3864_vm3, %v8627_v62  ;;  %v8597_v16 = vadd.f32 %v13869_v39, %v8471_v58 }
 0x68b   : > { %v8630_v25 = vmax.f32 %v8598_v51, 0.0 }
 0x68c   : > { %v8629_v38 = vmax.f32 %v8597_v16, 0.0  ;;  %v11206_v42 = vpop.f32.mrb[52].mxu1 }
 0x68d   : > { %9462 = vst.msk [vmem:[%s13882_s25 + $0x138] sm:$0xff] %vm3864_vm3, %v8630_v25  ;;  %v8600_v21 = vadd.f32 %v11206_v42, %v13869_v39  ;;  %v8481_v2 = vpop.f32.mrb[53].mxu1 }
 0x68e   : > { %9461 = vst.msk [vmem:[%s13882_s25 + $0x130] sm:$0xff] %vm3864_vm3, %v8629_v38  ;;  %v8599_v28 = vadd.f32 %v13869_v39, %v8481_v2 }
 0x68f   : > { %v8632_v9 = vmax.f32 %v8600_v21, 0.0 }
 0x690   : > { %v8631_v13 = vmax.f32 %v8599_v28, 0.0  ;;  %v11209_v53 = vpop.f32.mrb[54].mxu1 }
 0x691   : > { %9464 = vst.msk [vmem:[%s13882_s25 + $0x158] sm:$0xff] %vm3864_vm3, %v8632_v9  ;;  %v8602_v22 = vadd.f32 %v11209_v53, %v13869_v39  ;;  %v8491_v14 = vpop.f32.mrb[55].mxu1 }
 0x692   : > { %9463 = vst.msk [vmem:[%s13882_s25 + $0x150] sm:$0xff] %vm3864_vm3, %v8631_v13  ;;  %v8601_v15 = vadd.f32 %v13869_v39, %v8491_v14 }
 0x693   : > { %v8634_v18 = vmax.f32 %v8602_v22, 0.0 }
 0x694   : > { %v8633_v20 = vmax.f32 %v8601_v15, 0.0  ;;  %v11212_v27 = vpop.f32.mrb[56].mxu1 }
 0x695   : > { %9466 = vst.msk [vmem:[%s13882_s25 + $0x178] sm:$0xff] %vm3864_vm3, %v8634_v18  ;;  %v8604_v17 = vadd.f32 %v11212_v27, %v13869_v39  ;;  %v8501_v7 = vpop.f32.mrb[57].mxu1 }
 0x696   : > { %9465 = vst.msk [vmem:[%s13882_s25 + $0x170] sm:$0xff] %vm3864_vm3, %v8633_v20  ;;  %v8603_v19 = vadd.f32 %v13869_v39, %v8501_v7 }
 0x697   : > { %v8636_v11 = vmax.f32 %v8604_v17, 0.0 }
 0x698   : > { %v8635_v48 = vmax.f32 %v8603_v19, 0.0  ;;  %v11215_v47 = vpop.f32.mrb[58].mxu1 }
 0x699   : > { %9468 = vst.msk [vmem:[%s13882_s25 + $0x198] sm:$0xff] %vm3864_vm3, %v8636_v11  ;;  %v8606_v1 = vadd.f32 %v11215_v47, %v13869_v39  ;;  %v8511_v31 = vpop.f32.mrb[59].mxu1 }
 0x69a   : > { %9467 = vst.msk [vmem:[%s13882_s25 + $0x190] sm:$0xff] %vm3864_vm3, %v8635_v48  ;;  %v8605_v32 = vadd.f32 %v13869_v39, %v8511_v31 }
 0x69b   : > { %v8638_v5 = vmax.f32 %v8606_v1, 0.0 }
 0x69c   : > { %v8637_v30 = vmax.f32 %v8605_v32, 0.0  ;;  %v11218_v33 = vpop.f32.mrb[60].mxu1 }
 0x69d   : > { %9470 = vst.msk [vmem:[%s13882_s25 + $0x1b8] sm:$0xff] %vm3864_vm3, %v8638_v5  ;;  %v8608_v35 = vadd.f32 %v11218_v33, %v13869_v39  ;;  %v8521_v23 = vpop.f32.mrb[61].mxu1 }
 0x69e   : > { %9469 = vst.msk [vmem:[%s13882_s25 + $0x1b0] sm:$0xff] %vm3864_vm3, %v8637_v30  ;;  %v8607_v45 = vadd.f32 %v13869_v39, %v8521_v23 }
 0x69f   : > { %v8640_v49 = vmax.f32 %v8608_v35, 0.0 }
 0x6a0   : > { %v8639_v54 = vmax.f32 %v8607_v45, 0.0  ;;  %v11221_v57 = vpop.f32.mrb[62].mxu1 }
 0x6a1   : > { %9472 = vst.msk [vmem:[%s13882_s25 + $0x1d8] sm:$0xff] %vm3864_vm3, %v8640_v49  ;;  %v8610_v29 = vadd.f32 %v11221_v57, %v13869_v39  ;;  %v8531_v59 = vpop.f32.mrb[63].mxu1 }
 0x6a2   : > { %9471 = vst.msk [vmem:[%s13882_s25 + $0x1d0] sm:$0xff] %vm3864_vm3, %v8639_v54  ;;  %v8609_v60 = vadd.f32 %v13869_v39, %v8531_v59 }
 0x6a3   : > { %v8642_v61 = vmax.f32 %v8610_v29, 0.0 }
 0x6a4   : > { %v8641_v63 = vmax.f32 %v8609_v60, 0.0 }
 0x6a5   : > { %9474 = vst.msk [vmem:[%s13882_s25 + $0x1f8] sm:$0xff] %vm3864_vm3, %v8642_v61 }
 0x6a6   : > { %9473 = vst.msk [vmem:[%s13882_s25 + $0x1f0] sm:$0xff] %vm3864_vm3, %v8641_v63 }
 0x6a7 PF: > { %s15_s18 = sadd.s32 1, %s11815_s18  }
 0x6a8   : > { %p12_p4 = scmp.ge.s32.totalorder %s15_s18, 4  }
 0x6aa   :  { %14 = sbr.rel (!%p12_p4) target bundleno = 1 (0x1), region = 94 }

</bundles_post_ra>
